<compile_context>
chip_gen: v7x
topology: tpu7x:2x2x1
jax: 0.10.0
libtpu: 0.0.40
codegen_flags: <defaults>
</compile_context>

<pallas_src>
import functools
import math

import jax
import jax.numpy as jnp
from jax import lax
from jax.experimental import pallas as pl
from jax.experimental.pallas import tpu as pltpu


def _resblock_kernel(x_ref, mask_ref, w1_ref, b1_ref, w2_ref, b2_ref, out_ref,
                     h_ref, *, TH, W, C, res_scale):
    """One (batch, row-tile) step of Conv3x3 -> ReLU -> Conv3x3 -> residual.

    Flat-row layout: zero-padded rows of width P = W+2 are flattened, so a 3x3
    tap (di, dj) is a contiguous row range at offset di*P + dj.

    x_ref   : (R1, C)  R1=(TH+5)*P  input slab: tile rows + 2-row halo each side,
                       horizontally zero-padded and flattened.
    mask_ref: (L1, 1)  L1=(TH+2)*P  1.0 on real hidden pixels, 0.0 on the
                       flat-row wrap columns and out-of-image halo rows.
    w1_ref  : (9C, C)  conv1 weights, rows ordered (di, dj, cin)
    b1_ref  : (1, C)   f32
    w2_ref  : (9C, C)  conv2 weights
    b2_ref  : (1, C)   f32
    out_ref : (L2, C)  L2=TH*P flat output rows (wrap cols are junk, dropped by
                       the wrapper)
    h_ref   : (R2, C)  R2=(TH+3)*P zero-padded hidden activation scratch
    """
    P = W + 2
    C3 = 3 * C
    L1 = (TH + 2) * P      # hidden rows produced by conv1 (incl. 1-row halo)
    L2 = TH * P            # output rows produced by conv2
    R2 = (TH + 3) * P      # padded hidden scratch rows

    def conv3x3(read_rows, w_ref, rows):
        # 3 MXU passes: per di, im2col the 3 dj taps into (rows, 3C) and do a
        # single (rows,3C)@(3C,C) dot.  Accumulate in registers, f32.
        acc = None
        for di in range(3):
            base = di * P
            patch = jnp.concatenate(
                [read_rows(base + dj, rows) for dj in range(3)], axis=-1)
            w_di = w_ref[pl.ds(di * C3, C3), :]
            contrib = jnp.dot(patch, w_di, preferred_element_type=jnp.float32)
            acc = contrib if acc is None else acc + contrib
        return acc

    # ---- conv1 over the tile + 1 halo image-row on each side ----------------
    def x_rows(off, n):
        return x_ref[pl.ds(off, n), :]

    acc1 = conv3x3(x_rows, w1_ref, L1)
    hidden = jnp.maximum(acc1 + b1_ref[...].astype(jnp.float32), 0.0)
    hidden = hidden * mask_ref[...]    # zero wrap cols & out-of-image halo rows

    # Store the padded hidden activation.  Shifting the store by +1 flat row
    # turns the (zeroed) wrap columns into the horizontal zero padding.
    h_ref[pl.ds(0, 1), :] = jnp.zeros((1, C), h_ref.dtype)
    h_ref[pl.ds(1, L1), :] = hidden.astype(h_ref.dtype)
    tail = R2 - (L1 + 1)
    h_ref[pl.ds(L1 + 1, tail), :] = jnp.zeros((tail, C), h_ref.dtype)

    # ---- conv2 over the padded hidden activation ----------------------------
    def h_rows(off, n):
        return h_ref[pl.ds(off, n), :]

    acc2 = conv3x3(h_rows, w2_ref, L2)
    conv2 = acc2 + b2_ref[...].astype(jnp.float32)

    # ---- residual: re-read centre pixels of the (resident) input slab -------
    identity = x_ref[pl.ds(2 * P + 1, L2), :].astype(jnp.float32)
    out_ref[...] = (identity + conv2 * jnp.float32(res_scale)).astype(out_ref.dtype)


def _pick_tile_h(H, W, tile_h=None):
    """Tile height must divide H and be a multiple of 8 (or equal H)."""
    P = W + 2

    def ok(th):
        return H % th == 0 and (th == H or th % 8 == 0)

    if tile_h is not None and ok(tile_h):
        return tile_h
    best = H
    for th in range(8, H + 1, 8):
        if ok(th) and th * P <= 2048:   # keep per-tile flat rows VMEM-friendly
            best = th
    return best


def residual_block_no_bn(x_nchw, w1, b1, w2, b2, res_scale=1.0, tile_h=None):
    """x_nchw: (N, C, H, W); w1/w2: (3, 3, Cin, Cout) HWIO; b1/b2: (C,)."""
    N, C, H, W = x_nchw.shape
    P = W + 2
    TH = _pick_tile_h(H, W, tile_h)
    T = H // TH
    L1 = (TH + 2) * P
    L2 = TH * P
    R1 = (TH + 5) * P
    R2 = (TH + 3) * P

    # NCHW -> NHWC, zero-pad (top 2, bottom 3, left 1, right 1) and slice into
    # per-tile slabs of TH+5 padded rows (2-row halo + flat-row read slack),
    # flattened so every 3x3 tap is a contiguous row range inside the kernel.
    # TODO(synk): feed NHWC end-to-end and build the halo with in-kernel DMA to
    # drop these host-side HBM passes.
    x = jnp.transpose(x_nchw, (0, 2, 3, 1))
    xp = jnp.pad(x, ((0, 0), (2, 3), (1, 1), (0, 0)))            # (N, H+5, P, C)
    row_start = jnp.arange(T) * TH
    rows = row_start[:, None] + jnp.arange(TH + 5)[None, :]       # (T, TH+5)
    slabs = xp[:, rows, :, :].reshape(N, T, R1, C)

    # Hidden-validity mask per tile: zero on the flat-row wrap columns
    # (w in {W, W+1}) and on halo rows that fall outside the image.
    r = jnp.arange(TH + 2)
    col_ok = jnp.arange(P) < W
    img_row = row_start[:, None] + (r - 1)[None, :]                # (T, TH+2)
    row_ok = (img_row >= 0) & (img_row < H)
    mask = (row_ok[:, :, None] & col_ok[None, None, :]).astype(jnp.float32)
    mask = mask.reshape(T, L1, 1)

    # Flat weights, rows ordered (di, dj, cin); per-di chunks are (3C, C).
    w1_2d = w1.reshape(9 * C, C).astype(x.dtype)
    w2_2d = w2.reshape(9 * C, C).astype(x.dtype)
    b1_2d = b1.reshape(1, C).astype(jnp.float32)
    b2_2d = b2.reshape(1, C).astype(jnp.float32)

    kernel = functools.partial(_resblock_kernel, TH=TH, W=W, C=C,
                               res_scale=float(res_scale))

    # Scoped-VMEM budget: double-buffered blocks + hidden scratch, with slack.
    def _pad(rr, cc, isz):
        return (-(-rr // 8) * 8) * (-(-cc // 128) * 128) * isz
    isz = x.dtype.itemsize
    need = (2 * (_pad(R1, C, isz) + _pad(L1, 1, 4) + _pad(L2, C, isz)
                 + _pad(9 * C, C, isz) + _pad(1, C, 4))
            + _pad(R2, C, isz))
    vmem_limit = int(min(64 * 2**20, max(16 * 2**20, 4 * need)))

    out_flat = pl.pallas_call(
        kernel,
        out_shape=jax.ShapeDtypeStruct((N, H * P, C), x.dtype),
        grid_spec=pltpu.PrefetchScalarGridSpec(
            num_scalar_prefetch=0,
            grid=(N, T),
            in_specs=[
                pl.BlockSpec((None, None, R1, C), lambda n, t: (n, t, 0, 0)),
                pl.BlockSpec((None, L1, 1), lambda n, t: (t, 0, 0)),
                pl.BlockSpec((9 * C, C), lambda n, t: (0, 0)),
                pl.BlockSpec((1, C), lambda n, t: (0, 0)),
                pl.BlockSpec((9 * C, C), lambda n, t: (0, 0)),
                pl.BlockSpec((1, C), lambda n, t: (0, 0)),
            ],
            out_specs=pl.BlockSpec((None, L2, C), lambda n, t: (n, t, 0)),
            scratch_shapes=[
                pltpu.VMEM((R2, C), x.dtype),    # padded hidden activation
            ],
        ),
        compiler_params=pltpu.CompilerParams(
            dimension_semantics=("parallel", "parallel"),
            vmem_limit_bytes=vmem_limit),
    )(slabs, mask, w1_2d, b1_2d, w2_2d, b2_2d)

    # Drop the 2 junk wrap columns per row and go back to NCHW.
    out = out_flat.reshape(N, H, P, C)[:, :, :W, :]
    return jnp.transpose(out, (0, 3, 1, 2))


def _init_conv_params(key, num_feat, scale=0.1):
    """kaiming_normal_ (fan_in, relu gain) * scale, like default_init_weights.
    Weights in HWIO layout (3, 3, Cin, Cout)."""
    fan_in = num_feat * 3 * 3
    std = math.sqrt(2.0) / math.sqrt(fan_in)
    w = jax.random.normal(key, (3, 3, num_feat, num_feat), jnp.float32) * std * scale
    b = jnp.zeros((num_feat,), jnp.float32)
    return w, b


def _reference(x_nchw, w1, b1, w2, b2, res_scale):
    """Pure-JAX reference (lax.conv) for correctness checking."""
    x = jnp.transpose(x_nchw, (0, 2, 3, 1))
    dn = lax.conv_dimension_numbers(x.shape, w1.shape, ("NHWC", "HWIO", "NHWC"))
    h = lax.conv_general_dilated(x, w1, (1, 1), "SAME", dimension_numbers=dn)
    h = jnp.maximum(h + b1[None, None, None, :], 0.0)
    o = lax.conv_general_dilated(h, w2, (1, 1), "SAME", dimension_numbers=dn)
    o = o + b2[None, None, None, :]
    out = x + o * res_scale
    return jnp.transpose(out, (0, 3, 1, 2))


if __name__ == "__main__":
    key = jax.random.PRNGKey(0)
    k_x, k_w1, k_w2, k_b1, k_b2 = jax.random.split(key, 5)

    N, C, H, W = 2, 8, 16, 16        # small num_feat instead of default 64
    res_scale = 1.0

    x = jax.random.normal(k_x, (N, C, H, W), jnp.float32)
    w1, b1 = _init_conv_params(k_w1, C, scale=0.1)
    w2, b2 = _init_conv_params(k_w2, C, scale=0.1)
    # non-zero biases so the bias path is actually exercised by the check
    b1 = 0.05 * jax.random.normal(k_b1, (C,), jnp.float32)
    b2 = 0.05 * jax.random.normal(k_b2, (C,), jnp.float32)

    # tile_h=8 -> 2 row tiles per image, exercising the (N, T) tiled pipeline.
    out = residual_block_no_bn(x, w1, b1, w2, b2, res_scale, tile_h=8)
    out = jax.block_until_ready(out)

    ref = _reference(x, w1, b1, w2, b2, res_scale)
    assert out.shape == (N, C, H, W)
    assert jnp.allclose(out, ref, atol=2e-5, rtol=2e-5), "mismatch vs reference"

    print("KERNEL_OK")
</pallas_src>

<mosaic_0001>
module attributes {stable_mosaic.version = 11 : i64} {
  func.func @_resblock_kernel(%arg0: i32, %arg1: i32, %arg2: memref<1x1x234x8xf32, #tpu.memory_space<vmem>>, %arg3: memref<1x180x1xf32, #tpu.memory_space<vmem>>, %arg4: memref<72x8xf32, #tpu.memory_space<vmem>>, %arg5: memref<1x8xf32, #tpu.memory_space<vmem>>, %arg6: memref<72x8xf32, #tpu.memory_space<vmem>>, %arg7: memref<1x8xf32, #tpu.memory_space<vmem>>, %arg8: memref<1x144x8xf32, #tpu.memory_space<vmem>>, %arg9: memref<198x8xf32, #tpu.memory_space<vmem>>) attributes {dimension_semantics = [#tpu.dimension_semantics<parallel>, #tpu.dimension_semantics<parallel>], iteration_bounds = array<i64: 2, 2>, scalar_prefetch = 0 : i64, scratch_operands = 1 : i64, tpu.core_type = #tpu.core_type<tc>, window_params = [{transform_indices = @transform_0, window_bounds = array<i64: 1, 1, 234, 8>}, {transform_indices = @transform_1, window_bounds = array<i64: 1, 180, 1>}, {pipeline_mode = #tpu.pipeline_mode<synchronous>, transform_indices = @transform_2, window_bounds = array<i64: 72, 8>}, {pipeline_mode = #tpu.pipeline_mode<synchronous>, transform_indices = @transform_3, window_bounds = array<i64: 1, 8>}, {pipeline_mode = #tpu.pipeline_mode<synchronous>, transform_indices = @transform_4, window_bounds = array<i64: 72, 8>}, {pipeline_mode = #tpu.pipeline_mode<synchronous>, transform_indices = @transform_5, window_bounds = array<i64: 1, 8>}, {transform_indices = @transform_6, window_bounds = array<i64: 1, 144, 8>}]} {
    %c0 = arith.constant 0 : index
    %c0_0 = arith.constant 0 : index
    %c0_1 = arith.constant 0 : index
    %c0_2 = arith.constant 0 : index
    %0 = vector.load %arg2[%c0, %c0_0, %c0_1, %c0_2] : memref<1x1x234x8xf32, #tpu.memory_space<vmem>>, vector<1x1x180x8xf32>
    %1 = vector.shape_cast %0 : vector<1x1x180x8xf32> to vector<180x8xf32>
    %c0_3 = arith.constant 0 : index
    %c0_4 = arith.constant 0 : index
    %c1 = arith.constant 1 : index
    %c0_5 = arith.constant 0 : index
    %2 = vector.load %arg2[%c0_3, %c0_4, %c1, %c0_5] : memref<1x1x234x8xf32, #tpu.memory_space<vmem>>, vector<1x1x180x8xf32>
    %3 = vector.shape_cast %2 : vector<1x1x180x8xf32> to vector<180x8xf32>
    %c0_6 = arith.constant 0 : index
    %c0_7 = arith.constant 0 : index
    %c2 = arith.constant 2 : index
    %c0_8 = arith.constant 0 : index
    %4 = vector.load %arg2[%c0_6, %c0_7, %c2, %c0_8] : memref<1x1x234x8xf32, #tpu.memory_space<vmem>>, vector<1x1x180x8xf32>
    %5 = vector.shape_cast %4 : vector<1x1x180x8xf32> to vector<180x8xf32>
    %6 = tpu.concatenate %1, %3, %5 in 1 : vector<180x8xf32>, vector<180x8xf32>, vector<180x8xf32> -> vector<180x24xf32>
    %c0_9 = arith.constant 0 : index
    %c0_10 = arith.constant 0 : index
    %7 = vector.load %arg4[%c0_9, %c0_10] : memref<72x8xf32, #tpu.memory_space<vmem>>, vector<24x8xf32>
    %cst = arith.constant dense<0.000000e+00> : vector<180x8xf32>
    %8 = tpu.matmul %6, %7, %cst {dimension_numbers = #tpu.dot_dimension_numbers<[1], [0], [0], [1], [0, 0, 1, 1], [], []>} : vector<180x24xf32>, vector<24x8xf32>, vector<180x8xf32> -> vector<180x8xf32>
    %c0_11 = arith.constant 0 : index
    %c0_12 = arith.constant 0 : index
    %c18 = arith.constant 18 : index
    %c0_13 = arith.constant 0 : index
    %9 = vector.load %arg2[%c0_11, %c0_12, %c18, %c0_13] : memref<1x1x234x8xf32, #tpu.memory_space<vmem>>, vector<1x1x180x8xf32>
    %10 = vector.shape_cast %9 : vector<1x1x180x8xf32> to vector<180x8xf32>
    %c0_14 = arith.constant 0 : index
    %c0_15 = arith.constant 0 : index
    %c19 = arith.constant 19 : index
    %c0_16 = arith.constant 0 : index
    %11 = vector.load %arg2[%c0_14, %c0_15, %c19, %c0_16] : memref<1x1x234x8xf32, #tpu.memory_space<vmem>>, vector<1x1x180x8xf32>
    %12 = vector.shape_cast %11 : vector<1x1x180x8xf32> to vector<180x8xf32>
    %c0_17 = arith.constant 0 : index
    %c0_18 = arith.constant 0 : index
    %c20 = arith.constant 20 : index
    %c0_19 = arith.constant 0 : index
    %13 = vector.load %arg2[%c0_17, %c0_18, %c20, %c0_19] : memref<1x1x234x8xf32, #tpu.memory_space<vmem>>, vector<1x1x180x8xf32>
    %14 = vector.shape_cast %13 : vector<1x1x180x8xf32> to vector<180x8xf32>
    %15 = tpu.concatenate %10, %12, %14 in 1 : vector<180x8xf32>, vector<180x8xf32>, vector<180x8xf32> -> vector<180x24xf32>
    %c24 = arith.constant 24 : index
    %c0_20 = arith.constant 0 : index
    %16 = vector.load %arg4[%c24, %c0_20] : memref<72x8xf32, #tpu.memory_space<vmem>>, vector<24x8xf32>
    %cst_21 = arith.constant dense<0.000000e+00> : vector<180x8xf32>
    %17 = tpu.matmul %15, %16, %cst_21 {dimension_numbers = #tpu.dot_dimension_numbers<[1], [0], [0], [1], [0, 0, 1, 1], [], []>} : vector<180x24xf32>, vector<24x8xf32>, vector<180x8xf32> -> vector<180x8xf32>
    %18 = arith.addf %8, %17 : vector<180x8xf32>
    %c0_22 = arith.constant 0 : index
    %c0_23 = arith.constant 0 : index
    %c36 = arith.constant 36 : index
    %c0_24 = arith.constant 0 : index
    %19 = vector.load %arg2[%c0_22, %c0_23, %c36, %c0_24] : memref<1x1x234x8xf32, #tpu.memory_space<vmem>>, vector<1x1x180x8xf32>
    %20 = vector.shape_cast %19 : vector<1x1x180x8xf32> to vector<180x8xf32>
    %c0_25 = arith.constant 0 : index
    %c0_26 = arith.constant 0 : index
    %c37 = arith.constant 37 : index
    %c0_27 = arith.constant 0 : index
    %21 = vector.load %arg2[%c0_25, %c0_26, %c37, %c0_27] : memref<1x1x234x8xf32, #tpu.memory_space<vmem>>, vector<1x1x180x8xf32>
    %22 = vector.shape_cast %21 : vector<1x1x180x8xf32> to vector<180x8xf32>
    %c0_28 = arith.constant 0 : index
    %c0_29 = arith.constant 0 : index
    %c38 = arith.constant 38 : index
    %c0_30 = arith.constant 0 : index
    %23 = vector.load %arg2[%c0_28, %c0_29, %c38, %c0_30] : memref<1x1x234x8xf32, #tpu.memory_space<vmem>>, vector<1x1x180x8xf32>
    %24 = vector.shape_cast %23 : vector<1x1x180x8xf32> to vector<180x8xf32>
    %25 = tpu.concatenate %20, %22, %24 in 1 : vector<180x8xf32>, vector<180x8xf32>, vector<180x8xf32> -> vector<180x24xf32>
    %c48 = arith.constant 48 : index
    %c0_31 = arith.constant 0 : index
    %26 = vector.load %arg4[%c48, %c0_31] : memref<72x8xf32, #tpu.memory_space<vmem>>, vector<24x8xf32>
    %cst_32 = arith.constant dense<0.000000e+00> : vector<180x8xf32>
    %27 = tpu.matmul %25, %26, %cst_32 {dimension_numbers = #tpu.dot_dimension_numbers<[1], [0], [0], [1], [0, 0, 1, 1], [], []>} : vector<180x24xf32>, vector<24x8xf32>, vector<180x8xf32> -> vector<180x8xf32>
    %28 = arith.addf %18, %27 : vector<180x8xf32>
    %c0_33 = arith.constant 0 : index
    %c0_34 = arith.constant 0 : index
    %29 = vector.load %arg5[%c0_33, %c0_34] : memref<1x8xf32, #tpu.memory_space<vmem>>, vector<1x8xf32>
    %30 = vector.broadcast %29 : vector<1x8xf32> to vector<180x8xf32>
    %31 = arith.addf %28, %30 : vector<180x8xf32>
    %cst_35 = arith.constant 0.000000e+00 : f32
    %32 = vector.broadcast %cst_35 : f32 to vector<180x8xf32>
    %33 = arith.maximumf %31, %32 : vector<180x8xf32>
    %c0_36 = arith.constant 0 : index
    %c0_37 = arith.constant 0 : index
    %c0_38 = arith.constant 0 : index
    %34 = vector.load %arg3[%c0_36, %c0_37, %c0_38] : memref<1x180x1xf32, #tpu.memory_space<vmem>>, vector<1x180x1xf32>
    %35 = vector.shape_cast %34 : vector<1x180x1xf32> to vector<180x1xf32>
    %36 = vector.broadcast %35 : vector<180x1xf32> to vector<180x8xf32>
    %37 = arith.mulf %33, %36 : vector<180x8xf32>
    %cst_39 = arith.constant 0.000000e+00 : f32
    %38 = vector.broadcast %cst_39 : f32 to vector<1x8xf32>
    %c0_40 = arith.constant 0 : index
    %c0_41 = arith.constant 0 : index
    %39 = vector.load %arg9[%c0_40, %c0_41] : memref<198x8xf32, #tpu.memory_space<vmem>>, vector<1x8xf32>
    tpu.vector_store %arg9[%c0_40, %c0_41], %38 {strides = array<i32>} : memref<198x8xf32, #tpu.memory_space<vmem>>, vector<1x8xf32>,
    %c1_42 = arith.constant 1 : index
    %c0_43 = arith.constant 0 : index
    %40 = vector.load %arg9[%c1_42, %c0_43] : memref<198x8xf32, #tpu.memory_space<vmem>>, vector<180x8xf32>
    tpu.vector_store %arg9[%c1_42, %c0_43], %37 {strides = array<i32>} : memref<198x8xf32, #tpu.memory_space<vmem>>, vector<180x8xf32>,
    %cst_44 = arith.constant 0.000000e+00 : f32
    %41 = vector.broadcast %cst_44 : f32 to vector<17x8xf32>
    %c181 = arith.constant 181 : index
    %c0_45 = arith.constant 0 : index
    %42 = vector.load %arg9[%c181, %c0_45] : memref<198x8xf32, #tpu.memory_space<vmem>>, vector<17x8xf32>
    tpu.vector_store %arg9[%c181, %c0_45], %41 {strides = array<i32>} : memref<198x8xf32, #tpu.memory_space<vmem>>, vector<17x8xf32>,
    %c0_46 = arith.constant 0 : index
    %c0_47 = arith.constant 0 : index
    %43 = vector.load %arg9[%c0_46, %c0_47] : memref<198x8xf32, #tpu.memory_space<vmem>>, vector<144x8xf32>
    %c1_48 = arith.constant 1 : index
    %c0_49 = arith.constant 0 : index
    %44 = vector.load %arg9[%c1_48, %c0_49] : memref<198x8xf32, #tpu.memory_space<vmem>>, vector<144x8xf32>
    %c2_50 = arith.constant 2 : index
    %c0_51 = arith.constant 0 : index
    %45 = vector.load %arg9[%c2_50, %c0_51] : memref<198x8xf32, #tpu.memory_space<vmem>>, vector<144x8xf32>
    %46 = tpu.concatenate %43, %44, %45 in 1 : vector<144x8xf32>, vector<144x8xf32>, vector<144x8xf32> -> vector<144x24xf32>
    %c0_52 = arith.constant 0 : index
    %c0_53 = arith.constant 0 : index
    %47 = vector.load %arg6[%c0_52, %c0_53] : memref<72x8xf32, #tpu.memory_space<vmem>>, vector<24x8xf32>
    %cst_54 = arith.constant dense<0.000000e+00> : vector<144x8xf32>
    %48 = tpu.matmul %46, %47, %cst_54 {dimension_numbers = #tpu.dot_dimension_numbers<[1], [0], [0], [1], [0, 0, 1, 1], [], []>} : vector<144x24xf32>, vector<24x8xf32>, vector<144x8xf32> -> vector<144x8xf32>
    %c18_55 = arith.constant 18 : index
    %c0_56 = arith.constant 0 : index
    %49 = vector.load %arg9[%c18_55, %c0_56] : memref<198x8xf32, #tpu.memory_space<vmem>>, vector<144x8xf32>
    %c19_57 = arith.constant 19 : index
    %c0_58 = arith.constant 0 : index
    %50 = vector.load %arg9[%c19_57, %c0_58] : memref<198x8xf32, #tpu.memory_space<vmem>>, vector<144x8xf32>
    %c20_59 = arith.constant 20 : index
    %c0_60 = arith.constant 0 : index
    %51 = vector.load %arg9[%c20_59, %c0_60] : memref<198x8xf32, #tpu.memory_space<vmem>>, vector<144x8xf32>
    %52 = tpu.concatenate %49, %50, %51 in 1 : vector<144x8xf32>, vector<144x8xf32>, vector<144x8xf32> -> vector<144x24xf32>
    %c24_61 = arith.constant 24 : index
    %c0_62 = arith.constant 0 : index
    %53 = vector.load %arg6[%c24_61, %c0_62] : memref<72x8xf32, #tpu.memory_space<vmem>>, vector<24x8xf32>
    %cst_63 = arith.constant dense<0.000000e+00> : vector<144x8xf32>
    %54 = tpu.matmul %52, %53, %cst_63 {dimension_numbers = #tpu.dot_dimension_numbers<[1], [0], [0], [1], [0, 0, 1, 1], [], []>} : vector<144x24xf32>, vector<24x8xf32>, vector<144x8xf32> -> vector<144x8xf32>
    %55 = arith.addf %48, %54 : vector<144x8xf32>
    %c36_64 = arith.constant 36 : index
    %c0_65 = arith.constant 0 : index
    %56 = vector.load %arg9[%c36_64, %c0_65] : memref<198x8xf32, #tpu.memory_space<vmem>>, vector<144x8xf32>
    %c37_66 = arith.constant 37 : index
    %c0_67 = arith.constant 0 : index
    %57 = vector.load %arg9[%c37_66, %c0_67] : memref<198x8xf32, #tpu.memory_space<vmem>>, vector<144x8xf32>
    %c38_68 = arith.constant 38 : index
    %c0_69 = arith.constant 0 : index
    %58 = vector.load %arg9[%c38_68, %c0_69] : memref<198x8xf32, #tpu.memory_space<vmem>>, vector<144x8xf32>
    %59 = tpu.concatenate %56, %57, %58 in 1 : vector<144x8xf32>, vector<144x8xf32>, vector<144x8xf32> -> vector<144x24xf32>
    %c48_70 = arith.constant 48 : index
    %c0_71 = arith.constant 0 : index
    %60 = vector.load %arg6[%c48_70, %c0_71] : memref<72x8xf32, #tpu.memory_space<vmem>>, vector<24x8xf32>
    %cst_72 = arith.constant dense<0.000000e+00> : vector<144x8xf32>
    %61 = tpu.matmul %59, %60, %cst_72 {dimension_numbers = #tpu.dot_dimension_numbers<[1], [0], [0], [1], [0, 0, 1, 1], [], []>} : vector<144x24xf32>, vector<24x8xf32>, vector<144x8xf32> -> vector<144x8xf32>
    %62 = arith.addf %55, %61 : vector<144x8xf32>
    %c0_73 = arith.constant 0 : index
    %c0_74 = arith.constant 0 : index
    %63 = vector.load %arg7[%c0_73, %c0_74] : memref<1x8xf32, #tpu.memory_space<vmem>>, vector<1x8xf32>
    %64 = vector.broadcast %63 : vector<1x8xf32> to vector<144x8xf32>
    %65 = arith.addf %62, %64 : vector<144x8xf32>
    %c0_75 = arith.constant 0 : index
    %c0_76 = arith.constant 0 : index
    %c37_77 = arith.constant 37 : index
    %c0_78 = arith.constant 0 : index
    %66 = vector.load %arg2[%c0_75, %c0_76, %c37_77, %c0_78] : memref<1x1x234x8xf32, #tpu.memory_space<vmem>>, vector<1x1x144x8xf32>
    %67 = vector.shape_cast %66 : vector<1x1x144x8xf32> to vector<144x8xf32>
    %cst_79 = arith.constant 1.000000e+00 : f32
    %68 = vector.broadcast %cst_79 : f32 to vector<144x8xf32>
    %69 = arith.mulf %65, %68 : vector<144x8xf32>
    %70 = arith.addf %67, %69 : vector<144x8xf32>
    %c0_80 = arith.constant 0 : index
    %c0_81 = arith.constant 0 : index
    %c0_82 = arith.constant 0 : index
    %71 = vector.load %arg8[%c0_80, %c0_81, %c0_82] : memref<1x144x8xf32, #tpu.memory_space<vmem>>, vector<1x144x8xf32>
    %72 = vector.shape_cast %71 : vector<1x144x8xf32> to vector<144x8xf32>
    %73 = vector.shape_cast %70 : vector<144x8xf32> to vector<1x144x8xf32>
    tpu.vector_store %arg8[%c0_80, %c0_81, %c0_82], %73 {strides = array<i32>} : memref<1x144x8xf32, #tpu.memory_space<vmem>>, vector<1x144x8xf32>,
    return
  }
  func.func @transform_0(%arg0: i32, %arg1: i32) -> (i32, i32, i32, i32) {
    %c0_i32 = arith.constant 0 : i32
    %c0_i32_0 = arith.constant 0 : i32
    %c0_i32_1 = arith.constant 0 : i32
    return %arg0, %arg1, %c0_i32, %c0_i32_0 : i32, i32, i32, i32
  }
  func.func @transform_1(%arg0: i32, %arg1: i32) -> (i32, i32, i32) {
    %c0_i32 = arith.constant 0 : i32
    %c0_i32_0 = arith.constant 0 : i32
    %c0_i32_1 = arith.constant 0 : i32
    return %arg1, %c0_i32, %c0_i32_0 : i32, i32, i32
  }
  func.func @transform_2(%arg0: i32, %arg1: i32) -> (i32, i32) {
    %c0_i32 = arith.constant 0 : i32
    %c0_i32_0 = arith.constant 0 : i32
    %c0_i32_1 = arith.constant 0 : i32
    return %c0_i32, %c0_i32_0 : i32, i32
  }
  func.func @transform_3(%arg0: i32, %arg1: i32) -> (i32, i32) {
    %c0_i32 = arith.constant 0 : i32
    %c0_i32_0 = arith.constant 0 : i32
    %c0_i32_1 = arith.constant 0 : i32
    return %c0_i32, %c0_i32_0 : i32, i32
  }
  func.func @transform_4(%arg0: i32, %arg1: i32) -> (i32, i32) {
    %c0_i32 = arith.constant 0 : i32
    %c0_i32_0 = arith.constant 0 : i32
    %c0_i32_1 = arith.constant 0 : i32
    return %c0_i32, %c0_i32_0 : i32, i32
  }
  func.func @transform_5(%arg0: i32, %arg1: i32) -> (i32, i32) {
    %c0_i32 = arith.constant 0 : i32
    %c0_i32_0 = arith.constant 0 : i32
    %c0_i32_1 = arith.constant 0 : i32
    return %c0_i32, %c0_i32_0 : i32, i32
  }
  func.func @transform_6(%arg0: i32, %arg1: i32) -> (i32, i32, i32) {
    %c0_i32 = arith.constant 0 : i32
    %c0_i32_0 = arith.constant 0 : i32
    return %arg0, %arg1, %c0_i32 : i32, i32, i32
  }
}

</mosaic_0001>

<bundles_post_ra>
// kernel: tpu_custom_call.1
= control target key start
LH: loop header
LB: loop body
LE: loop exit
PB: predicated region body
PF: predicated region fallthrough
CT: control target
= control target key end

     0   :  { %s4532_s21 = smov 0   ;;  %s4534_s22 = smov 0   ;;  %s6178_s0 = inlined_call_operand.vmem [shape: f32[2,2,234,8], index: 0, kind: input, shape index: {}]   ;;  %s6179_s1 = inlined_call_operand.vmem [shape: f32[2,180,1], index: 1, kind: input, shape index: {}]   ;;  %s6180_s2 = inlined_call_operand.vmem [shape: f32[72,8], index: 2, kind: input, shape index: {}]   ;;  %s6181_s3 = inlined_call_operand.vmem [shape: f32[1,8], index: 3, kind: input, shape index: {}]   ;;  %s6182_s4 = inlined_call_operand.vmem [shape: f32[72,8], index: 4, kind: input, shape index: {}]   ;;  %s6183_s5 = inlined_call_operand.vmem [shape: f32[1,8], index: 5, kind: input, shape index: {}]   ;;  %s6184_s6 = inlined_call_operand.vmem [shape: f32[2,288,8], index: 6, kind: output, shape index: {}]  }
   0x1   :  { %s4536_s23 = smov 0   ;;  %s4538_s24 = smov 0  }
   0x2   :  { %s4540_s25 = smov 0  }
   0x3 LB: > { %s25_s26 = sadd.s32 1, %s4481_s23  ;;  %s28_s27 = sadd.s32 1, %s4485_s24  ;;  %s4489_s25 = sphi %s4540_s25, %s16_s25   ;;  %s4485_s24 = sphi %s4538_s24, %s6188_s24   ;;  %s4481_s23 = sphi %s4536_s23, %s6187_s23   ;;  %s4477_s22 = sphi %s4534_s22, %s6186_s22   ;;  %s4473_s21 = sphi %s4532_s21, %s6185_s21  }
   0x4   : > { %p26_p0 = scmp.ge.s32.totalorder %s25_s26, 2  ;;  %p3739_p1 = scmp.ge.s32.totalorder %s4489_s25, 1 }
   0x5   : > { %p242_p2 = scmp.lt.s32.totalorder %s4489_s25, 5 }
   0x6   : > { %s6190_s26 = smov (%p26_p0, %s25_s26), 0  ;;  %s6192_s27 = smov (!%p26_p0, %s28_s27), %s4485_s24 }
   0x7   : > { %p243_p3 = pnand %p3739_p1, %p242_p2  ;;  %p30_p4 = scmp.ge.s32.totalorder %s6192_s27, 2 }
   0x8   : > { %p285_p5 = scmp.lt.s32.totalorder (!%p243_p3), %s4477_s22, 1  ;;  %p287_p6 = scmp.lt.s32.totalorder (!%p243_p3), %s4473_s21, 1  ;;  %v892_v0 = vld [vmem:[%s6180_s2 + $0x18] sm:$0xff] (!%p243_p3)  ;;  %v893_v1 = vld [vmem:[%s6180_s2 + $0x20] sm:$0xff] (!%p243_p3)  ;;  %v4491_v2 = vmov (!%p243_p3), 0.0|0.0   ;;  %vm562_vm0 = vcmask (!%p243_p3), 64512  }
   0x9   : > { %s6194_s27 = smov (%p30_p4, %s6192_s27), 0  ;;  %246 = sbr.rel (%p243_p3) target bundleno = 1037 (0x40d), region = 44 }
   0xa   : > { %4335 = vmatprep.subr.bf16.mxu0 (!%p243_p3), %v4491_v2  ;;  %v4336_v3 = vpack.c.bf16 (!%p243_p3), %v893_v1, %v892_v0  ;;  %4356 = vmatprep.subr.bf16.mxu1 (!%p243_p3), %v4491_v2  ;;  %v4492_v4 = vmov (!%p243_p3), 0.0   ;;  %vm4493_vm1 = vmmov (!%p243_p3), 0   ;;  %v894_v5 = vld [vmem:[%s6180_s2 + $0x28] sm:$0xff] (!%p243_p3)  ;;  %s4494_s18 = smov (!%p243_p3), 8   ;;  %s4495_s19 = smov (!%p243_p3), 16   ;;  %v610_v20 = vld [vmem:[%s6180_s2] sm:$0xff] (!%p243_p3) }
   0xb   : > { %2208 = vst.msk [vmem:[#allocation2 + $0xb5] sm:$0xff] (!%p243_p3), %vm562_vm0, %v4492_v4  ;;  %4017 = vmatprep.mubr.msk.f32.mxu0 (!%p243_p3), %vm4493_vm1, %v4492_v4  ;;  %4098 = vmatprep.mubr.msk.f32.mxu1 (!%p243_p3), %vm4493_vm1, %v4492_v4  ;;  %v611_v21 = vld [vmem:[%s6180_s2 + $0x8] sm:$0xff] (!%p243_p3)  ;;  %v4688_v37 = vld [vmem:[%s6180_s2 + $0x10] sm:$0xff] (!%p243_p3)  ;;  %vm586_vm2 = vcmask (!%p243_p3), 130048   ;;  %vm895_vm3 = vcmask (!%p243_p3), 195584   ;;  %vm2182_vm4 = vcmask (!%p243_p3), 57344  }
   0xc   : > { %4337 = vmatpush3.bf16.msra.mxu0 (!%p243_p3), %v4336_v3  ;;  %v4651_v24 = vpack.c.bf16 (!%p243_p3), %v611_v21, %v610_v20  ;;  %2183 = vst.msk [vmem:[#allocation2] sm:$0x1] (!%p243_p3), %vm2182_vm4, %v4492_v4  ;;  %vm2206_vm5 = vcmask (!%p243_p3), 60416   ;;  %s299_s10 = smul.u32 (!%p243_p3), 18, %s4473_s21 }
   0xd   : > { %4015 = vmatprep.subr.mxu0 (!%p243_p3), %v4492_v4 }
   0xe   : > { %4358 = vmatpush3.bf16.msra.mxu1 (!%p243_p3), %v4651_v24  ;;  %p302_p7 = scmp.lt.s32.totalorder (!%p243_p3), %s299_s10, 35 }
   0xf   : > { %4357 = vmatprep.subr.mxu1 (!%p243_p3), %v4492_v4 }
  0x10   : > { %s6196_s22 = smov (!%p285_p5, %s4477_s22), 1  ;;  %4016 = vmatpush3.msra.mxu0 %v894_v5  ;;  %s6198_s10 = smov (!%p302_p7, %s299_s10), 35 }
  0x11   : > { %s4584_s8 = scalar_select %p287_p6, %s4473_s21, 1  ;;  %4338 = vmatprep.subr.bf16.mxu0 %v4491_v2 }
  0x12   : > { %s4397_s9 = smul.u32 60, %s6196_s22  ;;  %4359 = vmatpush3.msra.mxu1 %v4688_v37 }
  0x13   : > { %s4396_s12 = smul.u32 30, %s4584_s8 }
  0x14   : > { %s4398_s16 = smul.u32 184, %s4584_s8 }
  0x15   : > { %s291_s13 = sadd.s32 %s4397_s9, %s4396_s12  ;;  %s4399_s11 = smul.u32 36, %s6196_s22 }
  0x16   : > { %s3740_s14 = sshll.u32 %s291_s13, 3  ;;  %s5192_s28 = scalar_lea.vmem %s6179_s1, %s4398_s16 }
  0x17   : > { %s4596_s17 = scalar_lea.vmem %s6178_s0, %s3740_s14  ;;  %s305_s12 = sadd.s32 %s4399_s11, %s6198_s10 }
  0x18   : > { %v617_v6 = vld [vmem:[%s4596_s17 + $0x1b] sm:$0xff]  ;;  %v616_v7 = vld [vmem:[%s4596_s17 + $0x13] sm:$0xff]  ;;  %v4607_v10 = vld [vmem:[%s4596_s17 + $0x24] sm:$0xff]  ;;  %s3742_s15 = sshll.u32 %s305_s12, 3 }
  0x19   : > { %687 = vrot.lane.b32.xlu1 %v617_v6, %s4494_s18  ;;  %685 = vrot.lane.b32.xlu0 %v616_v7, %s4494_s18  ;;  %v640_v8 = vld [vmem:[%s4596_s17 + $0x1c] sm:$0xff]  ;;  %v639_v9 = vld [vmem:[%s4596_s17 + $0x14] sm:$0xff]  ;;  %s6092_s22 = scalar_lea.vmem %s6184_s6, %s3742_s15 }
  0x1a   : > { %v618_v11 = vld [vmem:[%s4596_s17 + $0x23] sm:$0xff]  ;;  %v4614_v12 = vld [vmem:[%s4596_s17 + $0x2c] sm:$0xff]  ;;  %v4621_v14 = vld [vmem:[%s4596_s17 + $0x34] sm:$0xff] }
  0x1b   : > { %v619_v13 = vld [vmem:[%s4596_s17 + $0x2b] sm:$0xff]  ;;  %v620_v15 = vld [vmem:[%s4596_s17 + $0x33] sm:$0xff]  ;;  %v4628_v16 = vld [vmem:[%s4596_s17 + $0x3c] sm:$0xff] }
  0x1c   : > { %v621_v17 = vld [vmem:[%s4596_s17 + $0x3b] sm:$0xff]  ;;  %v4635_v18 = vld [vmem:[%s4596_s17 + $0x44] sm:$0xff]  ;;  %v4648_v22 = vld [vmem:[%s4596_s17 + $0x4c] sm:$0xff] }
  0x1d   : > { %779 = vrot.lane.b32.xlu1 %v640_v8, %s4495_s19  ;;  %777 = vrot.lane.b32.xlu0 %v639_v9, %s4495_s19  ;;  %v622_v19 = vld [vmem:[%s4596_s17 + $0x43] sm:$0xff]  ;;  %v623_v23 = vld [vmem:[%s4596_s17 + $0x4b] sm:$0xff] }
  0x1e   : > { %v4658_v25 = vld [vmem:[%s4596_s17 + $0x54] sm:$0xff]  ;;  %v648_v27 = vld [vmem:[%s4596_s17 + $0x5c] sm:$0xff]  ;;  %v649_v29 = vld [vmem:[%s4596_s17 + $0x64] sm:$0xff] }
  0x1f   : > { %v624_v26 = vld [vmem:[%s4596_s17 + $0x53] sm:$0xff]  ;;  %v625_v28 = vld [vmem:[%s4596_s17 + $0x5b] sm:$0xff]  ;;  %v626_v30 = vld [vmem:[%s4596_s17 + $0x63] sm:$0xff] }
  0x20   : > { %v650_v31 = vld [vmem:[%s4596_s17 + $0x6c] sm:$0xff]  ;;  %v651_v33 = vld [vmem:[%s4596_s17 + $0x74] sm:$0xff]  ;;  %v652_v35 = vld [vmem:[%s4596_s17 + $0x7c] sm:$0xff] }
  0x21   : > { %781 = vrot.lane.b32.xlu1 %v4607_v10, %s4495_s19  ;;  %689 = vrot.lane.b32.xlu0 %v618_v11, %s4494_s18  ;;  %v627_v32 = vld [vmem:[%s4596_s17 + $0x6b] sm:$0xff]  ;;  %v628_v34 = vld [vmem:[%s4596_s17 + $0x73] sm:$0xff] }
  0x22   : > { %v629_v36 = vld [vmem:[%s4596_s17 + $0x7b] sm:$0xff]  ;;  %v653_v38 = vld [vmem:[%s4596_s17 + $0x84] sm:$0xff]  ;;  %v654_v40 = vld [vmem:[%s4596_s17 + $0x8c] sm:$0xff] }
  0x23   : > { %v630_v39 = vld [vmem:[%s4596_s17 + $0x83] sm:$0xff]  ;;  %v631_v41 = vld [vmem:[%s4596_s17 + $0x8b] sm:$0xff]  ;;  %v655_v42 = vld [vmem:[%s4596_s17 + $0x94] sm:$0xff] }
  0x24   : > { %v632_v43 = vld [vmem:[%s4596_s17 + $0x93] sm:$0xff]  ;;  %v656_v44 = vld [vmem:[%s4596_s17 + $0x9c] sm:$0xff]  ;;  %v657_v46 = vld [vmem:[%s4596_s17 + $0xa4] sm:$0xff] }
  0x25   : > { %783 = vrot.lane.b32.xlu1 %v4614_v12, %s4495_s19  ;;  %691 = vrot.lane.b32.xlu0 %v619_v13, %s4494_s18  ;;  %v633_v45 = vld [vmem:[%s4596_s17 + $0x9b] sm:$0xff]  ;;  %v634_v47 = vld [vmem:[%s4596_s17 + $0xa3] sm:$0xff] }
  0x26   : > { %v658_v48 = vld [vmem:[%s4596_s17 + $0xac] sm:$0xff]  ;;  %v659_v50 = vld [vmem:[%s4596_s17 + $0xb4] sm:$0xff]  ;;  %v660_v52 = vld [vmem:[%s4596_s17 + $0xbc] sm:$0xff] }
  0x27   : > { %v635_v49 = vld [vmem:[%s4596_s17 + $0xab] sm:$0xff]  ;;  %v636_v51 = vld [vmem:[%s4596_s17 + $0xb3] sm:$0xff]  ;;  %v637_v53 = vld [vmem:[%s4596_s17 + $0xbb] sm:$0xff] }
  0x28   : > { %v661_v54 = vld [vmem:[%s4596_s17 + $0xc4] sm:$0xf]  ;;  %v356_v58 = vld [vmem:[%s4596_s17 + $0xa] sm:$0xff]  ;;  %v357_v0 = vld [vmem:[%s4596_s17 + $0x12] sm:$0xff] }
  0x29   : > { %785 = vrot.lane.b32.xlu1 %v4621_v14, %s4495_s19  ;;  %693 = vrot.lane.b32.xlu0 %v620_v15, %s4494_s18  ;;  %v638_v55 = vld [vmem:[%s4596_s17 + $0xc3] sm:$0xf]  ;;  %v333_v59 = vld [vmem:[%s4596_s17 + $0x9] sm:$0xff] }
  0x2a   : > { %v355_v56 = vld [vmem:[%s4596_s17 + $0x2] sm:$0xff]  ;;  %v1441_v62 = vld [vmem:[%s4596_s17 + $0x2e] sm:$0xff]  ;;  %v1442_v3 = vld [vmem:[%s4596_s17 + $0x36] sm:$0xff] }
  0x2b   : > { %v332_v57 = vld [vmem:[%s4596_s17 + $0x1] sm:$0xff]  ;;  %v1418_v63 = vld [vmem:[%s4596_s17 + $0x2d] sm:$0xff]  ;;  %v1419_v5 = vld [vmem:[%s4596_s17 + $0x35] sm:$0xff] }
  0x2c   : > { %v1440_v60 = vld [vmem:[%s4596_s17 + $0x26] sm:$0xff]  ;;  %v334_v1 = vld [vmem:[%s4596_s17 + $0x11] sm:$0xff]  ;;  %v358_v6 = vld [vmem:[%s4596_s17 + $0x1a] sm:$0xff] }
  0x2d   : > { %787 = vrot.lane.b32.xlu1 %v4628_v16, %s4495_s19  ;;  %695 = vrot.lane.b32.xlu0 %v621_v17, %s4494_s18  ;;  %v1417_v61 = vld [vmem:[%s4596_s17 + $0x25] sm:$0xff]  ;;  %v335_v7 = vld [vmem:[%s4596_s17 + $0x19] sm:$0xff] }
  0x2e   : > { %v1443_v11 = vld [vmem:[%s4596_s17 + $0x3e] sm:$0xff] }
  0x2f   : > { %v359_v21 = vld [vmem:[%s4596_s17 + $0x22] sm:$0xff] }
  0x31   : > { %789 = vrot.lane.b32.xlu1 %v4635_v18, %s4495_s19  ;;  %697 = vrot.lane.b32.xlu0 %v622_v19, %s4494_s18  ;;  %v1420_v19 = vld [vmem:[%s4596_s17 + $0x3d] sm:$0xff] }
  0x35   : > { %791 = vrot.lane.b32.xlu1 %v4648_v22, %s4495_s19  ;;  %699 = vrot.lane.b32.xlu0 %v623_v23, %s4494_s18 }
  0x39   : > { %793 = vrot.lane.b32.xlu1 %v4658_v25, %s4495_s19  ;;  %701 = vrot.lane.b32.xlu0 %v624_v26, %s4494_s18 }
  0x3d   : > { %795 = vrot.lane.b32.xlu1 %v648_v27, %s4495_s19  ;;  %703 = vrot.lane.b32.xlu0 %v625_v28, %s4494_s18  ;;  %v336_v28 = vld [vmem:[%s4596_s17 + $0x21] sm:$0xff] }
  0x41   : > { %797 = vrot.lane.b32.xlu1 %v649_v29, %s4495_s19  ;;  %705 = vrot.lane.b32.xlu0 %v626_v30, %s4494_s18 }
  0x45   : > { %799 = vrot.lane.b32.xlu1 %v650_v31, %s4495_s19  ;;  %707 = vrot.lane.b32.xlu0 %v627_v32, %s4494_s18  ;;  %v360_v31 = vld [vmem:[%s4596_s17 + $0x2a] sm:$0xff] }
  0x46   : > { %v1444_v32 = vld [vmem:[%s4596_s17 + $0x46] sm:$0xff] }
  0x49   : > { %801 = vrot.lane.b32.xlu1 %v651_v33, %s4495_s19  ;;  %709 = vrot.lane.b32.xlu0 %v628_v34, %s4494_s18  ;;  %v1421_v34 = vld [vmem:[%s4596_s17 + $0x45] sm:$0xff] }
  0x4d   : > { %803 = vrot.lane.b32.xlu1 %v652_v35, %s4495_s19  ;;  %711 = vrot.lane.b32.xlu0 %v629_v36, %s4494_s18 }
  0x51   : > { %805 = vrot.lane.b32.xlu1 %v653_v38, %s4495_s19  ;;  %713 = vrot.lane.b32.xlu0 %v630_v39, %s4494_s18  ;;  %v361_v38 = vld [vmem:[%s4596_s17 + $0x32] sm:$0xff] }
  0x55   : > { %807 = vrot.lane.b32.xlu1 %v654_v40, %s4495_s19  ;;  %715 = vrot.lane.b32.xlu0 %v631_v41, %s4494_s18  ;;  %v337_v40 = vld [vmem:[%s4596_s17 + $0x29] sm:$0xff] }
  0x59   : > { %809 = vrot.lane.b32.xlu1 %v655_v42, %s4495_s19  ;;  %717 = vrot.lane.b32.xlu0 %v632_v43, %s4494_s18  ;;  %v362_v42 = vld [vmem:[%s4596_s17 + $0x3a] sm:$0xff]  ;;  %v1445_v43 = vld [vmem:[%s4596_s17 + $0x4e] sm:$0xff] }
  0x5d   : > { %811 = vrot.lane.b32.xlu1 %v656_v44, %s4495_s19  ;;  %719 = vrot.lane.b32.xlu0 %v633_v45, %s4494_s18 }
  0x61   : > { %813 = vrot.lane.b32.xlu1 %v657_v46, %s4495_s19  ;;  %721 = vrot.lane.b32.xlu0 %v634_v47, %s4494_s18  ;;  %v1422_v46 = vld [vmem:[%s4596_s17 + $0x4d] sm:$0xff] }
  0x65   : > { %815 = vrot.lane.b32.xlu1 %v658_v48, %s4495_s19  ;;  %723 = vrot.lane.b32.xlu0 %v635_v49, %s4494_s18  ;;  %v363_v49 = vld [vmem:[%s4596_s17 + $0x42] sm:$0xff] }
  0x69   : > { %817 = vrot.lane.b32.xlu1 %v659_v50, %s4495_s19  ;;  %725 = vrot.lane.b32.xlu0 %v636_v51, %s4494_s18 }
  0x6d   : > { %819 = vrot.lane.b32.xlu1 %v660_v52, %s4495_s19  ;;  %727 = vrot.lane.b32.xlu0 %v637_v53, %s4494_s18  ;;  %v338_v52 = vld [vmem:[%s4596_s17 + $0x31] sm:$0xff] }
  0x71   : > { %821 = vrot.lane.b32.xlu1 %v661_v54, %s4495_s19  ;;  %729 = vrot.lane.b32.xlu0 %v638_v55, %s4494_s18  ;;  %v4815_v55 = vld [vmem:[%s4596_s17 + $0x4a] sm:$0xff] }
  0x75   : > { %493 = vrot.lane.b32.xlu1 %v355_v56, %s4495_s19  ;;  %401 = vrot.lane.b32.xlu0 %v332_v57, %s4494_s18  ;;  %v1446_v56 = vld [vmem:[%s4596_s17 + $0x56] sm:$0xff] }
  0x79   : > { %495 = vrot.lane.b32.xlu1 %v356_v58, %s4495_s19  ;;  %403 = vrot.lane.b32.xlu0 %v333_v59, %s4494_s18  ;;  %v1423_v59 = vld [vmem:[%s4596_s17 + $0x55] sm:$0xff] }
  0x7d   : > { %1578 = vrot.lane.b32.xlu1 %v1440_v60, %s4495_s19  ;;  %1486 = vrot.lane.b32.xlu0 %v1417_v61, %s4494_s18 }
  0x81   : > { %1580 = vrot.lane.b32.xlu1 %v1441_v62, %s4495_s19  ;;  %1488 = vrot.lane.b32.xlu0 %v1418_v63, %s4494_s18  ;;  %v4828_v62 = vld [vmem:[%s4596_s17 + $0x52] sm:$0xff] }
  0x85   : > { %497 = vrot.lane.b32.xlu1 %v357_v0, %s4495_s19  ;;  %405 = vrot.lane.b32.xlu0 %v334_v1, %s4494_s18  ;;  %v339_v1 = vld [vmem:[%s4596_s17 + $0x39] sm:$0xff] }
  0x89   : > { %1582 = vrot.lane.b32.xlu1 %v1442_v3, %s4495_s19  ;;  %1490 = vrot.lane.b32.xlu0 %v1419_v5, %s4494_s18 }
  0x8b   : > { %v688_v8 = vpop.permute.xlu1 %687  ;;  %v686_v9 = vpop.permute.xlu0 %685 }
  0x8c   : > { %v846_v13 = vsel %vm562_vm0, %v357_v0, %v686_v9  ;;  %v847_v23 = vsel %vm562_vm0, %v358_v6, %v688_v8 }
  0x8d   : > { %499 = vrot.lane.b32.xlu1 %v358_v6, %s4495_s19  ;;  %407 = vrot.lane.b32.xlu0 %v335_v7, %s4494_s18  ;;  %v4840_v6 = vld [vmem:[%s4596_s17 + $0x5a] sm:$0xff] }
  0x8e   : > { %v1447_v7 = vld [vmem:[%s4596_s17 + $0x5e] sm:$0xff] }
  0x8f   : > { %v780_v15 = vpop.permute.xlu1 %779  ;;  %v778_v17 = vpop.permute.xlu0 %777 }
  0x90   : > { %v869_v20 = vsel %vm586_vm2, %v846_v13, %v778_v17  ;;  %v870_v29 = vsel %vm586_vm2, %v847_v23, %v780_v15  ;;  %v4496_v13 = vmov 0   ;;  %v340_v23 = vld [vmem:[%s4596_s17 + $0x41] sm:$0xff] }
  0x91   : > { %4018 = vmatmul.mubr.msk.f32.vlgmr.msra.gmra.mrb[0].mxu0 %vm895_vm3, %v869_v20  ;;  %1584 = vrot.lane.b32.xlu1 %v1443_v11, %s4495_s19  ;;  %v1424_v11 = vld [vmem:[%s4596_s17 + $0x5d] sm:$0xff] }
  0x92   : > { %1492 = vrot.lane.b32.xlu0 %v1420_v19, %s4494_s18  ;;  %4020 = vmatprep.mubr.msk.f32.mxu0 %vm4493_vm1, %v4492_v4  ;;  %v4853_v19 = vld [vmem:[%s4596_s17 + $0x62] sm:$0xff] }
  0x93   : > { %v690_v26 = vpop.permute.xlu0 %689  ;;  %v782_v27 = vpop.permute.xlu1 %781  ;;  %4340 = vmatpush3.bf16.msra.mxu0 %v4651_v24  ;;  %4447 = vset.pattern.permute.xlu1 %v4496_v13 }
  0x94   : > { %4090 = vmatprep.subr.mxu0 %v4492_v4  ;;  %v848_v30 = vsel %vm562_vm0, %v359_v21, %v690_v26  ;;  %4446 = vset.pattern.permute.xlu0 %v4496_v13 }
  0x95   : > { %4021 = vmatmul.mubr.msk.f32.gmra.mrb[2].mxu0 %vm895_vm3, %v870_v29  ;;  %501 = vrot.lane.b32.xlu1 %v359_v21, %s4495_s19  ;;  %v871_v35 = vsel %vm586_vm2, %v848_v30, %v782_v27  ;;  %v1448_v29 = vld [vmem:[%s4596_s17 + $0x66] sm:$0xff] }
  0x96   : > { %409 = vrot.lane.b32.xlu0 %v336_v28, %s4494_s18  ;;  %4023 = vmatprep.mubr.msk.f32.mxu0 %vm4493_vm1, %v4492_v4  ;;  %v4865_v28 = vld [vmem:[%s4596_s17 + $0x6a] sm:$0xff] }
  0x97   : > { %v692_v24 = vpop.permute.xlu0 %691  ;;  %v784_v33 = vpop.permute.xlu1 %783  ;;  %4091 = vmatpush3.msra.mxu0 %v4688_v37 }
  0x98   : > { %4341 = vmatprep.subr.bf16.mxu0 %v4491_v2  ;;  %v849_v36 = vsel %vm562_vm0, %v360_v31, %v692_v24 }
  0x99   : > { %4024 = vmatmul.mubr.msk.f32.gmra.mrb[4].mxu0 %vm895_vm3, %v871_v35  ;;  %1586 = vrot.lane.b32.xlu1 %v1444_v32, %s4495_s19  ;;  %v872_v41 = vsel %vm586_vm2, %v849_v36, %v784_v33  ;;  %v1425_v32 = vld [vmem:[%s4596_s17 + $0x65] sm:$0xff] }
  0x9a   : > { %1494 = vrot.lane.b32.xlu0 %v1421_v34, %s4494_s18  ;;  %4026 = vmatprep.mubr.msk.f32.mxu0 %vm4493_vm1, %v4492_v4  ;;  %v4878_v34 = vld [vmem:[%s4596_s17 + $0x72] sm:$0xff] }
  0x9b   : > { %v694_v37 = vpop.permute.xlu0 %693  ;;  %v786_v39 = vpop.permute.xlu1 %785 }
  0x9c   : > { %v850_v2 = vsel %vm562_vm0, %v361_v38, %v694_v37 }
  0x9d   : > { %4027 = vmatmul.mubr.msk.f32.gmra.mrb[6].mxu0 %vm895_vm3, %v872_v41  ;;  %503 = vrot.lane.b32.xlu1 %v360_v31, %s4495_s19  ;;  %v873_v47 = vsel %vm586_vm2, %v850_v2, %v786_v39  ;;  %v1449_v41 = vld [vmem:[%s4596_s17 + $0x6e] sm:$0xff] }
  0x9e   : > { %411 = vrot.lane.b32.xlu0 %v337_v40, %s4494_s18  ;;  %4029 = vmatprep.mubr.msk.f32.mxu0 %vm4493_vm1, %v4492_v4  ;;  %v4891_v40 = vld [vmem:[%s4596_s17 + $0x7a] sm:$0xff] }
  0x9f   : > { %v696_v44 = vpop.permute.xlu0 %695  ;;  %v788_v45 = vpop.permute.xlu1 %787 }
  0xa0   : > { %v851_v48 = vsel %vm562_vm0, %v362_v42, %v696_v44 }
  0xa1   : > { %4030 = vmatmul.mubr.msk.f32.gmra.mrb[8].mxu0 %vm895_vm3, %v873_v47  ;;  %1588 = vrot.lane.b32.xlu1 %v1445_v43, %s4495_s19  ;;  %v874_v53 = vsel %vm586_vm2, %v851_v48, %v788_v45  ;;  %v1426_v43 = vld [vmem:[%s4596_s17 + $0x6d] sm:$0xff] }
  0xa2   : > { %1496 = vrot.lane.b32.xlu0 %v1422_v46, %s4494_s18  ;;  %4032 = vmatprep.mubr.msk.f32.mxu0 %vm4493_vm1, %v4492_v4  ;;  %v4904_v46 = vld [vmem:[%s4596_s17 + $0x82] sm:$0xff] }
  0xa3   : > { %v698_v50 = vpop.permute.xlu0 %697  ;;  %v790_v51 = vpop.permute.xlu1 %789 }
  0xa4   : > { %v852_v54 = vsel %vm562_vm0, %v363_v49, %v698_v50 }
  0xa5   : > { %4033 = vmatmul.mubr.msk.f32.gmra.mrb[10].mxu0 %vm895_vm3, %v874_v53  ;;  %505 = vrot.lane.b32.xlu1 %v361_v38, %s4495_s19  ;;  %v875_v60 = vsel %vm586_vm2, %v852_v54, %v790_v51  ;;  %v341_v38 = vld [vmem:[%s4596_s17 + $0x49] sm:$0xff]  ;;  %v1450_v53 = vld [vmem:[%s4596_s17 + $0x76] sm:$0xff] }
  0xa6   : > { %413 = vrot.lane.b32.xlu0 %v338_v52, %s4494_s18  ;;  %4035 = vmatprep.mubr.msk.f32.mxu0 %vm4493_vm1, %v4492_v4  ;;  %v4917_v52 = vld [vmem:[%s4596_s17 + $0x8a] sm:$0xff] }
  0xa7   : > { %v700_v57 = vpop.permute.xlu0 %699  ;;  %v792_v58 = vpop.permute.xlu1 %791 }
  0xa8   : > { %v853_v61 = vsel %vm562_vm0, %v4815_v55, %v700_v57 }
  0xa9   : > { %4036 = vmatmul.mubr.msk.f32.gmra.mrb[12].mxu0 %vm895_vm3, %v875_v60  ;;  %1590 = vrot.lane.b32.xlu1 %v1446_v56, %s4495_s19  ;;  %v876_v3 = vsel %vm586_vm2, %v853_v61, %v792_v58  ;;  %v1427_v56 = vld [vmem:[%s4596_s17 + $0x75] sm:$0xff] }
  0xaa   : > { %1498 = vrot.lane.b32.xlu0 %v1423_v59, %s4494_s18  ;;  %4038 = vmatprep.mubr.msk.f32.mxu0 %vm4493_vm1, %v4492_v4  ;;  %v4930_v59 = vld [vmem:[%s4596_s17 + $0x92] sm:$0xff] }
  0xab   : > { %v702_v63 = vpop.permute.xlu0 %701  ;;  %v794_v0 = vpop.permute.xlu1 %793 }
  0xac   : > { %v854_v5 = vsel %vm562_vm0, %v4828_v62, %v702_v63 }
  0xad   : > { %4039 = vmatmul.mubr.msk.f32.gmra.mrb[14].mxu0 %vm895_vm3, %v876_v3  ;;  %507 = vrot.lane.b32.xlu1 %v362_v42, %s4495_s19  ;;  %v877_v15 = vsel %vm586_vm2, %v854_v5, %v794_v0  ;;  %v1451_v3 = vld [vmem:[%s4596_s17 + $0x7e] sm:$0xff] }
  0xae   : > { %415 = vrot.lane.b32.xlu0 %v339_v1, %s4494_s18  ;;  %4041 = vmatprep.mubr.msk.f32.mxu0 %vm4493_vm1, %v4492_v4  ;;  %v4943_v1 = vld [vmem:[%s4596_s17 + $0x9a] sm:$0xff] }
  0xaf   : > { %v704_v8 = vpop.permute.xlu0 %703  ;;  %v796_v9 = vpop.permute.xlu1 %795 }
  0xb0   : > { %v855_v17 = vsel %vm562_vm0, %v4840_v6, %v704_v8  ;;  %v1428_v8 = vld [vmem:[%s4596_s17 + $0x7d] sm:$0xff] }
  0xb1   : > { %4042 = vmatmul.mubr.msk.f32.gmra.mrb[16].mxu0 %vm895_vm3, %v877_v15  ;;  %1592 = vrot.lane.b32.xlu1 %v1447_v7, %s4495_s19  ;;  %v878_v26 = vsel %vm586_vm2, %v855_v17, %v796_v9  ;;  %v344_v17 = vld [vmem:[%s4596_s17 + $0x61] sm:$0xff] }
  0xb2   : > { %1500 = vrot.lane.b32.xlu0 %v1424_v11, %s4494_s18  ;;  %4044 = vmatprep.mubr.msk.f32.mxu0 %vm4493_vm1, %v4492_v4 }
  0xb3   : > { %v706_v20 = vpop.permute.xlu0 %705  ;;  %v798_v21 = vpop.permute.xlu1 %797 }
  0xb4   : > { %v856_v27 = vsel %vm562_vm0, %v4853_v19, %v706_v20 }
  0xb5   : > { %4045 = vmatmul.mubr.msk.f32.gmra.mrb[18].mxu0 %vm895_vm3, %v878_v26  ;;  %509 = vrot.lane.b32.xlu1 %v363_v49, %s4495_s19  ;;  %v879_v24 = vsel %vm586_vm2, %v856_v27, %v798_v21  ;;  %v342_v49 = vld [vmem:[%s4596_s17 + $0x51] sm:$0xff]  ;;  %v1452_v26 = vld [vmem:[%s4596_s17 + $0x86] sm:$0xff] }
  0xb6   : > { %417 = vrot.lane.b32.xlu0 %v340_v23, %s4494_s18  ;;  %4047 = vmatprep.mubr.msk.f32.mxu0 %vm4493_vm1, %v4492_v4  ;;  %v4969_v23 = vld [vmem:[%s4596_s17 + $0xaa] sm:$0xff] }
  0xb7   : > { %v708_v30 = vpop.permute.xlu0 %707  ;;  %v800_v31 = vpop.permute.xlu1 %799 }
  0xb8   : > { %v857_v33 = vsel %vm562_vm0, %v4865_v28, %v708_v30  ;;  %v1429_v30 = vld [vmem:[%s4596_s17 + $0x85] sm:$0xff] }
  0xb9   : > { %4048 = vmatmul.mubr.msk.f32.gmra.mrb[20].mxu0 %vm895_vm3, %v879_v24  ;;  %1594 = vrot.lane.b32.xlu1 %v1448_v29, %s4495_s19  ;;  %v880_v37 = vsel %vm586_vm2, %v857_v33, %v800_v31 }
  0xba   : > { %1502 = vrot.lane.b32.xlu0 %v1425_v32, %s4494_s18  ;;  %4050 = vmatprep.mubr.msk.f32.mxu0 %vm4493_vm1, %v4492_v4 }
  0xbb   : > { %v710_v35 = vpop.permute.xlu0 %709  ;;  %v802_v36 = vpop.permute.xlu1 %801 }
  0xbc   : > { %v858_v39 = vsel %vm562_vm0, %v4878_v34, %v710_v35  ;;  %v345_v35 = vld [vmem:[%s4596_s17 + $0x69] sm:$0xff] }
  0xbd   : > { %4051 = vmatmul.mubr.msk.f32.gmra.mrb[22].mxu0 %vm895_vm3, %v880_v37  ;;  %511 = vrot.lane.b32.xlu1 %v4815_v55, %s4495_s19  ;;  %v881_v44 = vsel %vm586_vm2, %v858_v39, %v802_v36  ;;  %v614_v37 = vld [vmem:[%s4596_s17 + $0xba] sm:$0xff]  ;;  %v1453_v39 = vld [vmem:[%s4596_s17 + $0x8e] sm:$0xff] }
  0xbe   : > { %419 = vrot.lane.b32.xlu0 %v341_v38, %s4494_s18  ;;  %4053 = vmatprep.mubr.msk.f32.mxu0 %vm4493_vm1, %v4492_v4 }
  0xbf   : > { %v712_v2 = vpop.permute.xlu0 %711  ;;  %v804_v42 = vpop.permute.xlu1 %803 }
  0xc0   : > { %v859_v45 = vsel %vm562_vm0, %v4891_v40, %v712_v2 }
  0xc1   : > { %4054 = vmatmul.mubr.msk.f32.gmra.mrb[24].mxu0 %vm895_vm3, %v881_v44  ;;  %1596 = vrot.lane.b32.xlu1 %v1449_v41, %s4495_s19  ;;  %v882_v50 = vsel %vm586_vm2, %v859_v45, %v804_v42  ;;  %v1430_v42 = vld [vmem:[%s4596_s17 + $0x8d] sm:$0xff] }
  0xc2   : > { %1504 = vrot.lane.b32.xlu0 %v1426_v43, %s4494_s18  ;;  %4056 = vmatprep.mubr.msk.f32.mxu0 %vm4493_vm1, %v4492_v4 }
  0xc3   : > { %v714_v47 = vpop.permute.xlu0 %713  ;;  %v806_v48 = vpop.permute.xlu1 %805 }
  0xc4   : > { %v860_v51 = vsel %vm562_vm0, %v4904_v46, %v714_v47 }
  0xc5   : > { %4057 = vmatmul.mubr.msk.f32.gmra.mrb[26].mxu0 %vm895_vm3, %v882_v50  ;;  %513 = vrot.lane.b32.xlu1 %v4828_v62, %s4495_s19  ;;  %v883_v57 = vsel %vm586_vm2, %v860_v51, %v806_v48  ;;  %v343_v62 = vld [vmem:[%s4596_s17 + $0x59] sm:$0xff]  ;;  %v346_v48 = vld [vmem:[%s4596_s17 + $0x71] sm:$0xff] }
  0xc6   : > { %421 = vrot.lane.b32.xlu0 %v342_v49, %s4494_s18  ;;  %4059 = vmatprep.mubr.msk.f32.mxu0 %vm4493_vm1, %v4492_v4  ;;  %v309_v51 = vld [vmem:[%s4596_s17] sm:$0xff] }
  0xc7   : > { %v716_v54 = vpop.permute.xlu0 %715  ;;  %v808_v55 = vpop.permute.xlu1 %807 }
  0xc8   : > { %v861_v58 = vsel %vm562_vm0, %v4917_v52, %v716_v54 }
  0xc9   : > { %4060 = vmatmul.mubr.msk.f32.gmra.mrb[28].mxu0 %vm895_vm3, %v883_v57  ;;  %1598 = vrot.lane.b32.xlu1 %v1450_v53, %s4495_s19  ;;  %v884_v63 = vsel %vm586_vm2, %v861_v58, %v808_v55  ;;  %v1454_v53 = vld [vmem:[%s4596_s17 + $0x96] sm:$0xff] }
  0xca   : > { %1506 = vrot.lane.b32.xlu0 %v1427_v56, %s4494_s18  ;;  %4062 = vmatprep.mubr.msk.f32.mxu0 %vm4493_vm1, %v4492_v4  ;;  %v1431_v56 = vld [vmem:[%s4596_s17 + $0x95] sm:$0xff] }
  0xcb   : > { %v718_v60 = vpop.permute.xlu0 %717  ;;  %v810_v61 = vpop.permute.xlu1 %809  ;;  %v1693_v58 = vld [vmem:[%s6180_s2 + $0x30] sm:$0xff] }
  0xcc   : > { %v862_v0 = vsel %vm562_vm0, %v4930_v59, %v718_v60 }
  0xcd   : > { %4063 = vmatmul.mubr.msk.f32.gmra.mrb[30].mxu0 %vm895_vm3, %v884_v63  ;;  %515 = vrot.lane.b32.xlu1 %v4840_v6, %s4495_s19  ;;  %v885_v9 = vsel %vm586_vm2, %v862_v0, %v810_v61  ;;  %v4956_v6 = vld [vmem:[%s4596_s17 + $0xa2] sm:$0xff]  ;;  %v347_v0 = vld [vmem:[%s4596_s17 + $0x79] sm:$0xff] }
  0xce   : > { %423 = vrot.lane.b32.xlu0 %v343_v62, %s4494_s18  ;;  %4065 = vmatprep.mubr.msk.f32.mxu0 %vm4493_vm1, %v4492_v4  ;;  %v310_v61 = vld [vmem:[%s4596_s17 + $0x8] sm:$0xff] }
  0xcf   : > { %v720_v5 = vpop.permute.xlu0 %719  ;;  %v812_v7 = vpop.permute.xlu1 %811 }
  0xd0   : > { %v863_v11 = vsel %vm562_vm0, %v4943_v1, %v720_v5 }
  0xd1   : > { %4066 = vmatmul.mubr.msk.f32.gmra.mrb[32].mxu0 %vm895_vm3, %v885_v9  ;;  %1600 = vrot.lane.b32.xlu1 %v1451_v3, %s4495_s19  ;;  %v886_v20 = vsel %vm586_vm2, %v863_v11, %v812_v7 }
  0xd2   : > { %1508 = vrot.lane.b32.xlu0 %v1428_v8, %s4494_s18  ;;  %4068 = vmatprep.mubr.msk.f32.mxu0 %vm4493_vm1, %v4492_v4  ;;  %v1455_v8 = vld [vmem:[%s4596_s17 + $0x9e] sm:$0xff] }
  0xd3   : > { %v722_v13 = vpop.permute.xlu0 %721  ;;  %v814_v15 = vpop.permute.xlu1 %813 }
  0xd4   : > { %v864_v21 = vsel %vm562_vm0, %v4956_v6, %v722_v13  ;;  %v1432_v13 = vld [vmem:[%s4596_s17 + $0x9d] sm:$0xff] }
  0xd5   : > { %4069 = vmatmul.mubr.msk.f32.gmra.mrb[34].mxu0 %vm895_vm3, %v886_v20  ;;  %517 = vrot.lane.b32.xlu1 %v4853_v19, %s4495_s19  ;;  %v887_v31 = vsel %vm586_vm2, %v864_v21, %v814_v15  ;;  %v613_v19 = vld [vmem:[%s4596_s17 + $0xb2] sm:$0xff] }
  0xd6   : > { %425 = vrot.lane.b32.xlu0 %v344_v17, %s4494_s18  ;;  %4071 = vmatprep.mubr.msk.f32.mxu0 %vm4493_vm1, %v4492_v4 }
  0xd7   : > { %v724_v27 = vpop.permute.xlu0 %723  ;;  %v816_v29 = vpop.permute.xlu1 %815 }
  0xd8   : > { %v865_v32 = vsel %vm562_vm0, %v4969_v23, %v724_v27 }
  0xd9   : > { %4072 = vmatmul.mubr.msk.f32.gmra.mrb[36].mxu0 %vm895_vm3, %v887_v31  ;;  %1602 = vrot.lane.b32.xlu1 %v1452_v26, %s4495_s19  ;;  %v888_v36 = vsel %vm586_vm2, %v865_v32, %v816_v29  ;;  %v348_v26 = vld [vmem:[%s4596_s17 + $0x81] sm:$0xff]  ;;  %v311_v29 = vld [vmem:[%s4596_s17 + $0x10] sm:$0xff] }
  0xda   : > { %1510 = vrot.lane.b32.xlu0 %v1429_v30, %s4494_s18  ;;  %4074 = vmatprep.mubr.msk.f32.mxu0 %vm4493_vm1, %v4492_v4  ;;  %v1456_v30 = vld [vmem:[%s4596_s17 + $0xa6] sm:$0xff] }
  0xdb   : > { %v726_v24 = vpop.permute.xlu0 %725  ;;  %v818_v33 = vpop.permute.xlu1 %817 }
  0xdc   : > { %v866_v38 = vsel %vm562_vm0, %v613_v19, %v726_v24  ;;  %v1433_v19 = vld [vmem:[%s4596_s17 + $0xa5] sm:$0xff] }
  0xdd   : > { %4075 = vmatmul.mubr.msk.f32.gmra.mrb[38].mxu0 %vm895_vm3, %v888_v36  ;;  %519 = vrot.lane.b32.xlu1 %v4865_v28, %s4495_s19  ;;  %v889_v43 = vsel %vm586_vm2, %v866_v38, %v818_v33  ;;  %v615_v28 = vld [vmem:[%s4596_s17 + $0xc2] sm:$0xf]  ;;  %v349_v36 = vld [vmem:[%s4596_s17 + $0x89] sm:$0xff] }
  0xde   : > { %427 = vrot.lane.b32.xlu0 %v345_v35, %s4494_s18  ;;  %4077 = vmatprep.mubr.msk.f32.mxu0 %vm4493_vm1, %v4492_v4 }
  0xdf   : > { %v728_v41 = vpop.permute.xlu0 %727  ;;  %v820_v2 = vpop.permute.xlu1 %819 }
  0xe0   : > { %v867_v44 = vsel %vm562_vm0, %v614_v37, %v728_v41  ;;  %v1457_v41 = vld [vmem:[%s4596_s17 + $0xae] sm:$0xff] }
  0xe1   : > { %4078 = vmatmul.mubr.msk.f32.gmra.mrb[40].mxu0 %vm895_vm3, %v889_v43  ;;  %1604 = vrot.lane.b32.xlu1 %v1453_v39, %s4495_s19  ;;  %v890_v49 = vsel %vm586_vm2, %v867_v44, %v820_v2  ;;  %v312_v39 = vld [vmem:[%s4596_s17 + $0x18] sm:$0xff]  ;;  %v1434_v43 = vld [vmem:[%s4596_s17 + $0xad] sm:$0xff] }
  0xe2   : > { %1512 = vrot.lane.b32.xlu0 %v1430_v42, %s4494_s18  ;;  %4080 = vmatprep.mubr.msk.f32.mxu0 %vm4493_vm1, %v4492_v4 }
  0xe3   : > { %v730_v45 = vpop.permute.xlu0 %729  ;;  %v822_v47 = vpop.permute.xlu1 %821 }
  0xe4   : > { %v868_v50 = vsel %vm562_vm0, %v615_v28, %v730_v45  ;;  %v350_v28 = vld [vmem:[%s4596_s17 + $0x91] sm:$0xff] }
  0xe5   : > { %4081 = vmatmul.mubr.msk.f32.gmra.mrb[42].mxu0 %vm895_vm3, %v890_v49  ;;  %521 = vrot.lane.b32.xlu1 %v4878_v34, %s4495_s19  ;;  %v891_v57 = vsel %vm586_vm2, %v868_v50, %v822_v47  ;;  %v1694_v34 = vld [vmem:[%s6180_s2 + $0x38] sm:$0xff]  ;;  %v313_v49 = vld [vmem:[%s4596_s17 + $0x20] sm:$0xff] }
  0xe6   : > { %429 = vrot.lane.b32.xlu0 %v346_v48, %s4494_s18  ;;  %4083 = vmatprep.mubr.msk.f32.mxu0 %vm4493_vm1, %v4492_v4  ;;  %v4342_v3 = vpack.c.bf16 %v1694_v34, %v1693_v58  ;;  %v1458_v50 = vld [vmem:[%s4596_s17 + $0xb6] sm:$0xff] }
  0xe7   : > { %v402_v54 = vpop.permute.xlu0 %401  ;;  %v494_v55 = vpop.permute.xlu1 %493 }
  0xe8   : > { %v563_v60 = vsel %vm562_vm0, %v309_v51, %v402_v54 }
  0xe9   : > { %4084 = vmatmul.mubr.msk.f32.gmra.mrb[44].mxu0 %vm895_vm3, %v891_v57  ;;  %1606 = vrot.lane.b32.xlu1 %v1454_v53, %s4495_s19  ;;  %v587_v5 = vsel %vm586_vm2, %v563_v60, %v494_v55  ;;  %v1435_v53 = vld [vmem:[%s4596_s17 + $0xb5] sm:$0xff]  ;;  %v314_v60 = vld [vmem:[%s4596_s17 + $0x28] sm:$0xff] }
  0xea   : > { %1514 = vrot.lane.b32.xlu0 %v1431_v56, %s4494_s18  ;;  %4092 = vmatprep.mubr.msk.f32.mxu0 %vm4493_vm1, %v4492_v4  ;;  %v351_v56 = vld [vmem:[%s4596_s17 + $0x99] sm:$0xff] }
  0xeb   : > { %v404_v62 = vpop.permute.xlu0 %403  ;;  %v496_v63 = vpop.permute.xlu1 %495 }
  0xec   : > { %v564_v7 = vsel %vm562_vm0, %v310_v61, %v404_v62  ;;  %v1459_v61 = vld [vmem:[%s4596_s17 + $0xbe] sm:$0xff] }
  0xed   : > { %523 = vrot.lane.b32.xlu1 %v4891_v40, %s4495_s19  ;;  %4093 = vmatmul.mubr.msk.f32.vlgmr.msra.gmra.mrb[46].mxu0 %vm895_vm3, %v587_v5  ;;  %v588_v15 = vsel %vm586_vm2, %v564_v7, %v496_v63  ;;  %v1695_v40 = vld [vmem:[%s6180_s2 + $0x40] sm:$0xff] }
  0xee   : > { %431 = vrot.lane.b32.xlu0 %v347_v0, %s4494_s18  ;;  %4095 = vmatprep.mubr.msk.f32.mxu0 %vm4493_vm1, %v4492_v4  ;;  %v1436_v63 = vld [vmem:[%s4596_s17 + $0xbd] sm:$0xff] }
  0xef   : > { %v1487_v9 = vpop.permute.xlu0 %1486  ;;  %v1579_v11 = vpop.permute.xlu1 %1578  ;;  %4343 = vmatpush3.bf16.msra.mxu0 %v4342_v3  ;;  %v352_v5 = vld [vmem:[%s4596_s17 + $0xa1] sm:$0xff] }
  0xf0   : > { %4165 = vmatprep.subr.mxu0 %v4492_v4  ;;  %v1647_v17 = vsel %vm562_vm0, %v4607_v10, %v1487_v9 }
  0xf1   : > { %1608 = vrot.lane.b32.xlu1 %v1455_v8, %s4495_s19  ;;  %4096 = vmatmul.mubr.msk.f32.gmra.mrb[48].mxu0 %vm895_vm3, %v588_v15  ;;  %v1670_v27 = vsel %vm586_vm2, %v1647_v17, %v1579_v11  ;;  %v315_v11 = vld [vmem:[%s4596_s17 + $0x30] sm:$0xff] }
  0xf2   : > { %1516 = vrot.lane.b32.xlu0 %v1432_v13, %s4494_s18  ;;  %4167 = vmatprep.mubr.msk.f32.mxu0 %vm4493_vm1, %v4492_v4  ;;  %v1460_v13 = vld [vmem:[%s4596_s17 + $0xc6] sm:$0xff] }
  0xf3   : > { %v1489_v20 = vpop.permute.xlu0 %1488  ;;  %v1581_v21 = vpop.permute.xlu1 %1580  ;;  %4166 = vmatpush3.msra.mxu0 %v1695_v40  ;;  %v1437_v40 = vld [vmem:[%s4596_s17 + $0xc5] sm:$0xff] }
  0xf4   : > { %v1648_v10 = vsel %vm562_vm0, %v4614_v12, %v1489_v20 }
  0xf5   : > { %525 = vrot.lane.b32.xlu1 %v4904_v46, %s4495_s19  ;;  %4168 = vmatmul.mubr.msk.f32.vlgmr.msra.gmra.mrb[50].mxu0 %vm895_vm3, %v1670_v27  ;;  %v1671_v24 = vsel %vm586_vm2, %v1648_v10, %v1581_v21  ;;  %v353_v21 = vld [vmem:[%s4596_s17 + $0xa9] sm:$0xff] }
  0xf6   : > { %433 = vrot.lane.b32.xlu0 %v348_v26, %s4494_s18  ;;  %4170 = vmatprep.mubr.msk.f32.mxu0 %vm4493_vm1, %v4492_v4 }
  0xf7   : > { %v406_v31 = vpop.permute.xlu0 %405  ;;  %v498_v32 = vpop.permute.xlu1 %497 }
  0xf8   : > { %v565_v12 = vsel %vm562_vm0, %v311_v29, %v406_v31  ;;  %v316_v29 = vld [vmem:[%s4596_s17 + $0x38] sm:$0xff] }
  0xf9   : > { %v589_v46 = vsel %vm586_vm2, %v565_v12, %v498_v32  ;;  %1610 = vrot.lane.b32.xlu1 %v1456_v30, %s4495_s19  ;;  %4171 = vmatmul.mubr.msk.f32.gmra.mrb[52].mxu0 %vm895_vm3, %v1671_v24  ;;  %v1461_v30 = vld [vmem:[%s4596_s17 + $0xce] sm:$0xff]  ;;  %v1401_v24 = vld [vmem:[%s4596_s17 + $0x5c] sm:$0xff] }
  0xfa   : > { %1518 = vrot.lane.b32.xlu0 %v1433_v19, %s4494_s18  ;;  %4099 = vmatmul.mubr.msk.f32.vlgmr.msra.gmra.mrb[0].mxu1 %vm895_vm3, %v589_v46  ;;  %v1438_v32 = vld [vmem:[%s4596_s17 + $0xcd] sm:$0xff] }
  0xfb   : > { %v1491_v33 = vpop.permute.xlu0 %1490  ;;  %v1583_v35 = vpop.permute.xlu1 %1582  ;;  %4173 = vmatprep.mubr.msk.f32.mxu0 %vm4493_vm1, %v4492_v4  ;;  %4101 = vmatprep.mubr.msk.f32.mxu1 %vm4493_vm1, %v4492_v4  ;;  %v377_v12 = vld [vmem:[%s4596_s17 + $0xb2] sm:$0xf] }
  0xfc   : > { %v1649_v38 = vsel %vm562_vm0, %v4621_v14, %v1491_v33  ;;  %v354_v33 = vld [vmem:[%s4596_s17 + $0xb1] sm:$0xf] }
  0xfd   : > { %v1672_v37 = vsel %vm586_vm2, %v1649_v38, %v1583_v35  ;;  %527 = vrot.lane.b32.xlu1 %v4917_v52, %s4495_s19 }
  0xfe   : > { %435 = vrot.lane.b32.xlu0 %v349_v36, %s4494_s18  ;;  %4174 = vmatmul.mubr.msk.f32.gmra.mrb[54].mxu0 %vm895_vm3, %v1672_v37  ;;  %v317_v37 = vld [vmem:[%s4596_s17 + $0x40] sm:$0xff] }
  0xff   : > { %v408_v2 = vpop.permute.xlu0 %407  ;;  %v500_v42 = vpop.permute.xlu1 %499  ;;  %4176 = vmatprep.mubr.msk.f32.mxu0 %vm4493_vm1, %v4492_v4 }
 0x100   : > { %v566_v14 = vsel %vm562_vm0, %v312_v39, %v408_v2  ;;  %v1462_v39 = vld [vmem:[%s4596_s17 + $0xd6] sm:$0xf] }
 0x101   : > { %v590_v44 = vsel %vm586_vm2, %v566_v14, %v500_v42  ;;  %1612 = vrot.lane.b32.xlu1 %v1457_v41, %s4495_s19  ;;  %v1439_v2 = vld [vmem:[%s4596_s17 + $0xd5] sm:$0xf] }
 0x102   : > { %1520 = vrot.lane.b32.xlu0 %v1434_v43, %s4494_s18  ;;  %4102 = vmatmul.mubr.msk.f32.gmra.mrb[2].mxu1 %vm895_vm3, %v590_v44  ;;  %v1402_v44 = vld [vmem:[%s4596_s17 + $0x64] sm:$0xff] }
 0x103   : > { %v1585_v52 = vpop.permute.xlu1 %1584  ;;  %4104 = vmatprep.mubr.msk.f32.mxu1 %vm4493_vm1, %v4492_v4 }
 0x104   : > { %v1493_v45 = vpop.permute.xlu0 %1492 }
 0x105   : > { %v1650_v47 = vsel %vm562_vm0, %v4628_v16, %v1493_v45  ;;  %529 = vrot.lane.b32.xlu1 %v4930_v59, %s4495_s19  ;;  %v2023_v45 = vld [vmem:[%s5192_s28 + $0x10] sm:$0xff] }
 0x106   : > { %v1673_v48 = vsel %vm586_vm2, %v1650_v47, %v1585_v52  ;;  %437 = vrot.lane.b32.xlu0 %v350_v28, %s4494_s18  ;;  %v2024_v52 = vld [vmem:[%s5192_s28 + $0x18] sm:$0xff] }
 0x107   : > { %4177 = vmatmul.mubr.msk.f32.gmra.mrb[56].mxu0 %vm895_vm3, %v1673_v48  ;;  %v502_v51 = vpop.permute.xlu1 %501 }
 0x108   : > { %v410_v54 = vpop.permute.xlu0 %409  ;;  %4179 = vmatprep.mubr.msk.f32.mxu0 %vm4493_vm1, %v4492_v4 }
 0x109   : > { %v567_v16 = vsel %vm562_vm0, %v313_v49, %v410_v54  ;;  %1614 = vrot.lane.b32.xlu1 %v1458_v50, %s4495_s19  ;;  %v318_v50 = vld [vmem:[%s4596_s17 + $0x48] sm:$0xff] }
 0x10a   : > { %v591_v59 = vsel %vm586_vm2, %v567_v16, %v502_v51  ;;  %1522 = vrot.lane.b32.xlu0 %v1435_v53, %s4494_s18  ;;  %v2025_v51 = vld [vmem:[%s5192_s28 + $0x20] sm:$0xff]  ;;  %v2026_v54 = vld [vmem:[%s5192_s28 + $0x28] sm:$0xff] }
 0x10b   : > { %4105 = vmatmul.mubr.msk.f32.gmra.mrb[4].mxu1 %vm895_vm3, %v591_v59  ;;  %v1587_v55 = vpop.permute.xlu1 %1586 }
 0x10c   : > { %v1495_v57 = vpop.permute.xlu0 %1494  ;;  %4107 = vmatprep.mubr.msk.f32.mxu1 %vm4493_vm1, %v4492_v4 }
 0x10d   : > { %v1651_v58 = vsel %vm562_vm0, %v4635_v18, %v1495_v57  ;;  %531 = vrot.lane.b32.xlu1 %v4943_v1, %s4495_s19  ;;  %v2027_v57 = vld [vmem:[%s5192_s28 + $0x30] sm:$0xff] }
 0x10e   : > { %v1674_v34 = vsel %vm586_vm2, %v1651_v58, %v1587_v55  ;;  %439 = vrot.lane.b32.xlu0 %v351_v56, %s4494_s18  ;;  %v1403_v56 = vld [vmem:[%s4596_s17 + $0x6c] sm:$0xff] }
 0x10f   : > { %4180 = vmatmul.mubr.msk.f32.gmra.mrb[58].mxu0 %vm895_vm3, %v1674_v34  ;;  %v504_v62 = vpop.permute.xlu1 %503  ;;  %v2028_v34 = vld [vmem:[%s5192_s28 + $0x38] sm:$0xff] }
 0x110   : > { %v412_v0 = vpop.permute.xlu0 %411  ;;  %4182 = vmatprep.mubr.msk.f32.mxu0 %vm4493_vm1, %v4492_v4 }
 0x111   : > { %v568_v18 = vsel %vm562_vm0, %v314_v60, %v412_v0  ;;  %1616 = vrot.lane.b32.xlu1 %v1459_v61, %s4495_s19  ;;  %v2029_v0 = vld [vmem:[%s5192_s28 + $0x40] sm:$0xff] }
 0x112   : > { %v592_v1 = vsel %vm586_vm2, %v568_v18, %v504_v62  ;;  %1524 = vrot.lane.b32.xlu0 %v1436_v63, %s4494_s18  ;;  %v319_v63 = vld [vmem:[%s4596_s17 + $0x50] sm:$0xff] }
 0x113   : > { %4108 = vmatmul.mubr.msk.f32.gmra.mrb[6].mxu1 %vm895_vm3, %v592_v1  ;;  %v1589_v3 = vpop.permute.xlu1 %1588  ;;  %v2030_v1 = vld [vmem:[%s5192_s28 + $0x48] sm:$0xff] }
 0x114   : > { %v1497_v7 = vpop.permute.xlu0 %1496  ;;  %4110 = vmatprep.mubr.msk.f32.mxu1 %vm4493_vm1, %v4492_v4 }
 0x115   : > { %v1652_v8 = vsel %vm562_vm0, %v4648_v22, %v1497_v7  ;;  %533 = vrot.lane.b32.xlu1 %v4956_v6, %s4495_s19 }
 0x116   : > { %v1675_v9 = vsel %vm586_vm2, %v1652_v8, %v1589_v3  ;;  %441 = vrot.lane.b32.xlu0 %v352_v5, %s4494_s18  ;;  %v1404_v8 = vld [vmem:[%s4596_s17 + $0x74] sm:$0xff] }
 0x117   : > { %4183 = vmatmul.mubr.msk.f32.gmra.mrb[60].mxu0 %vm895_vm3, %v1675_v9  ;;  %v506_v15 = vpop.permute.xlu1 %505  ;;  %v2031_v9 = vld [vmem:[%s5192_s28 + $0x50] sm:$0xff] }
 0x118   : > { %v414_v17 = vpop.permute.xlu0 %413  ;;  %4185 = vmatprep.mubr.msk.f32.mxu0 %vm4493_vm1, %v4492_v4 }
 0x119   : > { %v569_v22 = vsel %vm562_vm0, %v315_v11, %v414_v17  ;;  %1618 = vrot.lane.b32.xlu1 %v1460_v13, %s4495_s19  ;;  %v2032_v13 = vld [vmem:[%s5192_s28 + $0x58] sm:$0xff] }
 0x11a   : > { %v593_v6 = vsel %vm586_vm2, %v569_v22, %v506_v15  ;;  %1526 = vrot.lane.b32.xlu0 %v1437_v40, %s4494_s18  ;;  %v320_v22 = vld [vmem:[%s4596_s17 + $0x58] sm:$0xff] }
 0x11b   : > { %4111 = vmatmul.mubr.msk.f32.gmra.mrb[8].mxu1 %vm895_vm3, %v593_v6  ;;  %v1591_v20 = vpop.permute.xlu1 %1590  ;;  %v2033_v6 = vld [vmem:[%s5192_s28 + $0x60] sm:$0xff] }
 0x11c   : > { %v1499_v26 = vpop.permute.xlu0 %1498  ;;  %4113 = vmatprep.mubr.msk.f32.mxu1 %vm4493_vm1, %v4492_v4 }
 0x11d   : > { %v1653_v27 = vsel %vm562_vm0, %v4658_v25, %v1499_v26  ;;  %535 = vrot.lane.b32.xlu1 %v4969_v23, %s4495_s19 }
 0x11e   : > { %v1676_v10 = vsel %vm586_vm2, %v1653_v27, %v1591_v20  ;;  %443 = vrot.lane.b32.xlu0 %v353_v21, %s4494_s18  ;;  %v2034_v21 = vld [vmem:[%s5192_s28 + $0x68] sm:$0xff] }
 0x11f   : > { %4186 = vmatmul.mubr.msk.f32.gmra.mrb[62].mxu0 %vm895_vm3, %v1676_v10  ;;  %v508_v31 = vpop.permute.xlu1 %507 }
 0x120   : > { %v416_v19 = vpop.permute.xlu0 %415  ;;  %4188 = vmatprep.mubr.msk.f32.mxu0 %vm4493_vm1, %v4492_v4 }
 0x121   : > { %v570_v25 = vsel %vm562_vm0, %v316_v29, %v416_v19  ;;  %1620 = vrot.lane.b32.xlu1 %v1461_v30, %s4495_s19  ;;  %v1405_v29 = vld [vmem:[%s4596_s17 + $0x7c] sm:$0xff]  ;;  %v2035_v30 = vld [vmem:[%s5192_s28 + $0x70] sm:$0xff] }
 0x122   : > { %v594_v23 = vsel %vm586_vm2, %v570_v25, %v508_v31  ;;  %1528 = vrot.lane.b32.xlu0 %v1438_v32, %s4494_s18  ;;  %v2036_v32 = vld [vmem:[%s5192_s28 + $0x78] sm:$0xff] }
 0x123   : > { %4114 = vmatmul.mubr.msk.f32.gmra.mrb[10].mxu1 %vm895_vm3, %v594_v23  ;;  %v1593_v46 = vpop.permute.xlu1 %1592 }
 0x124   : > { %v1501_v35 = vpop.permute.xlu0 %1500  ;;  %4116 = vmatprep.mubr.msk.f32.mxu1 %vm4493_vm1, %v4492_v4 }
 0x125   : > { %v1654_v36 = vsel %vm562_vm0, %v1401_v24, %v1501_v35  ;;  %537 = vrot.lane.b32.xlu1 %v377_v12, %s4495_s19  ;;  %v321_v24 = vld [vmem:[%s4596_s17 + $0x60] sm:$0xff] }
 0x126   : > { %v1677_v38 = vsel %vm586_vm2, %v1654_v36, %v1593_v46  ;;  %445 = vrot.lane.b32.xlu0 %v354_v33, %s4494_s18  ;;  %v2037_v12 = vld [vmem:[%s5192_s28 + $0x80] sm:$0xff]  ;;  %v2038_v33 = vld [vmem:[%s5192_s28 + $0x88] sm:$0xff] }
 0x127   : > { %4189 = vmatmul.mubr.msk.f32.gmra.mrb[64].mxu0 %vm895_vm3, %v1677_v38  ;;  %v510_v41 = vpop.permute.xlu1 %509 }
 0x128   : > { %v418_v42 = vpop.permute.xlu0 %417  ;;  %4191 = vmatprep.mubr.msk.f32.mxu0 %vm4493_vm1, %v4492_v4 }
 0x129   : > { %v571_v43 = vsel %vm562_vm0, %v317_v37, %v418_v42  ;;  %1622 = vrot.lane.b32.xlu1 %v1462_v39, %s4495_s19  ;;  %v1406_v37 = vld [vmem:[%s4596_s17 + $0x84] sm:$0xff]  ;;  %v2039_v39 = vld [vmem:[%s5192_s28 + $0x90] sm:$0xff] }
 0x12a   : > { %v595_v14 = vsel %vm586_vm2, %v571_v43, %v510_v41  ;;  %1530 = vrot.lane.b32.xlu0 %v1439_v2, %s4494_s18  ;;  %v2040_v2 = vld [vmem:[%s5192_s28 + $0x98] sm:$0xff] }
 0x12b   : > { %4117 = vmatmul.mubr.msk.f32.gmra.mrb[12].mxu1 %vm895_vm3, %v595_v14  ;;  %v1595_v28 = vpop.permute.xlu1 %1594 }
 0x12c   : > { %v1503_v47 = vpop.permute.xlu0 %1502  ;;  %4119 = vmatprep.mubr.msk.f32.mxu1 %vm4493_vm1, %v4492_v4 }
 0x12d   : > { %v1655_v48 = vsel %vm562_vm0, %v1402_v44, %v1503_v47  ;;  %2061 = vperm.xlu1 %4447, %v2024_v52   ;;  %v322_v44 = vld [vmem:[%s4596_s17 + $0x68] sm:$0xff]  ;;  %v2041_v52 = vld [vmem:[%s5192_s28 + $0xa0] sm:$0xff] }
 0x12e   : > { %v1678_v49 = vsel %vm586_vm2, %v1655_v48, %v1595_v28  ;;  %2056 = vperm.xlu0 %4446, %v2023_v45   ;;  %v2021_v45 = vld [vmem:[%s5192_s28] sm:$0xff] }
 0x12f   : > { %4192 = vmatmul.mubr.msk.f32.gmra.mrb[66].mxu0 %vm895_vm3, %v1678_v49  ;;  %v512_v53 = vpop.permute.xlu1 %511 }
 0x130   : > { %v420_v16 = vpop.permute.xlu0 %419  ;;  %4194 = vmatprep.mubr.msk.f32.mxu0 %vm4493_vm1, %v4492_v4 }
 0x131   : > { %v572_v59 = vsel %vm562_vm0, %v318_v50, %v420_v16  ;;  %2066 = vperm.xlu1 %4447, %v2025_v51   ;;  %v1407_v50 = vld [vmem:[%s4596_s17 + $0x8c] sm:$0xff] }
 0x132   : > { %v596_v55 = vsel %vm586_vm2, %v572_v59, %v512_v53  ;;  %2071 = vperm.xlu0 %4446, %v2026_v54   ;;  %v2022_v51 = vld [vmem:[%s5192_s28 + $0x8] sm:$0xff]  ;;  %v2043_v54 = vld [vmem:[%s5192_s28 + $0xb0] sm:$0xf] }
 0x133   : > { %4120 = vmatmul.mubr.msk.f32.gmra.mrb[14].mxu1 %vm895_vm3, %v596_v55  ;;  %v1597_v58 = vpop.permute.xlu1 %1596 }
 0x134   : > { %v1505_v60 = vpop.permute.xlu0 %1504  ;;  %4122 = vmatprep.mubr.msk.f32.mxu1 %vm4493_vm1, %v4492_v4 }
 0x135   : > { %v1656_v61 = vsel %vm562_vm0, %v1403_v56, %v1505_v60  ;;  %2076 = vperm.xlu1 %4447, %v2027_v57   ;;  %v323_v56 = vld [vmem:[%s4596_s17 + $0x70] sm:$0xff]  ;;  %v2042_v57 = vld [vmem:[%s5192_s28 + $0xa8] sm:$0xff] }
 0x136   : > { %v1679_v62 = vsel %vm586_vm2, %v1656_v61, %v1597_v58  ;;  %2081 = vperm.xlu0 %4446, %v2028_v34  }
 0x137   : > { %4195 = vmatmul.mubr.msk.f32.gmra.mrb[68].mxu0 %vm895_vm3, %v1679_v62  ;;  %v514_v18 = vpop.permute.xlu1 %513  ;;  %v1408_v62 = vld [vmem:[%s4596_s17 + $0x94] sm:$0xff] }
 0x138   : > { %v422_v3 = vpop.permute.xlu0 %421  ;;  %4197 = vmatprep.mubr.msk.f32.mxu0 %vm4493_vm1, %v4492_v4 }
 0x139   : > { %v573_v5 = vsel %vm562_vm0, %v319_v63, %v422_v3  ;;  %2086 = vperm.xlu1 %4447, %v2029_v0   ;;  %v324_v3 = vld [vmem:[%s4596_s17 + $0x78] sm:$0xff] }
 0x13a   : > { %v597_v7 = vsel %vm586_vm2, %v573_v5, %v514_v18  ;;  %2091 = vperm.xlu0 %4446, %v2030_v1  }
 0x13b   : > { %4123 = vmatmul.mubr.msk.f32.gmra.mrb[16].mxu1 %vm895_vm3, %v597_v7  ;;  %v1599_v11 = vpop.permute.xlu1 %1598 }
 0x13c   : > { %v1507_v15 = vpop.permute.xlu0 %1506  ;;  %4125 = vmatprep.mubr.msk.f32.mxu1 %vm4493_vm1, %v4492_v4 }
 0x13d   : > { %v1657_v40 = vsel %vm562_vm0, %v1404_v8, %v1507_v15  ;;  %2096 = vperm.xlu1 %4447, %v2031_v9  }
 0x13e   : > { %v1680_v17 = vsel %vm586_vm2, %v1657_v40, %v1599_v11  ;;  %2101 = vperm.xlu0 %4446, %v2032_v13   ;;  %v1409_v11 = vld [vmem:[%s4596_s17 + $0x9c] sm:$0xff] }
 0x13f   : > { %4198 = vmatmul.mubr.msk.f32.gmra.mrb[70].mxu0 %vm895_vm3, %v1680_v17  ;;  %v516_v20 = vpop.permute.xlu1 %515 }
 0x140   : > { %v424_v26 = vpop.permute.xlu0 %423  ;;  %4200 = vmatprep.mubr.msk.f32.mxu0 %vm4493_vm1, %v4492_v4 }
 0x141   : > { %v574_v27 = vsel %vm562_vm0, %v320_v22, %v424_v26  ;;  %2106 = vperm.xlu1 %4447, %v2033_v6  }
 0x142   : > { %v598_v10 = vsel %vm586_vm2, %v574_v27, %v516_v20  ;;  %2111 = vperm.xlu0 %4446, %v2034_v21   ;;  %v325_v20 = vld [vmem:[%s4596_s17 + $0x80] sm:$0xff] }
 0x143   : > { %4126 = vmatmul.mubr.msk.f32.gmra.mrb[18].mxu1 %vm895_vm3, %v598_v10  ;;  %v1601_v31 = vpop.permute.xlu1 %1600 }
 0x144   : > { %v1509_v19 = vpop.permute.xlu0 %1508  ;;  %4128 = vmatprep.mubr.msk.f32.mxu1 %vm4493_vm1, %v4492_v4 }
 0x145   : > { %v1658_v25 = vsel %vm562_vm0, %v1405_v29, %v1509_v19  ;;  %2116 = vperm.xlu1 %4447, %v2035_v30  }
 0x146   : > { %v1681_v23 = vsel %vm586_vm2, %v1658_v25, %v1601_v31  ;;  %2121 = vperm.xlu0 %4446, %v2036_v32   ;;  %v1410_v31 = vld [vmem:[%s4596_s17 + $0xa4] sm:$0xff] }
 0x147   : > { %4201 = vmatmul.mubr.msk.f32.gmra.mrb[72].mxu0 %vm895_vm3, %v1681_v23  ;;  %v518_v46 = vpop.permute.xlu1 %517 }
 0x148   : > { %v426_v35 = vpop.permute.xlu0 %425  ;;  %4203 = vmatprep.mubr.msk.f32.mxu0 %vm4493_vm1, %v4492_v4 }
 0x149   : > { %v575_v36 = vsel %vm562_vm0, %v321_v24, %v426_v35  ;;  %2126 = vperm.xlu1 %4447, %v2037_v12  }
 0x14a   : > { %v599_v38 = vsel %vm586_vm2, %v575_v36, %v518_v46  ;;  %2131 = vperm.xlu0 %4446, %v2038_v33   ;;  %v326_v46 = vld [vmem:[%s4596_s17 + $0x88] sm:$0xff] }
 0x14b   : > { %4129 = vmatmul.mubr.msk.f32.gmra.mrb[20].mxu1 %vm895_vm3, %v599_v38  ;;  %v1603_v41 = vpop.permute.xlu1 %1602 }
 0x14c   : > { %v1511_v42 = vpop.permute.xlu0 %1510  ;;  %4131 = vmatprep.mubr.msk.f32.mxu1 %vm4493_vm1, %v4492_v4 }
 0x14d   : > { %v1659_v43 = vsel %vm562_vm0, %v1406_v37, %v1511_v42  ;;  %2136 = vperm.xlu1 %4447, %v2039_v39  }
 0x14e   : > { %v1682_v14 = vsel %vm586_vm2, %v1659_v43, %v1603_v41  ;;  %2141 = vperm.xlu0 %4446, %v2040_v2   ;;  %v1411_v41 = vld [vmem:[%s4596_s17 + $0xac] sm:$0xff] }
 0x14f   : > { %4204 = vmatmul.mubr.msk.f32.gmra.mrb[74].mxu0 %vm895_vm3, %v1682_v14  ;;  %v520_v28 = vpop.permute.xlu1 %519 }
 0x150   : > { %v428_v47 = vpop.permute.xlu0 %427  ;;  %4206 = vmatprep.mubr.msk.f32.mxu0 %vm4493_vm1, %v4492_v4 }
 0x151   : > { %v576_v48 = vsel %vm562_vm0, %v322_v44, %v428_v47  ;;  %2146 = vperm.xlu1 %4447, %v2041_v52  }
 0x152   : > { %v600_v49 = vsel %vm586_vm2, %v576_v48, %v520_v28  ;;  %2046 = vperm.xlu0 %4446, %v2021_v45   ;;  %v327_v28 = vld [vmem:[%s4596_s17 + $0x90] sm:$0xff] }
 0x153   : > { %4132 = vmatmul.mubr.msk.f32.gmra.mrb[22].mxu1 %vm895_vm3, %v600_v49  ;;  %v1605_v53 = vpop.permute.xlu1 %1604 }
 0x154   : > { %v1513_v16 = vpop.permute.xlu0 %1512  ;;  %4134 = vmatprep.mubr.msk.f32.mxu1 %vm4493_vm1, %v4492_v4 }
 0x155   : > { %v1660_v59 = vsel %vm562_vm0, %v1407_v50, %v1513_v16  ;;  %2051 = vperm.xlu1 %4447, %v2022_v51  }
 0x156   : > { %v1683_v55 = vsel %vm586_vm2, %v1660_v59, %v1605_v53  ;;  %2156 = vperm.xlu0 %4446, %v2043_v54   ;;  %v1412_v53 = vld [vmem:[%s4596_s17 + $0xb4] sm:$0xff] }
 0x157   : > { %4207 = vmatmul.mubr.msk.f32.gmra.mrb[76].mxu0 %vm895_vm3, %v1683_v55  ;;  %v522_v58 = vpop.permute.xlu1 %521 }
 0x158   : > { %v430_v34 = vpop.permute.xlu0 %429  ;;  %4209 = vmatprep.mubr.msk.f32.mxu0 %vm4493_vm1, %v4492_v4 }
 0x159   : > { %v577_v60 = vsel %vm562_vm0, %v323_v56, %v430_v34  ;;  %2151 = vperm.xlu1 %4447, %v2042_v57  }
 0x15a   : > { %v601_v61 = vsel %vm586_vm2, %v577_v60, %v522_v58  ;;  %v328_v58 = vld [vmem:[%s4596_s17 + $0x98] sm:$0xff] }
 0x15b   : > { %4135 = vmatmul.mubr.msk.f32.gmra.mrb[24].mxu1 %vm895_vm3, %v601_v61  ;;  %v1607_v63 = vpop.permute.xlu1 %1606 }
 0x15c   : > { %v1515_v0 = vpop.permute.xlu0 %1514  ;;  %4137 = vmatprep.mubr.msk.f32.mxu1 %vm4493_vm1, %v4492_v4 }
 0x15d   : > { %v1661_v18 = vsel %vm562_vm0, %v1408_v62, %v1515_v0 }
 0x15e   : > { %v1684_v1 = vsel %vm586_vm2, %v1661_v18, %v1607_v63  ;;  %v1413_v18 = vld [vmem:[%s4596_s17 + $0xbc] sm:$0xff] }
 0x15f   : > { %4210 = vmatmul.mubr.msk.f32.gmra.mrb[78].mxu0 %vm895_vm3, %v1684_v1  ;;  %v524_v5 = vpop.permute.xlu1 %523 }
 0x160   : > { %v432_v7 = vpop.permute.xlu0 %431  ;;  %4212 = vmatprep.mubr.msk.f32.mxu0 %vm4493_vm1, %v4492_v4 }
 0x161   : > { %v578_v8 = vsel %vm562_vm0, %v324_v3, %v432_v7 }
 0x162   : > { %v602_v9 = vsel %vm586_vm2, %v578_v8, %v524_v5 }
 0x163   : > { %4138 = vmatmul.mubr.msk.f32.gmra.mrb[26].mxu1 %vm895_vm3, %v602_v9  ;;  %v1609_v13 = vpop.permute.xlu1 %1608 }
 0x164   : > { %v1517_v15 = vpop.permute.xlu0 %1516  ;;  %v5310_v40 = vpop.f32.mrb[0].mxu0  ;;  %4140 = vmatprep.mubr.msk.f32.mxu1 %vm4493_vm1, %v4492_v4 }
 0x165   : > { %v1662_v17 = vsel %vm562_vm0, %v1409_v11, %v1517_v15  ;;  %v4019_v22 = vpop.f32.mrb[1].mxu0  ;;  %v329_v11 = vld [vmem:[%s4596_s17 + $0xa0] sm:$0xff] }
 0x166   : > { %v1685_v6 = vsel %vm586_vm2, %v1662_v17, %v1609_v13 }
 0x167   : > { %4213 = vmatmul.mubr.msk.f32.gmra.mrb[80].mxu0 %vm895_vm3, %v1685_v6  ;;  %v526_v21 = vpop.permute.xlu1 %525 }
 0x168   : > { %v434_v26 = vpop.permute.xlu0 %433  ;;  %v5318_v27 = vpop.f32.mrb[2].mxu0  ;;  %4215 = vmatprep.mubr.msk.f32.mxu0 %vm4493_vm1, %v4492_v4 }
 0x169   : > { %v579_v10 = vsel %vm562_vm0, %v325_v20, %v434_v26  ;;  %v4022_v29 = vpop.f32.mrb[3].mxu0 }
 0x16a   : > { %v603_v30 = vsel %vm586_vm2, %v579_v10, %v526_v21  ;;  %v1414_v21 = vld [vmem:[%s4596_s17 + $0xc4] sm:$0xff] }
 0x16b   : > { %4141 = vmatmul.mubr.msk.f32.gmra.mrb[28].mxu1 %vm895_vm3, %v603_v30  ;;  %v1611_v32 = vpop.permute.xlu1 %1610 }
 0x16c   : > { %v1519_v19 = vpop.permute.xlu0 %1518  ;;  %v5326_v25 = vpop.f32.mrb[4].mxu0  ;;  %4143 = vmatprep.mubr.msk.f32.mxu1 %vm4493_vm1, %v4492_v4 }
 0x16d   : > { %v1663_v23 = vsel %vm562_vm0, %v1410_v31, %v1519_v19  ;;  %v4025_v24 = vpop.f32.mrb[5].mxu0  ;;  %v330_v19 = vld [vmem:[%s4596_s17 + $0xa8] sm:$0xff] }
 0x16e   : > { %v1686_v12 = vsel %vm586_vm2, %v1663_v23, %v1611_v32 }
 0x16f   : > { %4216 = vmatmul.mubr.msk.f32.gmra.mrb[82].mxu0 %vm895_vm3, %v1686_v12  ;;  %v528_v33 = vpop.permute.xlu1 %527 }
 0x170   : > { %v436_v35 = vpop.permute.xlu0 %435  ;;  %v5334_v36 = vpop.f32.mrb[6].mxu0  ;;  %4218 = vmatprep.mubr.msk.f32.mxu0 %vm4493_vm1, %v4492_v4 }
 0x171   : > { %v580_v38 = vsel %vm562_vm0, %v326_v46, %v436_v35  ;;  %v4028_v37 = vpop.f32.mrb[7].mxu0 }
 0x172   : > { %v604_v39 = vsel %vm586_vm2, %v580_v38, %v528_v33  ;;  %v1415_v38 = vld [vmem:[%s4596_s17 + $0xcc] sm:$0xff] }
 0x173   : > { %4144 = vmatmul.mubr.msk.f32.gmra.mrb[30].mxu1 %vm895_vm3, %v604_v39  ;;  %v1613_v2 = vpop.permute.xlu1 %1612 }
 0x174   : > { %v1521_v42 = vpop.permute.xlu0 %1520  ;;  %v5342_v43 = vpop.f32.mrb[8].mxu0  ;;  %4146 = vmatprep.mubr.msk.f32.mxu1 %vm4493_vm1, %v4492_v4 }
 0x175   : > { %v1664_v14 = vsel %vm562_vm0, %v1411_v41, %v1521_v42  ;;  %v4031_v44 = vpop.f32.mrb[9].mxu0 }
 0x176   : > { %v1687_v52 = vsel %vm586_vm2, %v1664_v14, %v1613_v2  ;;  %v331_v44 = vld [vmem:[%s4596_s17 + $0xb0] sm:$0xf] }
 0x177   : > { %4219 = vmatmul.mubr.msk.f32.gmra.mrb[84].mxu0 %vm895_vm3, %v1687_v52  ;;  %v530_v45 = vpop.permute.xlu1 %529 }
 0x178   : > { %v438_v47 = vpop.permute.xlu0 %437  ;;  %v5350_v48 = vpop.f32.mrb[10].mxu0  ;;  %4221 = vmatprep.mubr.msk.f32.mxu0 %vm4493_vm1, %v4492_v4 }
 0x179   : > { %v581_v49 = vsel %vm562_vm0, %v327_v28, %v438_v47  ;;  %v4034_v50 = vpop.f32.mrb[11].mxu0 }
 0x17a   : > { %v605_v51 = vsel %vm586_vm2, %v581_v49, %v530_v45 }
 0x17b   : > { %4147 = vmatmul.mubr.msk.f32.gmra.mrb[32].mxu1 %vm895_vm3, %v605_v51  ;;  %v1615_v54 = vpop.permute.xlu1 %1614  ;;  %v1416_v51 = vld [vmem:[%s4596_s17 + $0xd4] sm:$0xf] }
 0x17c   : > { %v1523_v16 = vpop.permute.xlu0 %1522  ;;  %v5358_v59 = vpop.f32.mrb[12].mxu0  ;;  %4149 = vmatprep.mubr.msk.f32.mxu1 %vm4493_vm1, %v4492_v4 }
 0x17d   : > { %v1665_v55 = vsel %vm562_vm0, %v1412_v53, %v1523_v16  ;;  %v4037_v56 = vpop.f32.mrb[13].mxu0 }
 0x17e   : > { %v1688_v57 = vsel %vm586_vm2, %v1665_v55, %v1615_v54 }
 0x17f   : > { %4222 = vmatmul.mubr.msk.f32.gmra.mrb[86].mxu0 %vm895_vm3, %v1688_v57  ;;  %v532_v34 = vpop.permute.xlu1 %531 }
 0x180   : > { %v440_v60 = vpop.permute.xlu0 %439  ;;  %v5366_v61 = vpop.f32.mrb[14].mxu0  ;;  %4224 = vmatprep.mubr.msk.f32.mxu0 %vm4493_vm1, %v4492_v4 }
 0x181   : > { %v582_v62 = vsel %vm562_vm0, %v328_v58, %v440_v60  ;;  %v4040_v63 = vpop.f32.mrb[15].mxu0 }
 0x182   : > { %v606_v0 = vsel %vm586_vm2, %v582_v62, %v532_v34 }
 0x183   : > { %4150 = vmatmul.mubr.msk.f32.gmra.mrb[34].mxu1 %vm895_vm3, %v606_v0  ;;  %v1617_v1 = vpop.permute.xlu1 %1616 }
 0x184   : > { %v1525_v3 = vpop.permute.xlu0 %1524  ;;  %v5374_v5 = vpop.f32.mrb[16].mxu0  ;;  %4152 = vmatprep.mubr.msk.f32.mxu1 %vm4493_vm1, %v4492_v4 }
 0x185   : > { %v1666_v7 = vsel %vm562_vm0, %v1413_v18, %v1525_v3  ;;  %v4043_v8 = vpop.f32.mrb[17].mxu0 }
 0x186   : > { %v1689_v9 = vsel %vm586_vm2, %v1666_v7, %v1617_v1 }
 0x187   : > { %4225 = vmatmul.mubr.msk.f32.gmra.mrb[88].mxu0 %vm895_vm3, %v1689_v9  ;;  %v534_v13 = vpop.permute.xlu1 %533 }
 0x188   : > { %v442_v15 = vpop.permute.xlu0 %441  ;;  %v5382_v17 = vpop.f32.mrb[18].mxu0  ;;  %4227 = vmatprep.mubr.msk.f32.mxu0 %vm4493_vm1, %v4492_v4 }
 0x189   : > { %v583_v22 = vsel %vm562_vm0, %v329_v11, %v442_v15  ;;  %v4046_v6 = vpop.f32.mrb[19].mxu0 }
 0x18a   : > { %v607_v20 = vsel %vm586_vm2, %v583_v22, %v534_v13 }
 0x18b   : > { %4153 = vmatmul.mubr.msk.f32.gmra.mrb[36].mxu1 %vm895_vm3, %v607_v20  ;;  %v1619_v26 = vpop.permute.xlu1 %1618 }
 0x18c   : > { %v1527_v10 = vpop.permute.xlu0 %1526  ;;  %v5390_v29 = vpop.f32.mrb[20].mxu0  ;;  %4155 = vmatprep.mubr.msk.f32.mxu1 %vm4493_vm1, %v4492_v4 }
 0x18d   : > { %v1667_v30 = vsel %vm562_vm0, %v1414_v21, %v1527_v10  ;;  %v4049_v31 = vpop.f32.mrb[21].mxu0 }
 0x18e   : > { %v1690_v32 = vsel %vm586_vm2, %v1667_v30, %v1619_v26 }
 0x18f   : > { %4228 = vmatmul.mubr.msk.f32.gmra.mrb[90].mxu0 %vm895_vm3, %v1690_v32  ;;  %v536_v23 = vpop.permute.xlu1 %535 }
 0x190   : > { %v444_v24 = vpop.permute.xlu0 %443  ;;  %v5398_v12 = vpop.f32.mrb[22].mxu0  ;;  %4230 = vmatprep.mubr.msk.f32.mxu0 %vm4493_vm1, %v4492_v4 }
 0x191   : > { %v584_v46 = vsel %vm562_vm0, %v330_v19, %v444_v24  ;;  %v4052_v33 = vpop.f32.mrb[23].mxu0 }
 0x192   : > { %v608_v35 = vsel %vm586_vm2, %v584_v46, %v536_v23 }
 0x193   : > { %4156 = vmatmul.mubr.msk.f32.gmra.mrb[38].mxu1 %vm895_vm3, %v608_v35  ;;  %v1621_v37 = vpop.permute.xlu1 %1620 }
 0x194   : > { %v1529_v39 = vpop.permute.xlu0 %1528  ;;  %v5406_v41 = vpop.f32.mrb[24].mxu0  ;;  %4158 = vmatprep.mubr.msk.f32.mxu1 %vm4493_vm1, %v4492_v4 }
 0x195   : > { %v1668_v2 = vsel %vm562_vm0, %v1415_v38, %v1529_v39  ;;  %v4055_v42 = vpop.f32.mrb[25].mxu0 }
 0x196   : > { %v1691_v14 = vsel %vm586_vm2, %v1668_v2, %v1621_v37 }
 0x197   : > { %4231 = vmatmul.mubr.msk.f32.gmra.mrb[92].mxu0 %vm895_vm3, %v1691_v14  ;;  %v538_v52 = vpop.permute.xlu1 %537 }
 0x198   : > { %v446_v28 = vpop.permute.xlu0 %445  ;;  %v5414_v45 = vpop.f32.mrb[26].mxu0  ;;  %4233 = vmatprep.mubr.msk.f32.mxu0 %vm4493_vm1, %v4492_v4 }
 0x199   : > { %v585_v47 = vsel %vm562_vm0, %v331_v44, %v446_v28  ;;  %v4058_v49 = vpop.f32.mrb[27].mxu0 }
 0x19a   : > { %v609_v50 = vsel %vm586_vm2, %v585_v47, %v538_v52  ;;  %v5478_v47 = vld [vmem:[%s6181_s3] ss:$0 sm:$0xff] }
 0x19b   : > { %4159 = vmatmul.mubr.msk.f32.gmra.mrb[40].mxu1 %vm895_vm3, %v609_v50  ;;  %v1623_v53 = vpop.permute.xlu1 %1622 }
 0x19c   : > { %v1531_v54 = vpop.permute.xlu0 %1530  ;;  %v5422_v16 = vpop.f32.mrb[28].mxu0 }
 0x19d   : > { %v1669_v55 = vsel %vm562_vm0, %v1416_v51, %v1531_v54  ;;  %v4061_v56 = vpop.f32.mrb[29].mxu0 }
 0x19e   : > { %v1692_v57 = vsel %vm586_vm2, %v1669_v55, %v1623_v53 }
 0x19f   : > { %4234 = vmatmul.mubr.msk.f32.gmra.mrb[94].mxu0 %vm895_vm3, %v1692_v57 }
 0x1a0   : > { %v5427_v4 = vpop.f32.mrb[30].mxu0 }
 0x1a1   : > { %v4064_v58 = vpop.f32.mrb[31].mxu0 }
 0x1a4   : > { %v5429_v34 = vpop.f32.mrb[32].mxu0 }
 0x1a5   : > { %v4067_v60 = vpop.f32.mrb[33].mxu0 }
 0x1a8   : > { %v5431_v62 = vpop.f32.mrb[34].mxu0 }
 0x1a9   : > { %v4070_v63 = vpop.f32.mrb[35].mxu0 }
 0x1ac   : > { %v5433_v0 = vpop.f32.mrb[36].mxu0  ;;  %v5435_v18 = vpop.permute.xlu1 %2061 }
 0x1ad   : > { %v2057_v1 = vpop.permute.xlu0 %2056  ;;  %v4073_v3 = vpop.f32.mrb[37].mxu0 }
 0x1b0   : > { %v5437_v7 = vpop.f32.mrb[38].mxu0  ;;  %v5439_v8 = vpop.permute.xlu1 %2066 }
 0x1b1   : > { %v5441_v9 = vpop.permute.xlu0 %2071  ;;  %v4076_v11 = vpop.f32.mrb[39].mxu0 }
 0x1b4   : > { %v5443_v13 = vpop.f32.mrb[40].mxu0  ;;  %v5445_v15 = vpop.permute.xlu1 %2076 }
 0x1b5   : > { %v5447_v22 = vpop.permute.xlu0 %2081  ;;  %v4079_v6 = vpop.f32.mrb[41].mxu0 }
 0x1b8   : > { %v5449_v20 = vpop.f32.mrb[42].mxu0  ;;  %v5451_v21 = vpop.permute.xlu1 %2086 }
 0x1b9   : > { %v5453_v26 = vpop.permute.xlu0 %2091  ;;  %v4082_v10 = vpop.f32.mrb[43].mxu0 }
 0x1bc   : > { %v5455_v30 = vpop.f32.mrb[44].mxu0  ;;  %v5457_v31 = vpop.permute.xlu1 %2096 }
 0x1bd   : > { %v5459_v32 = vpop.permute.xlu0 %2101  ;;  %v4085_v19 = vpop.f32.mrb[45].mxu0 }
 0x1c0   : > { %v5461_v23 = vpop.permute.xlu1 %2106  ;;  %v1280_v24 = vpop.f32.mrb[46].mxu0 }
 0x1c1   : > { %v5463_v46 = vpop.permute.xlu0 %2111  ;;  %v1281_v33 = vadd.f32 %v1280_v24, %v5310_v40  ;;  %v4094_v35 = vpop.f32.mrb[47].mxu0 }
 0x1c4   : > { %v5466_v38 = vpop.permute.xlu1 %2116  ;;  %v1285_v37 = vpop.f32.mrb[48].mxu0 }
 0x1c5   : > { %v5468_v39 = vpop.permute.xlu0 %2121  ;;  %v1286_v2 = vadd.f32 %v1285_v37, %v5318_v27  ;;  %v4097_v42 = vpop.f32.mrb[49].mxu0 }
 0x1c8   : > { %v5471_v14 = vpop.permute.xlu1 %2126  ;;  %v1831_v44 = vpop.f32.mrb[50].mxu0 }
 0x1c9   : > { %v5473_v52 = vpop.permute.xlu0 %2131  ;;  %v1945_v28 = vadd.f32 %v1831_v44, %v1281_v33  ;;  %v4169_v40 = vpop.f32.mrb[51].mxu0 }
 0x1cb   : > { %v1975_v49 = vadd.f32 %v5478_v47, %v1945_v28 }
 0x1cc   : > { %v5481_v50 = vpop.permute.xlu1 %2136  ;;  %v1836_v51 = vpop.f32.mrb[52].mxu0 }
 0x1cd   : > { %v5483_v53 = vpop.permute.xlu0 %2141  ;;  %v1946_v27 = vadd.f32 %v1836_v51, %v1286_v2  ;;  %v1290_v54 = vpop.f32.mrb[0].mxu1  ;;  %v1998_v60 = vmax.f32 %v1975_v49, 0.0 }
 0x1ce   : > { %v1291_v55 = vadd.f32 %v1290_v54, %v5326_v25  ;;  %v4172_v56 = vpop.f32.mrb[53].mxu0  ;;  %v4100_v57 = vpop.f32.mrb[1].mxu1 }
 0x1cf   : > { %v1976_v58 = vadd.f32 %v5478_v47, %v1946_v27 }
 0x1d0   : > { %v5487_v63 = vpop.permute.xlu1 %2146 }
 0x1d1   : > { %v2047_v3 = vpop.permute.xlu0 %2046  ;;  %v1841_v11 = vpop.f32.mrb[54].mxu0  ;;  %v1999_v24 = vmax.f32 %v1976_v58, 0.0 }
 0x1d2   : > { %v2159_v6 = vmul.f32 %v2047_v3, %v1998_v60  ;;  %v1947_v10 = vadd.f32 %v1841_v11, %v1291_v55  ;;  %v4175_v19 = vpop.f32.mrb[55].mxu0 }
 0x1d4   : > { %2184 = vst.msk [vmem:[#allocation2 + $0x1] sm:$0xff] %vm562_vm0, %v2159_v6  ;;  %v1977_v33 = vadd.f32 %v5478_v47, %v1947_v10  ;;  %v2052_v35 = vpop.permute.xlu1 %2051 }
 0x1d5   : > { %v2160_v37 = vmul.f32 %v2052_v35, %v1999_v24  ;;  %v1295_v25 = vpop.f32.mrb[2].mxu1  ;;  %v2667_v24 = vld [vmem:[%s6182_s4 + $0x20] sm:$0xff] }
 0x1d6   : > { %v2000_v2 = vmax.f32 %v1977_v33, 0.0  ;;  %v1296_v42 = vadd.f32 %v1295_v25, %v5334_v36  ;;  %v4103_v44 = vpop.f32.mrb[3].mxu1 }
 0x1d7   : > { %2185 = vst.msk [vmem:[#allocation2 + $0x9] sm:$0xff] %vm562_vm0, %v2160_v37  ;;  %v2668_v44 = vld [vmem:[%s6182_s4 + $0x28] sm:$0xff] }
 0x1d8   : > { %v2161_v28 = vmul.f32 %v2057_v1, %v2000_v2 }
 0x1da   : > { %2186 = vst.msk [vmem:[#allocation2 + $0x11] sm:$0xff] %vm562_vm0, %v2161_v28  ;;  %v1846_v40 = vpop.f32.mrb[56].mxu0 }
 0x1db   : > { %v1948_v49 = vadd.f32 %v1846_v40, %v1296_v42  ;;  %v4178_v51 = vpop.f32.mrb[57].mxu0  ;;  %v2229_v27 = vld [vmem:[#allocation2 + $0x1] sm:$0xff] }
 0x1dc   : > { %2283 = vrot.lane.b32.xlu0 %v2229_v27, %s4494_s18 }
 0x1dd   : > { %v1978_v54 = vadd.f32 %v5478_v47, %v1948_v49 }
 0x1de   : > { %v1300_v55 = vpop.f32.mrb[4].mxu1  ;;  %v2247_v56 = vld [vmem:[#allocation2 + $0x2] sm:$0xff] }
 0x1df   : > { %v2230_v57 = vld [vmem:[#allocation2 + $0x9] sm:$0xff]  ;;  %v2001_v58 = vmax.f32 %v1978_v54, 0.0  ;;  %v1301_v36 = vadd.f32 %v1300_v55, %v5342_v43  ;;  %v4106_v60 = vpop.f32.mrb[5].mxu1  ;;  %v2666_v43 = vld [vmem:[%s6182_s4 + $0x18] sm:$0xff] }
 0x1e0   : > { %2285 = vrot.lane.b32.xlu1 %v2230_v57, %s4494_s18  ;;  %2355 = vrot.lane.b32.xlu0 %v2247_v56, %s4495_s19 }
 0x1e1   : > { %v2162_v1 = vmul.f32 %v5435_v18, %v2001_v58  ;;  %v2248_v3 = vld [vmem:[#allocation2 + $0xa] sm:$0xff]  ;;  %v4344_v18 = vpack.c.bf16 %v2667_v24, %v2666_v43 }
 0x1e2   : > { %v2231_v11 = vld [vmem:[#allocation2 + $0x11] sm:$0xff]  ;;  %v1851_v6 = vpop.f32.mrb[58].mxu0 }
 0x1e3   : > { %2187 = vst.msk [vmem:[#allocation2 + $0x19] sm:$0xff] %vm562_vm0, %v2162_v1  ;;  %v1949_v10 = vadd.f32 %v1851_v6, %v1301_v36  ;;  %v4181_v19 = vpop.f32.mrb[59].mxu0  ;;  %4345 = vmatprep.subr.bf16.mxu1 %v4344_v18 }
 0x1e4   : > { %2357 = vrot.lane.b32.xlu1 %v2248_v3, %s4495_s19  ;;  %2287 = vrot.lane.b32.xlu0 %v2231_v11, %s4494_s18 }
 0x1e5   : > { %v1979_v33 = vadd.f32 %v5478_v47, %v1949_v10  ;;  %4347 = vmatpush3.bf16.msra.mxu1 %v4344_v18 }
 0x1e6   : > { %v1305_v35 = vpop.f32.mrb[6].mxu1  ;;  %4240 = vmatprep.subr.mxu1 %v2668_v44 }
 0x1e7   : > { %v2002_v37 = vmax.f32 %v1979_v33, 0.0  ;;  %v1306_v25 = vadd.f32 %v1305_v35, %v5350_v48  ;;  %v4109_v2 = vpop.f32.mrb[7].mxu1 }
 0x1e9   : > { %v2163_v42 = vmul.f32 %v5439_v8, %v2002_v37  ;;  %4241 = vmatpush3.msra.mxu1 %v2668_v44 }
 0x1ea   : > { %v1856_v28 = vpop.f32.mrb[60].mxu0  ;;  %v2450_v40 = vld [vmem:[#allocation2 + $0x13] sm:$0xff] }
 0x1eb   : > { %v2232_v49 = vld [vmem:[#allocation2 + $0x19] sm:$0xff]  ;;  %2188 = vst.msk [vmem:[#allocation2 + $0x21] sm:$0xff] %vm562_vm0, %v2163_v42  ;;  %v1950_v51 = vadd.f32 %v1856_v28, %v1306_v25  ;;  %2504 = vrot.lane.b32.xlu0 %v2450_v40, %s4494_s18  ;;  %v4184_v48 = vpop.f32.mrb[61].mxu0 }
 0x1ec   : > { %2289 = vrot.lane.b32.xlu1 %v2232_v49, %s4494_s18  ;;  %v2468_v54 = vld [vmem:[#allocation2 + $0x14] sm:$0xff] }
 0x1ed   : > { %v1980_v27 = vadd.f32 %v5478_v47, %v1950_v51  ;;  %v5522_v60 = vld [vmem:[#allocation2 + $0x12] sm:$0xff] }
 0x1ee   : > { %v1310_v8 = vpop.f32.mrb[8].mxu1 }
 0x1ef   : > { %v2003_v55 = vmax.f32 %v1980_v27, 0.0  ;;  %v1311_v56 = vadd.f32 %v1310_v8, %v5358_v59  ;;  %v4112_v57 = vpop.f32.mrb[9].mxu1  ;;  %2576 = vrot.lane.b32.xlu0 %v2468_v54, %s4495_s19 }
 0x1f1   : > { %v2164_v58 = vmul.f32 %v5441_v9, %v2003_v55 }
 0x1f2   : > { %v1861_v36 = vpop.f32.mrb[62].mxu0  ;;  %v2451_v1 = vld [vmem:[#allocation2 + $0x1b] sm:$0xff] }
 0x1f3   : > { %2189 = vst.msk [vmem:[#allocation2 + $0x29] sm:$0xff] %vm562_vm0, %v2164_v58  ;;  %v1951_v3 = vadd.f32 %v1861_v36, %v1311_v56  ;;  %2359 = vrot.lane.b32.xlu0 %v5522_v60, %s4495_s19  ;;  %2506 = vrot.lane.b32.xlu1 %v2451_v1, %s4494_s18  ;;  %v4187_v11 = vpop.f32.mrb[63].mxu0  ;;  %v2469_v10 = vld [vmem:[#allocation2 + $0x1c] sm:$0xff] }
 0x1f4   : > { %v2233_v19 = vld [vmem:[#allocation2 + $0x21] sm:$0xff] }
 0x1f5   : > { %v1981_v59 = vadd.f32 %v5478_v47, %v1951_v3  ;;  %v5533_v35 = vld [vmem:[#allocation2 + $0x1a] sm:$0xff] }
 0x1f6   : > { %v1315_v6 = vpop.f32.mrb[10].mxu1 }
 0x1f7   : > { %v2004_v43 = vmax.f32 %v1981_v59, 0.0  ;;  %v1316_v9 = vadd.f32 %v1315_v6, %v5366_v61  ;;  %v4115_v24 = vpop.f32.mrb[11].mxu1  ;;  %2578 = vrot.lane.b32.xlu1 %v2469_v10, %s4495_s19  ;;  %2291 = vrot.lane.b32.xlu0 %v2233_v19, %s4494_s18 }
 0x1f9   : > { %v2165_v18 = vmul.f32 %v5445_v15, %v2004_v43 }
 0x1fa   : > { %v1866_v33 = vpop.f32.mrb[64].mxu0  ;;  %v2452_v37 = vld [vmem:[#allocation2 + $0x23] sm:$0xff] }
 0x1fb   : > { %2190 = vst.msk [vmem:[#allocation2 + $0x31] sm:$0xff] %vm562_vm0, %v2165_v18  ;;  %v1952_v25 = vadd.f32 %v1866_v33, %v1316_v9  ;;  %2361 = vrot.lane.b32.xlu1 %v5533_v35, %s4495_s19  ;;  %2508 = vrot.lane.b32.xlu0 %v2452_v37, %s4494_s18  ;;  %v4190_v61 = vpop.f32.mrb[65].mxu0  ;;  %v2470_v44 = vld [vmem:[#allocation2 + $0x24] sm:$0xff] }
 0x1fc   : > { %v2234_v28 = vld [vmem:[#allocation2 + $0x29] sm:$0xff] }
 0x1fd   : > { %v1982_v2 = vadd.f32 %v5478_v47, %v1952_v25  ;;  %v5544_v27 = vld [vmem:[#allocation2 + $0x22] sm:$0xff] }
 0x1fe   : > { %v1320_v42 = vpop.f32.mrb[12].mxu1 }
 0x1ff   : > { %v2005_v40 = vmax.f32 %v1982_v2, 0.0  ;;  %v1321_v15 = vadd.f32 %v1320_v42, %v5374_v5  ;;  %v4118_v49 = vpop.f32.mrb[13].mxu1  ;;  %2580 = vrot.lane.b32.xlu0 %v2470_v44, %s4495_s19  ;;  %2293 = vrot.lane.b32.xlu1 %v2234_v28, %s4494_s18 }
 0x201   : > { %v2166_v51 = vmul.f32 %v5447_v22, %v2005_v40 }
 0x202   : > { %v1871_v48 = vpop.f32.mrb[66].mxu0  ;;  %v2453_v8 = vld [vmem:[#allocation2 + $0x2b] sm:$0xff] }
 0x203   : > { %2191 = vst.msk [vmem:[#allocation2 + $0x39] sm:$0xff] %vm562_vm0, %v2166_v51  ;;  %v1953_v54 = vadd.f32 %v1871_v48, %v1321_v15  ;;  %2363 = vrot.lane.b32.xlu0 %v5544_v27, %s4495_s19  ;;  %2510 = vrot.lane.b32.xlu1 %v2453_v8, %s4494_s18  ;;  %v4193_v5 = vpop.f32.mrb[67].mxu0  ;;  %v2471_v57 = vld [vmem:[#allocation2 + $0x2c] sm:$0xff] }
 0x204   : > { %v2235_v58 = vld [vmem:[#allocation2 + $0x31] sm:$0xff] }
 0x205   : > { %v1983_v55 = vadd.f32 %v5478_v47, %v1953_v54  ;;  %v5555_v59 = vld [vmem:[#allocation2 + $0x2a] sm:$0xff] }
 0x206   : > { %v1325_v56 = vpop.f32.mrb[14].mxu1 }
 0x207   : > { %v2006_v36 = vmax.f32 %v1983_v55, 0.0  ;;  %v1326_v22 = vadd.f32 %v1325_v56, %v5382_v17  ;;  %v4121_v1 = vpop.f32.mrb[15].mxu1  ;;  %2582 = vrot.lane.b32.xlu1 %v2471_v57, %s4495_s19  ;;  %2295 = vrot.lane.b32.xlu0 %v2235_v58, %s4494_s18 }
 0x209   : > { %v2167_v3 = vmul.f32 %v5451_v21, %v2006_v36 }
 0x20a   : > { %v1876_v11 = vpop.f32.mrb[68].mxu0  ;;  %v2454_v6 = vld [vmem:[#allocation2 + $0x33] sm:$0xff] }
 0x20b   : > { %2192 = vst.msk [vmem:[#allocation2 + $0x41] sm:$0xff] %vm562_vm0, %v2167_v3  ;;  %v1954_v10 = vadd.f32 %v1876_v11, %v1326_v22  ;;  %2365 = vrot.lane.b32.xlu1 %v5555_v59, %s4495_s19  ;;  %2512 = vrot.lane.b32.xlu0 %v2454_v6, %s4494_s18  ;;  %v4196_v17 = vpop.f32.mrb[69].mxu0  ;;  %v2472_v9 = vld [vmem:[#allocation2 + $0x34] sm:$0xff] }
 0x20c   : > { %v2236_v24 = vld [vmem:[#allocation2 + $0x39] sm:$0xff] }
 0x20d   : > { %v1984_v19 = vadd.f32 %v5478_v47, %v1954_v10  ;;  %v5566_v61 = vld [vmem:[#allocation2 + $0x32] sm:$0xff] }
 0x20e   : > { %v1330_v43 = vpop.f32.mrb[16].mxu1 }
 0x20f   : > { %v2007_v18 = vmax.f32 %v1984_v19, 0.0  ;;  %v1331_v21 = vadd.f32 %v1330_v43, %v5390_v29  ;;  %v4124_v33 = vpop.f32.mrb[17].mxu1  ;;  %2584 = vrot.lane.b32.xlu0 %v2472_v9, %s4495_s19  ;;  %2297 = vrot.lane.b32.xlu1 %v2236_v24, %s4494_s18 }
 0x211   : > { %v2168_v37 = vmul.f32 %v5453_v26, %v2007_v18 }
 0x212   : > { %v1881_v25 = vpop.f32.mrb[70].mxu0  ;;  %v2455_v2 = vld [vmem:[#allocation2 + $0x3b] sm:$0xff] }
 0x213   : > { %2193 = vst.msk [vmem:[#allocation2 + $0x49] sm:$0xff] %vm562_vm0, %v2168_v37  ;;  %v1955_v42 = vadd.f32 %v1881_v25, %v1331_v21  ;;  %2367 = vrot.lane.b32.xlu0 %v5566_v61, %s4495_s19  ;;  %2514 = vrot.lane.b32.xlu1 %v2455_v2, %s4494_s18  ;;  %v4199_v29 = vpop.f32.mrb[71].mxu0  ;;  %v2473_v40 = vld [vmem:[#allocation2 + $0x3c] sm:$0xff] }
 0x214   : > { %v2237_v15 = vld [vmem:[#allocation2 + $0x41] sm:$0xff] }
 0x215   : > { %v1985_v44 = vadd.f32 %v5478_v47, %v1955_v42  ;;  %v5577_v54 = vld [vmem:[#allocation2 + $0x3a] sm:$0xff] }
 0x216   : > { %v1335_v28 = vpop.f32.mrb[18].mxu1 }
 0x217   : > { %v2008_v49 = vmax.f32 %v1985_v44, 0.0  ;;  %v1336_v26 = vadd.f32 %v1335_v28, %v5398_v12  ;;  %v4127_v51 = vpop.f32.mrb[19].mxu1  ;;  %2586 = vrot.lane.b32.xlu1 %v2473_v40, %s4495_s19  ;;  %2299 = vrot.lane.b32.xlu0 %v2237_v15, %s4494_s18 }
 0x219   : > { %v2169_v48 = vmul.f32 %v5457_v31, %v2008_v49 }
 0x21a   : > { %v1886_v8 = vpop.f32.mrb[72].mxu0  ;;  %v2456_v5 = vld [vmem:[#allocation2 + $0x43] sm:$0xff] }
 0x21b   : > { %2194 = vst.msk [vmem:[#allocation2 + $0x51] sm:$0xff] %vm562_vm0, %v2169_v48  ;;  %v1956_v55 = vadd.f32 %v1886_v8, %v1336_v26  ;;  %2369 = vrot.lane.b32.xlu1 %v5577_v54, %s4495_s19  ;;  %2516 = vrot.lane.b32.xlu0 %v2456_v5, %s4494_s18  ;;  %v4202_v12 = vpop.f32.mrb[73].mxu0  ;;  %v2474_v58 = vld [vmem:[#allocation2 + $0x44] sm:$0xff] }
 0x21c   : > { %v2238_v36 = vld [vmem:[#allocation2 + $0x49] sm:$0xff] }
 0x21d   : > { %v1986_v56 = vadd.f32 %v5478_v47, %v1956_v55  ;;  %v5588_v6 = vld [vmem:[#allocation2 + $0x42] sm:$0xff] }
 0x21e   : > { %v1340_v57 = vpop.f32.mrb[20].mxu1 }
 0x21f   : > { %v2009_v22 = vmax.f32 %v1986_v56, 0.0  ;;  %v1341_v31 = vadd.f32 %v1340_v57, %v5406_v41  ;;  %v4130_v1 = vpop.f32.mrb[21].mxu1  ;;  %2588 = vrot.lane.b32.xlu0 %v2474_v58, %s4495_s19  ;;  %2301 = vrot.lane.b32.xlu1 %v2238_v36, %s4494_s18 }
 0x221   : > { %v2170_v3 = vmul.f32 %v5459_v32, %v2009_v22 }
 0x222   : > { %v1891_v11 = vpop.f32.mrb[74].mxu0  ;;  %v2457_v10 = vld [vmem:[#allocation2 + $0x4b] sm:$0xff] }
 0x223   : > { %2195 = vst.msk [vmem:[#allocation2 + $0x59] sm:$0xff] %vm562_vm0, %v2170_v3  ;;  %v1957_v17 = vadd.f32 %v1891_v11, %v1341_v31  ;;  %2371 = vrot.lane.b32.xlu0 %v5588_v6, %s4495_s19  ;;  %2518 = vrot.lane.b32.xlu1 %v2457_v10, %s4494_s18  ;;  %v4205_v41 = vpop.f32.mrb[75].mxu0  ;;  %v5595_v9 = vld [vmem:[#allocation2 + $0x4c] sm:$0xff] }
 0x224   : > { %v2239_v24 = vld [vmem:[#allocation2 + $0x51] sm:$0xff] }
 0x225   : > { %v1987_v19 = vadd.f32 %v5478_v47, %v1957_v17  ;;  %v5602_v25 = vld [vmem:[#allocation2 + $0x4a] sm:$0xff] }
 0x226   : > { %v1345_v43 = vpop.f32.mrb[22].mxu1 }
 0x227   : > { %v2010_v32 = vmax.f32 %v1987_v19, 0.0  ;;  %v1346_v18 = vadd.f32 %v1345_v43, %v5414_v45  ;;  %v4133_v21 = vpop.f32.mrb[23].mxu1  ;;  %2590 = vrot.lane.b32.xlu1 %v5595_v9, %s4495_s19  ;;  %2303 = vrot.lane.b32.xlu0 %v2239_v24, %s4494_s18 }
 0x229   : > { %v2171_v33 = vmul.f32 %v5461_v23, %v2010_v32 }
 0x22a   : > { %v1896_v37 = vpop.f32.mrb[76].mxu0  ;;  %v2458_v2 = vld [vmem:[#allocation2 + $0x53] sm:$0xff] }
 0x22b   : > { %2196 = vst.msk [vmem:[#allocation2 + $0x61] sm:$0xff] %vm562_vm0, %v2171_v33  ;;  %v1958_v42 = vadd.f32 %v1896_v37, %v1346_v18  ;;  %2373 = vrot.lane.b32.xlu1 %v5602_v25, %s4495_s19  ;;  %2520 = vrot.lane.b32.xlu0 %v2458_v2, %s4494_s18  ;;  %v4208_v45 = vpop.f32.mrb[77].mxu0  ;;  %v5609_v28 = vld [vmem:[#allocation2 + $0x54] sm:$0xff] }
 0x22c   : > { %v2240_v40 = vld [vmem:[#allocation2 + $0x59] sm:$0xff] }
 0x22d   : > { %v1988_v29 = vadd.f32 %v5478_v47, %v1958_v42  ;;  %v5616_v48 = vld [vmem:[#allocation2 + $0x52] sm:$0xff] }
 0x22e   : > { %v1350_v44 = vpop.f32.mrb[24].mxu1 }
 0x22f   : > { %v2011_v23 = vmax.f32 %v1988_v29, 0.0  ;;  %v1351_v15 = vadd.f32 %v1350_v44, %v5422_v16  ;;  %v4136_v49 = vpop.f32.mrb[25].mxu1  ;;  %2592 = vrot.lane.b32.xlu0 %v5609_v28, %s4495_s19  ;;  %2305 = vrot.lane.b32.xlu1 %v2240_v40, %s4494_s18 }
 0x231   : > { %v2172_v26 = vmul.f32 %v5463_v46, %v2011_v23 }
 0x232   : > { %v1901_v51 = vpop.f32.mrb[78].mxu0  ;;  %v2459_v8 = vld [vmem:[#allocation2 + $0x5b] sm:$0xff] }
 0x233   : > { %2197 = vst.msk [vmem:[#allocation2 + $0x69] sm:$0xff] %vm562_vm0, %v2172_v26  ;;  %v1959_v5 = vadd.f32 %v1901_v51, %v1351_v15  ;;  %2375 = vrot.lane.b32.xlu0 %v5616_v48, %s4495_s19  ;;  %2522 = vrot.lane.b32.xlu1 %v2459_v8, %s4494_s18  ;;  %v4211_v16 = vpop.f32.mrb[79].mxu0  ;;  %v5623_v56 = vld [vmem:[#allocation2 + $0x5c] sm:$0xff]  ;;  %v5658_v15 = vpop.permute.xlu0 %2156 }
 0x234   : > { %v2241_v57 = vld [vmem:[#allocation2 + $0x61] sm:$0xff] }
 0x235   : > { %v1989_v55 = vadd.f32 %v5478_v47, %v1959_v5  ;;  %v5630_v1 = vld [vmem:[#allocation2 + $0x5a] sm:$0xff] }
 0x236   : > { %v1355_v12 = vpop.f32.mrb[26].mxu1  ;;  %v2445_v5 = vld [vmem:[%s6182_s4] sm:$0xff] }
 0x237   : > { %v2012_v46 = vmax.f32 %v1989_v55, 0.0  ;;  %v1356_v58 = vadd.f32 %v1355_v12, %v5427_v4  ;;  %v4139_v36 = vpop.f32.mrb[27].mxu1  ;;  %2594 = vrot.lane.b32.xlu1 %v5623_v56, %s4495_s19  ;;  %2307 = vrot.lane.b32.xlu0 %v2241_v57, %s4494_s18 }
 0x239   : > { %v2173_v22 = vmul.f32 %v5466_v38, %v2012_v46 }
 0x23a   : > { %v1906_v31 = vpop.f32.mrb[80].mxu0  ;;  %v2460_v3 = vld [vmem:[#allocation2 + $0x63] sm:$0xff] }
 0x23b   : > { %2198 = vst.msk [vmem:[#allocation2 + $0x71] sm:$0xff] %vm562_vm0, %v2173_v22  ;;  %v1960_v11 = vadd.f32 %v1906_v31, %v1356_v58  ;;  %2377 = vrot.lane.b32.xlu1 %v5630_v1, %s4495_s19  ;;  %2524 = vrot.lane.b32.xlu0 %v2460_v3, %s4494_s18  ;;  %v4214_v4 = vpop.f32.mrb[81].mxu0  ;;  %v5637_v41 = vld [vmem:[#allocation2 + $0x64] sm:$0xff] }
 0x23c   : > { %v2242_v19 = vld [vmem:[#allocation2 + $0x69] sm:$0xff] }
 0x23d   : > { %v1990_v10 = vadd.f32 %v5478_v47, %v1960_v11  ;;  %v5644_v21 = vld [vmem:[#allocation2 + $0x62] sm:$0xff]  ;;  %v5685_v11 = vpop.permute.xlu1 %2151 }
 0x23e   : > { %v1360_v17 = vpop.f32.mrb[28].mxu1 }
 0x23f   : > { %v2013_v38 = vmax.f32 %v1990_v10, 0.0  ;;  %v1361_v43 = vadd.f32 %v1360_v17, %v5429_v34  ;;  %v4142_v24 = vpop.f32.mrb[29].mxu1  ;;  %2596 = vrot.lane.b32.xlu0 %v5637_v41, %s4495_s19  ;;  %2309 = vrot.lane.b32.xlu1 %v2242_v19, %s4494_s18 }
 0x241   : > { %v2174_v32 = vmul.f32 %v5468_v39, %v2013_v38 }
 0x242   : > { %v1911_v18 = vpop.f32.mrb[82].mxu0  ;;  %v2461_v33 = vld [vmem:[#allocation2 + $0x6b] sm:$0xff] }
 0x243   : > { %2199 = vst.msk [vmem:[#allocation2 + $0x79] sm:$0xff] %vm562_vm0, %v2174_v32  ;;  %v1961_v37 = vadd.f32 %v1911_v18, %v1361_v43  ;;  %2379 = vrot.lane.b32.xlu0 %v5644_v21, %s4495_s19  ;;  %2526 = vrot.lane.b32.xlu1 %v2461_v33, %s4494_s18  ;;  %v4217_v34 = vpop.f32.mrb[83].mxu0  ;;  %v5651_v45 = vld [vmem:[#allocation2 + $0x6c] sm:$0xff] }
 0x244   : > { %v2243_v29 = vld [vmem:[#allocation2 + $0x71] sm:$0xff] }
 0x245   : > { %v1991_v2 = vadd.f32 %v5478_v47, %v1961_v37  ;;  %v5660_v26 = vld [vmem:[#allocation2 + $0x6a] sm:$0xff] }
 0x246   : > { %v1365_v42 = vpop.f32.mrb[30].mxu1 }
 0x247   : > { %v2014_v39 = vmax.f32 %v1991_v2, 0.0  ;;  %v1366_v44 = vadd.f32 %v1365_v42, %v5431_v62  ;;  %v4145_v40 = vpop.f32.mrb[31].mxu1  ;;  %2598 = vrot.lane.b32.xlu1 %v5651_v45, %s4495_s19  ;;  %2311 = vrot.lane.b32.xlu0 %v2243_v29, %s4494_s18 }
 0x249   : > { %v2175_v23 = vmul.f32 %v5471_v14, %v2014_v39  ;;  %v2446_v14 = vld [vmem:[%s6182_s4 + $0x8] sm:$0xff] }
 0x24a   : > { %v1916_v49 = vpop.f32.mrb[84].mxu0  ;;  %v2462_v51 = vld [vmem:[#allocation2 + $0x73] sm:$0xff]  ;;  %v5673_v55 = vpack.c.bf16 %v2446_v14, %v2445_v5 }
 0x24b   : > { %2200 = vst.msk [vmem:[#allocation2 + $0x81] sm:$0xff] %vm562_vm0, %v2175_v23  ;;  %v1962_v8 = vadd.f32 %v1916_v49, %v1366_v44  ;;  %2381 = vrot.lane.b32.xlu1 %v5660_v26, %s4495_s19  ;;  %2528 = vrot.lane.b32.xlu0 %v2462_v51, %s4494_s18  ;;  %v4220_v62 = vpop.f32.mrb[85].mxu0  ;;  %v5677_v46 = vld [vmem:[#allocation2 + $0x74] sm:$0xff] }
 0x24c   : > { %v2244_v58 = vld [vmem:[#allocation2 + $0x79] sm:$0xff]  ;;  %4349 = vmatprep.subr.bf16.mxu1 %v5673_v55 }
 0x24d   : > { %v1992_v16 = vadd.f32 %v5478_v47, %v1962_v8  ;;  %v5687_v10 = vld [vmem:[#allocation2 + $0x72] sm:$0xff] }
 0x24e   : > { %v1370_v12 = vpop.f32.mrb[32].mxu1  ;;  %v5675_v57 = vpop.permute.xlu0 %2283 }
 0x24f   : > { %v2015_v36 = vmax.f32 %v1992_v16, 0.0  ;;  %v1371_v22 = vadd.f32 %v1370_v12, %v5433_v0  ;;  %v4148_v31 = vpop.f32.mrb[33].mxu1  ;;  %2600 = vrot.lane.b32.xlu0 %v5677_v46, %s4495_s19  ;;  %2313 = vrot.lane.b32.xlu1 %v2244_v58, %s4494_s18 }
 0x251   : > { %v2176_v3 = vmul.f32 %v5473_v52, %v2015_v36 }
 0x252   : > { %v1921_v4 = vpop.f32.mrb[86].mxu0  ;;  %v2463_v17 = vld [vmem:[#allocation2 + $0x7b] sm:$0xff]  ;;  %v5690_v19 = vpop.permute.xlu0 %2355 }
 0x253   : > { %2201 = vst.msk [vmem:[#allocation2 + $0x89] sm:$0xff] %vm562_vm0, %v2176_v3  ;;  %v1963_v0 = vadd.f32 %v1921_v4, %v1371_v22  ;;  %2383 = vrot.lane.b32.xlu0 %v5687_v10, %s4495_s19  ;;  %2530 = vrot.lane.b32.xlu1 %v2463_v17, %s4494_s18  ;;  %v4223_v38 = vpop.f32.mrb[87].mxu0  ;;  %v5696_v24 = vld [vmem:[#allocation2 + $0x7c] sm:$0xff]  ;;  %v5698_v18 = vpop.permute.xlu1 %2285 }
 0x254   : > { %v2245_v32 = vld [vmem:[#allocation2 + $0x81] sm:$0xff] }
 0x255   : > { %v1993_v43 = vadd.f32 %v5478_v47, %v1963_v0  ;;  %v5707_v39 = vld [vmem:[#allocation2 + $0x7a] sm:$0xff] }
 0x256   : > { %v1375_v52 = vpop.f32.mrb[34].mxu1  ;;  %v5705_v42 = vpop.permute.xlu0 %2287 }
 0x257   : > { %v2016_v33 = vmax.f32 %v1993_v43, 0.0  ;;  %v1376_v37 = vadd.f32 %v1375_v52, %v5437_v7  ;;  %v4151_v34 = vpop.f32.mrb[35].mxu1  ;;  %2602 = vrot.lane.b32.xlu1 %v5696_v24, %s4495_s19  ;;  %2315 = vrot.lane.b32.xlu0 %v2245_v32, %s4494_s18  ;;  %v5713_v23 = vpop.permute.xlu1 %2357 }
 0x259   : > { %v2177_v2 = vmul.f32 %v5481_v50, %v2016_v33 }
 0x25a   : > { %v1926_v29 = vpop.f32.mrb[88].mxu0  ;;  %v2464_v44 = vld [vmem:[#allocation2 + $0x83] sm:$0xff] }
 0x25b   : > { %2202 = vst.msk [vmem:[#allocation2 + $0x91] sm:$0xff] %vm562_vm0, %v2177_v2  ;;  %v1964_v40 = vadd.f32 %v1926_v29, %v1376_v37  ;;  %2385 = vrot.lane.b32.xlu1 %v5707_v39, %s4495_s19  ;;  %2532 = vrot.lane.b32.xlu0 %v2464_v44, %s4494_s18  ;;  %v4226_v7 = vpop.f32.mrb[89].mxu0  ;;  %v5716_v8 = vld [vmem:[#allocation2 + $0x84] sm:$0xff] }
 0x25c   : > { %v5718_v62 = vld [vmem:[#allocation2 + $0x82] sm:$0xff] }
 0x25d   : > { %v1994_v49 = vadd.f32 %v5478_v47, %v1964_v40  ;;  %v2505_v50 = vpop.permute.xlu0 %2504  ;;  %v2246_v4 = vld [vmem:[#allocation2 + $0x89] sm:$0xff] }
 0x25e   : > { %v1380_v51 = vpop.f32.mrb[36].mxu1  ;;  %v2630_v58 = vsel %vm562_vm0, %v5522_v60, %v2505_v50  ;;  %v5728_v36 = vpop.permute.xlu1 %2289 }
 0x25f   : > { %v2017_v5 = vmax.f32 %v1994_v49, 0.0  ;;  %v1381_v14 = vadd.f32 %v1380_v51, %v5443_v13  ;;  %v4154_v16 = vpop.f32.mrb[37].mxu1  ;;  %2604 = vrot.lane.b32.xlu1 %v5716_v8, %s4495_s19  ;;  %2387 = vrot.lane.b32.xlu0 %v5718_v62, %s4495_s19 }
 0x261   : > { %v2178_v12 = vmul.f32 %v5483_v53, %v2017_v5  ;;  %v2577_v22 = vpop.permute.xlu0 %2576 }
 0x262   : > { %v2648_v31 = vsel %vm586_vm2, %v2630_v58, %v2577_v22  ;;  %v1931_v3 = vpop.f32.mrb[90].mxu0  ;;  %v2465_v13 = vld [vmem:[#allocation2 + $0x8b] sm:$0xff] }
 0x263   : > { %2203 = vst.msk [vmem:[#allocation2 + $0x99] sm:$0xff] %vm562_vm0, %v2178_v12  ;;  %v1965_v17 = vadd.f32 %v1931_v3, %v1381_v14  ;;  %4242 = vmatprep.mubr.msk.f32.mxu1 %vm895_vm3, %v2648_v31  ;;  %2317 = vrot.lane.b32.xlu1 %v2246_v4, %s4494_s18  ;;  %v4229_v0 = vpop.f32.mrb[91].mxu0  ;;  %v5738_v52 = vld [vmem:[#allocation2 + $0x8c] sm:$0xff] }
 0x264   : > { %2534 = vrot.lane.b32.xlu0 %v2465_v13, %s4494_s18  ;;  %v5747_v49 = vld [vmem:[#allocation2 + $0x8a] sm:$0xff] }
 0x265   : > { %v1995_v53 = vadd.f32 %v5478_v47, %v1965_v17  ;;  %v5736_v60 = vpop.permute.xlu0 %2359  ;;  %v2507_v38 = vpop.permute.xlu1 %2506  ;;  %v3321_v3 = vld [vmem:[%s6182_s4 + $0x30] sm:$0xff] }
 0x266   : > { %v1385_v43 = vpop.f32.mrb[38].mxu1  ;;  %v2631_v2 = vsel %vm562_vm0, %v5533_v35, %v2507_v38 }
 0x267   : > { %v2018_v32 = vmax.f32 %v1995_v53, 0.0  ;;  %v1386_v33 = vadd.f32 %v1385_v43, %v5449_v20  ;;  %2606 = vrot.lane.b32.xlu1 %v5738_v52, %s4495_s19  ;;  %v4157_v37 = vpop.f32.mrb[39].mxu1  ;;  %v2447_v20 = vld [vmem:[%s6182_s4 + $0x10] sm:$0xff] }
 0x268   : > { %v2215_v37 = vld [vmem:[#allocation2 + $0x20] sm:$0xff] }
 0x269   : > { %v2179_v34 = vmul.f32 %v5487_v63, %v2018_v32  ;;  %v2579_v29 = vpop.permute.xlu1 %2578  ;;  %v2292_v44 = vpop.permute.xlu0 %2291 }
 0x26a   : > { %v2649_v40 = vsel %vm586_vm2, %v2631_v2, %v2579_v29  ;;  %v1936_v7 = vpop.f32.mrb[92].mxu0  ;;  %v2466_v50 = vld [vmem:[#allocation2 + $0x93] sm:$0xff] }
 0x26b   : > { %2204 = vst.msk [vmem:[#allocation2 + $0xa1] sm:$0xff] %vm562_vm0, %v2179_v34  ;;  %v1966_v51 = vadd.f32 %v1936_v7, %v1386_v33  ;;  %4243 = vmatmul.mubr.msk.f32.vlgmr.msra.gmra.mrb[42].mxu1 %vm895_vm3, %v2649_v40  ;;  %2389 = vrot.lane.b32.xlu1 %v5747_v49, %s4495_s19  ;;  %v4232_v63 = vpop.f32.mrb[93].mxu0  ;;  %v5762_v22 = vld [vmem:[#allocation2 + $0x94] sm:$0xff]  ;;  %v3105_v33 = vld [vmem:[#allocation2 + $0x25] sm:$0xff] }
 0x26c   : > { %2536 = vrot.lane.b32.xlu0 %v2466_v50, %s4494_s18  ;;  %4351 = vmatpush3.bf16.msra.mxu1 %v5673_v55  ;;  %v3322_v55 = vld [vmem:[%s6182_s4 + $0x38] sm:$0xff] }
 0x26d   : > { %v1996_v35 = vadd.f32 %v5478_v47, %v1966_v51  ;;  %v5759_v5 = vpop.permute.xlu1 %2361  ;;  %v2509_v14 = vpop.permute.xlu0 %2508  ;;  %4273 = vmatprep.subr.mxu1 %v2447_v20  ;;  %v5772_v4 = vpack.c.bf16 %v3322_v55, %v3321_v3  ;;  %v3124_v3 = vld [vmem:[#allocation2 + $0x2e] sm:$0xff]  ;;  %v3125_v55 = vld [vmem:[#allocation2 + $0x36] sm:$0xff] }
 0x26e   : > { %v1390_v16 = vpop.f32.mrb[40].mxu1 }
 0x26f   : > { %v2019_v12 = vmax.f32 %v1996_v35, 0.0  ;;  %v1391_v58 = vadd.f32 %v1390_v16, %v5455_v30  ;;  %v4160_v31 = vpop.f32.mrb[41].mxu1  ;;  %v2632_v30 = vsel %vm562_vm0, %v5544_v27, %v2509_v14  ;;  %v2413_v27 = vsel %vm562_vm0, %v2215_v37, %v2292_v44  ;;  %v3106_v14 = vld [vmem:[#allocation2 + $0x2d] sm:$0xff]  ;;  %v3107_v16 = vld [vmem:[#allocation2 + $0x35] sm:$0xff] }
 0x270   : > { %2608 = vrot.lane.b32.xlu0 %v5762_v22, %s4495_s19  ;;  %4274 = vmatpush3.msra.mxu1 %v2447_v20  ;;  %v3123_v20 = vld [vmem:[#allocation2 + $0x26] sm:$0xff] }
 0x271   : > { %v2180_v13 = vmul.f32 %v5685_v11, %v2019_v12  ;;  %v2581_v17 = vpop.permute.xlu0 %2580  ;;  %v2294_v0 = vpop.permute.xlu1 %2293  ;;  %4353 = vmatprep.subr.bf16.mxu1 %v5772_v4  ;;  %v2216_v12 = vld [vmem:[#allocation2 + $0x28] sm:$0xff] }
 0x272   : > { %v2650_v53 = vsel %vm586_vm2, %v2632_v30, %v2581_v17  ;;  %v1941_v38 = vpop.f32.mrb[94].mxu0  ;;  %v2467_v43 = vld [vmem:[#allocation2 + $0x9b] sm:$0xff] }
 0x273   : > { %2205 = vst.msk [vmem:[#allocation2 + $0xa9] sm:$0xff] %vm562_vm0, %v2180_v13  ;;  %v1967_v32 = vadd.f32 %v1941_v38, %v1391_v58  ;;  %4245 = vmatprep.mubr.msk.f32.mxu1 %vm895_vm3, %v2650_v53  ;;  %2538 = vrot.lane.b32.xlu1 %v2467_v43, %s4494_s18  ;;  %v4235_v11 = vpop.f32.mrb[95].mxu0  ;;  %v5788_v7 = vld [vmem:[#allocation2 + $0x9c] sm:$0xff]  ;;  %v2414_v58 = vsel %vm562_vm0, %v2216_v12, %v2294_v0  ;;  %v3109_v0 = vld [vmem:[#allocation2 + $0x45] sm:$0xff]  ;;  %v2217_v43 = vld [vmem:[#allocation2 + $0x30] sm:$0xff] }
 0x274   : > { %3159 = vrot.lane.b32.xlu0 %v3105_v33, %s4494_s18  ;;  %v3108_v38 = vld [vmem:[#allocation2 + $0x3d] sm:$0xff] }
 0x275   : > { %v1997_v34 = vadd.f32 %v5478_v47, %v1967_v32  ;;  %v2364_v2 = vpop.permute.xlu0 %2363  ;;  %v2511_v29 = vpop.permute.xlu1 %2510 }
 0x276   : > { %v5786_v40 = vsel %vm586_vm2, %v2413_v27, %v2364_v2  ;;  %v2633_v47 = vsel %vm562_vm0, %v5555_v59, %v2511_v29  ;;  %v3127_v27 = vld [vmem:[#allocation2 + $0x46] sm:$0xff] }
 0x277   : > { %v2020_v50 = vmax.f32 %v1997_v34, 0.0  ;;  %2610 = vrot.lane.b32.xlu1 %v5788_v7, %s4495_s19 }
 0x278   : > { %3231 = vrot.lane.b32.xlu0 %v3123_v20, %s4495_s19  ;;  %v3110_v20 = vld [vmem:[#allocation2 + $0x4d] sm:$0xff] }
 0x279   : > { %v2181_v51 = vmul.f32 %v5658_v15, %v2020_v50  ;;  %v2583_v44 = vpop.permute.xlu1 %2582  ;;  %v2296_v63 = vpop.permute.xlu0 %2295 }
 0x27a   : > { %v2651_v35 = vsel %vm586_vm2, %v2633_v47, %v2583_v44  ;;  %v2415_v32 = vsel %vm562_vm0, %v2217_v43, %v2296_v63  ;;  %v2218_v47 = vld [vmem:[#allocation2 + $0x38] sm:$0xff] }
 0x27b   : > { %2207 = vst.msk [vmem:[#allocation2 + $0xb1] sm:$0xf] %vm2206_vm5, %v2181_v51  ;;  %4246 = vmatmul.mubr.msk.f32.gmra.mrb[44].mxu1 %vm895_vm3, %v2651_v35  ;;  %3161 = vrot.lane.b32.xlu1 %v3106_v14, %s4494_s18  ;;  %v3111_v51 = vld [vmem:[#allocation2 + $0x55] sm:$0xff] }
 0x27c   : > { %3163 = vrot.lane.b32.xlu0 %v3107_v16, %s4494_s18  ;;  %v3129_v16 = vld [vmem:[#allocation2 + $0x56] sm:$0xff] }
 0x27d   : > { %v2366_v15 = vpop.permute.xlu1 %2365  ;;  %v2513_v31 = vpop.permute.xlu0 %2512 }
 0x27e   : > { %v5802_v59 = vsel %vm586_vm2, %v2414_v58, %v2366_v15  ;;  %v2634_v13 = vsel %vm562_vm0, %v5566_v61, %v2513_v31  ;;  %v3126_v61 = vld [vmem:[#allocation2 + $0x3e] sm:$0xff] }
 0x27f   : > { %3233 = vrot.lane.b32.xlu1 %v3124_v3, %s4495_s19  ;;  %v3112_v3 = vld [vmem:[#allocation2 + $0x5d] sm:$0xff] }
 0x280   : > { %3235 = vrot.lane.b32.xlu0 %v3125_v55, %s4495_s19  ;;  %v3113_v55 = vld [vmem:[#allocation2 + $0x65] sm:$0xff] }
 0x281   : > { %v2585_v30 = vpop.permute.xlu0 %2584  ;;  %v2298_v17 = vpop.permute.xlu1 %2297 }
 0x282   : > { %v2652_v53 = vsel %vm586_vm2, %v2634_v13, %v2585_v30  ;;  %v2416_v44 = vsel %vm562_vm0, %v2218_v47, %v2298_v17  ;;  %v2219_v13 = vld [vmem:[#allocation2 + $0x40] sm:$0xff] }
 0x283   : > { %4248 = vmatprep.mubr.msk.f32.mxu1 %vm895_vm3, %v2652_v53  ;;  %3165 = vrot.lane.b32.xlu1 %v3108_v38, %s4494_s18 }
 0x284   : > { %3167 = vrot.lane.b32.xlu0 %v3109_v0, %s4494_s18  ;;  %v3131_v0 = vld [vmem:[#allocation2 + $0x66] sm:$0xff] }
 0x285   : > { %v2368_v33 = vpop.permute.xlu0 %2367  ;;  %v2515_v11 = vpop.permute.xlu1 %2514 }
 0x286   : > { %v5814_v37 = vsel %vm586_vm2, %v2415_v32, %v2368_v33  ;;  %v2635_v34 = vsel %vm562_vm0, %v5577_v54, %v2515_v11  ;;  %v3128_v54 = vld [vmem:[#allocation2 + $0x4e] sm:$0xff] }
 0x287   : > { %3237 = vrot.lane.b32.xlu1 %v3126_v61, %s4495_s19  ;;  %v3114_v61 = vld [vmem:[#allocation2 + $0x6d] sm:$0xff] }
 0x288   : > { %3239 = vrot.lane.b32.xlu0 %v3127_v27, %s4495_s19  ;;  %v3115_v27 = vld [vmem:[#allocation2 + $0x75] sm:$0xff] }
 0x289   : > { %v2587_v2 = vpop.permute.xlu1 %2586  ;;  %v2300_v29 = vpop.permute.xlu0 %2299 }
 0x28a   : > { %v2653_v50 = vsel %vm586_vm2, %v2635_v34, %v2587_v2  ;;  %v2417_v30 = vsel %vm562_vm0, %v2219_v13, %v2300_v29  ;;  %v2220_v34 = vld [vmem:[#allocation2 + $0x48] sm:$0xff] }
 0x28b   : > { %4249 = vmatmul.mubr.msk.f32.gmra.mrb[46].mxu1 %vm895_vm3, %v2653_v50  ;;  %3169 = vrot.lane.b32.xlu1 %v3110_v20, %s4494_s18 }
 0x28c   : > { %3171 = vrot.lane.b32.xlu0 %v3111_v51, %s4494_s18  ;;  %v3133_v51 = vld [vmem:[#allocation2 + $0x76] sm:$0xff] }
 0x28d   : > { %v2370_v63 = vpop.permute.xlu1 %2369  ;;  %v2517_v35 = vpop.permute.xlu0 %2516 }
 0x28e   : > { %v5826_v14 = vsel %vm586_vm2, %v2416_v44, %v2370_v63  ;;  %v2636_v12 = vsel %vm562_vm0, %v5588_v6, %v2517_v35  ;;  %v3130_v6 = vld [vmem:[#allocation2 + $0x5e] sm:$0xff] }
 0x28f   : > { %3241 = vrot.lane.b32.xlu1 %v3128_v54, %s4495_s19  ;;  %v3116_v54 = vld [vmem:[#allocation2 + $0x7d] sm:$0xff] }
 0x290   : > { %3243 = vrot.lane.b32.xlu0 %v3129_v16, %s4495_s19  ;;  %v3117_v16 = vld [vmem:[#allocation2 + $0x85] sm:$0xff] }
 0x291   : > { %v2589_v58 = vpop.permute.xlu0 %2588  ;;  %v2302_v15 = vpop.permute.xlu1 %2301 }
 0x292   : > { %v2654_v31 = vsel %vm586_vm2, %v2636_v12, %v2589_v58  ;;  %v2418_v2 = vsel %vm562_vm0, %v2220_v34, %v2302_v15  ;;  %v2221_v12 = vld [vmem:[#allocation2 + $0x50] sm:$0xff] }
 0x293   : > { %4251 = vmatprep.mubr.msk.f32.mxu1 %vm895_vm3, %v2654_v31  ;;  %3173 = vrot.lane.b32.xlu1 %v3112_v3, %s4494_s18 }
 0x294   : > { %3175 = vrot.lane.b32.xlu0 %v3113_v55, %s4494_s18  ;;  %v3135_v55 = vld [vmem:[#allocation2 + $0x86] sm:$0xff] }
 0x295   : > { %v2372_v17 = vpop.permute.xlu0 %2371  ;;  %v2519_v53 = vpop.permute.xlu1 %2518 }
 0x296   : > { %v5838_v38 = vsel %vm586_vm2, %v2417_v30, %v2372_v17  ;;  %v2637_v43 = vsel %vm562_vm0, %v5602_v25, %v2519_v53  ;;  %v3132_v25 = vld [vmem:[#allocation2 + $0x6e] sm:$0xff] }
 0x297   : > { %3245 = vrot.lane.b32.xlu1 %v3130_v6, %s4495_s19  ;;  %v3118_v6 = vld [vmem:[#allocation2 + $0x8d] sm:$0xff] }
 0x298   : > { %3247 = vrot.lane.b32.xlu0 %v3131_v0, %s4495_s19  ;;  %v3119_v0 = vld [vmem:[#allocation2 + $0x95] sm:$0xff] }
 0x299   : > { %v2591_v32 = vpop.permute.xlu1 %2590  ;;  %v2304_v33 = vpop.permute.xlu0 %2303 }
 0x29a   : > { %v2655_v11 = vsel %vm586_vm2, %v2637_v43, %v2591_v32  ;;  %v2419_v58 = vsel %vm562_vm0, %v2221_v12, %v2304_v33  ;;  %v2222_v43 = vld [vmem:[#allocation2 + $0x58] sm:$0xff] }
 0x29b   : > { %4252 = vmatmul.mubr.msk.f32.gmra.mrb[48].mxu1 %vm895_vm3, %v2655_v11  ;;  %3177 = vrot.lane.b32.xlu1 %v3114_v61, %s4494_s18 }
 0x29c   : > { %3179 = vrot.lane.b32.xlu0 %v3115_v27, %s4494_s18  ;;  %v3137_v27 = vld [vmem:[#allocation2 + $0x96] sm:$0xff] }
 0x29d   : > { %v2374_v29 = vpop.permute.xlu1 %2373  ;;  %v2521_v50 = vpop.permute.xlu0 %2520 }
 0x29e   : > { %v5850_v20 = vsel %vm586_vm2, %v2418_v2, %v2374_v29  ;;  %v2638_v47 = vsel %vm562_vm0, %v5616_v48, %v2521_v50  ;;  %v3134_v48 = vld [vmem:[#allocation2 + $0x7e] sm:$0xff] }
 0x29f   : > { %3249 = vrot.lane.b32.xlu1 %v3132_v25, %s4495_s19  ;;  %v3120_v25 = vld [vmem:[#allocation2 + $0x9d] sm:$0xff] }
 0x2a0   : > { %3251 = vrot.lane.b32.xlu0 %v3133_v51, %s4495_s19  ;;  %v3121_v51 = vld [vmem:[#allocation2 + $0xa5] sm:$0xff] }
 0x2a1   : > { %v2593_v44 = vpop.permute.xlu0 %2592  ;;  %v2306_v63 = vpop.permute.xlu1 %2305 }
 0x2a2   : > { %v2656_v35 = vsel %vm586_vm2, %v2638_v47, %v2593_v44  ;;  %v2420_v32 = vsel %vm562_vm0, %v2222_v43, %v2306_v63  ;;  %v2223_v47 = vld [vmem:[#allocation2 + $0x60] sm:$0xff] }
 0x2a3   : > { %4254 = vmatprep.mubr.msk.f32.mxu1 %vm895_vm3, %v2656_v35  ;;  %3181 = vrot.lane.b32.xlu1 %v3116_v54, %s4494_s18 }
 0x2a4   : > { %3183 = vrot.lane.b32.xlu0 %v3117_v16, %s4494_s18  ;;  %v3139_v16 = vld [vmem:[#allocation2 + $0xa6] sm:$0xff] }
 0x2a5   : > { %v2376_v15 = vpop.permute.xlu0 %2375  ;;  %v2523_v31 = vpop.permute.xlu1 %2522 }
 0x2a6   : > { %v5862_v3 = vsel %vm586_vm2, %v2419_v58, %v2376_v15  ;;  %v2639_v13 = vsel %vm562_vm0, %v5630_v1, %v2523_v31  ;;  %v3136_v1 = vld [vmem:[#allocation2 + $0x8e] sm:$0xff] }
 0x2a7   : > { %3253 = vrot.lane.b32.xlu1 %v3134_v48, %s4495_s19  ;;  %v3122_v48 = vld [vmem:[#allocation2 + $0xad] sm:$0xff] }
 0x2a8   : > { %3255 = vrot.lane.b32.xlu0 %v3135_v55, %s4495_s19  ;;  %v2224_v55 = vld [vmem:[#allocation2 + $0x68] sm:$0xff] }
 0x2a9   : > { %v2595_v30 = vpop.permute.xlu1 %2594  ;;  %v2308_v17 = vpop.permute.xlu0 %2307 }
 0x2aa   : > { %v2657_v53 = vsel %vm586_vm2, %v2639_v13, %v2595_v30  ;;  %v2421_v44 = vsel %vm562_vm0, %v2223_v47, %v2308_v17 }
 0x2ab   : > { %4255 = vmatmul.mubr.msk.f32.gmra.mrb[50].mxu1 %vm895_vm3, %v2657_v53  ;;  %3185 = vrot.lane.b32.xlu1 %v3118_v6, %s4494_s18  ;;  %v3140_v6 = vld [vmem:[#allocation2 + $0xae] sm:$0xff] }
 0x2ac   : > { %3187 = vrot.lane.b32.xlu0 %v3119_v0, %s4494_s18 }
 0x2ad   : > { %v2378_v33 = vpop.permute.xlu1 %2377  ;;  %v2525_v11 = vpop.permute.xlu0 %2524 }
 0x2ae   : > { %v5874_v61 = vsel %vm586_vm2, %v2420_v32, %v2378_v33  ;;  %v2640_v34 = vsel %vm562_vm0, %v5644_v21, %v2525_v11  ;;  %v3138_v21 = vld [vmem:[#allocation2 + $0x9e] sm:$0xff] }
 0x2af   : > { %3257 = vrot.lane.b32.xlu1 %v3136_v1, %s4495_s19 }
 0x2b0   : > { %3259 = vrot.lane.b32.xlu0 %v3137_v27, %s4495_s19 }
 0x2b1   : > { %v2597_v2 = vpop.permute.xlu0 %2596  ;;  %v2310_v29 = vpop.permute.xlu1 %2309 }
 0x2b2   : > { %v2658_v50 = vsel %vm586_vm2, %v2640_v34, %v2597_v2  ;;  %v2422_v13 = vsel %vm562_vm0, %v2224_v55, %v2310_v29 }
 0x2b3   : > { %4257 = vmatprep.mubr.msk.f32.mxu1 %vm895_vm3, %v2658_v50  ;;  %3189 = vrot.lane.b32.xlu1 %v3120_v25, %s4494_s18 }
 0x2b4   : > { %3191 = vrot.lane.b32.xlu0 %v3121_v51, %s4494_s18 }
 0x2b5   : > { %v2380_v63 = vpop.permute.xlu0 %2379  ;;  %v2527_v35 = vpop.permute.xlu1 %2526 }
 0x2b6   : > { %v5886_v54 = vsel %vm586_vm2, %v2421_v44, %v2380_v63  ;;  %v2641_v12 = vsel %vm562_vm0, %v5660_v26, %v2527_v35 }
 0x2b7   : > { %3261 = vrot.lane.b32.xlu1 %v3138_v21, %s4495_s19 }
 0x2b8   : > { %3263 = vrot.lane.b32.xlu0 %v3139_v16, %s4495_s19 }
 0x2b9   : > { %v2599_v58 = vpop.permute.xlu1 %2598  ;;  %v5892_v15 = vpop.permute.xlu0 %2311 }
 0x2ba   : > { %v2659_v31 = vsel %vm586_vm2, %v2641_v12, %v2599_v58  ;;  %v2448_v12 = vld [vmem:[#allocation2 + $0x92] sm:$0xff] }
 0x2bb   : > { %4258 = vmatmul.mubr.msk.f32.gmra.mrb[52].mxu1 %vm895_vm3, %v2659_v31  ;;  %3193 = vrot.lane.b32.xlu1 %v3122_v48, %s4494_s18 }
 0x2bd   : > { %v2382_v30 = vpop.permute.xlu1 %2381  ;;  %v2529_v17 = vpop.permute.xlu0 %2528 }
 0x2be   : > { %v5899_v53 = vsel %vm586_vm2, %v2422_v13, %v2382_v30  ;;  %v2642_v26 = vsel %vm562_vm0, %v5687_v10, %v2529_v17  ;;  %v2211_v30 = vld [vmem:[#allocation2] sm:$0xff] }
 0x2bf   : > { %3265 = vrot.lane.b32.xlu1 %v3140_v6, %s4495_s19 }
 0x2c1   : > { %v2601_v0 = vpop.permute.xlu0 %2600  ;;  %v5904_v43 = vpop.permute.xlu1 %2313 }
 0x2c2   : > { %v2660_v32 = vsel %vm586_vm2, %v2642_v26, %v2601_v0  ;;  %v2409_v26 = vsel %vm562_vm0, %v2211_v30, %v5675_v57  ;;  %v3088_v30 = vld [vmem:[#allocation2 + $0x2c] sm:$0xff] }
 0x2c3   : > { %4260 = vmatprep.mubr.msk.f32.mxu1 %vm895_vm3, %v2660_v32 }
 0x2c5   : > { %v5908_v33 = vpop.permute.xlu0 %2383  ;;  %v2531_v11 = vpop.permute.xlu1 %2530 }
 0x2c6   : > { %v2643_v1 = vsel %vm562_vm0, %v5707_v39, %v2531_v11  ;;  %v2427_v11 = vsel %vm586_vm2, %v2409_v26, %v5690_v19  ;;  %v3323_v19 = vld [vmem:[%s6182_s4 + $0x40] sm:$0xff] }
 0x2c9   : > { %v2603_v27 = vpop.permute.xlu1 %2602  ;;  %v5912_v34 = vpop.permute.xlu0 %2315 }
 0x2ca   : > { %v2661_v2 = vsel %vm586_vm2, %v2643_v1, %v2603_v27  ;;  %v2212_v1 = vld [vmem:[#allocation2 + $0x8] sm:$0xff] }
 0x2cb   : > { %4261 = vmatmul.mubr.msk.f32.gmra.mrb[54].mxu1 %vm895_vm3, %v2661_v2  ;;  %v2410_v27 = vsel %vm562_vm0, %v2212_v1, %v5698_v18  ;;  %v2213_v2 = vld [vmem:[#allocation2 + $0x10] sm:$0xff]  ;;  %v2214_v18 = vld [vmem:[#allocation2 + $0x18] sm:$0xff] }
 0x2cc   : > { %v2428_v57 = vsel %vm586_vm2, %v2410_v27, %v5713_v23  ;;  %v2412_v23 = vsel %vm562_vm0, %v2214_v18, %v5728_v36  ;;  %v4450_v27 = vld [vmem:[#allocation2 + $0x44] sm:$0xff] }
 0x2cd   : > { %v5916_v10 = vpop.permute.xlu1 %2385  ;;  %v2533_v29 = vpop.permute.xlu0 %2532 }
 0x2ce   : > { %v2644_v50 = vsel %vm562_vm0, %v5718_v62, %v2533_v29 }
 0x2d1   : > { %v2605_v25 = vpop.permute.xlu1 %2604  ;;  %v5920_v51 = vpop.permute.xlu0 %2387 }
 0x2d2   : > { %v2662_v47 = vsel %vm586_vm2, %v2644_v50, %v2605_v25  ;;  %v2411_v50 = vsel %vm562_vm0, %v2213_v2, %v5705_v42 }
 0x2d3   : > { %4263 = vmatprep.mubr.msk.f32.mxu1 %vm895_vm3, %v2662_v47  ;;  %v2429_v47 = vsel %vm586_vm2, %v2411_v50, %v5736_v60 }
 0x2d5   : > { %v5924_v39 = vpop.permute.xlu1 %2317 }
 0x2d6   : > { %v2535_v44 = vpop.permute.xlu0 %2534 }
 0x2d7   : > { %v2645_v63 = vsel %vm562_vm0, %v5747_v49, %v2535_v44  ;;  %v2449_v49 = vld [vmem:[#allocation2 + $0x9a] sm:$0xff]  ;;  %v2430_v44 = vsel %vm586_vm2, %v2412_v23, %v5759_v5 }
 0x2d9   : > { %v2607_v35 = vpop.permute.xlu1 %2606 }
 0x2da   : > { %v2663_v21 = vsel %vm586_vm2, %v2645_v63, %v2607_v35 }
 0x2db   : > { %4264 = vmatmul.mubr.msk.f32.gmra.mrb[56].mxu1 %vm895_vm3, %v2663_v21 }
 0x2dd   : > { %v5930_v62 = vpop.permute.xlu1 %2389 }
 0x2de   : > { %v2537_v16 = vpop.permute.xlu0 %2536 }
 0x2df   : > { %v2646_v58 = vsel %vm562_vm0, %v2448_v12, %v2537_v16  ;;  %v2227_v12 = vld [vmem:[#allocation2 + $0x80] sm:$0xff] }
 0x2e2   : > { %v2609_v31 = vpop.permute.xlu0 %2608 }
 0x2e3   : > { %v2664_v48 = vsel %vm586_vm2, %v2646_v58, %v2609_v31  ;;  %v2425_v58 = vsel %vm562_vm0, %v2227_v12, %v5912_v34  ;;  %v3103_v12 = vld [vmem:[#allocation2 + $0xa4] sm:$0xff] }
 0x2e4   : > { %4266 = vmatprep.mubr.msk.f32.mxu1 %vm895_vm3, %v2664_v48  ;;  %v3087_v48 = vld [vmem:[#allocation2 + $0x24] sm:$0xff] }
 0x2e5   : > { %v2539_v55 = vpop.permute.xlu1 %2538 }
 0x2e6   : > { %v5935_v13 = vpop.permute.xlu0 %3159  ;;  %v2647_v17 = vsel %vm562_vm0, %v2449_v49, %v2539_v55 }
 0x2e9   : > { %v2611_v6 = vpop.permute.xlu1 %2610 }
 0x2ea   : > { %v5940_v0 = vpop.permute.xlu0 %3231  ;;  %v2665_v32 = vsel %vm586_vm2, %v2647_v17, %v2611_v6  ;;  %v4448_v6 = vld [vmem:[#allocation2 + $0x34] sm:$0xff] }
 0x2eb   : > { %4267 = vmatmul.mubr.msk.f32.gmra.mrb[58].mxu1 %vm895_vm3, %v2665_v32 }
 0x2ec   : > { %4275 = vmatprep.mubr.msk.f32.mxu1 %vm895_vm3, %v2427_v11 }
 0x2ed   : > { %v5949_v29 = vpop.permute.xlu1 %3161 }
 0x2ee   : > { %v5955_v25 = vpop.permute.xlu0 %3163 }
 0x2ef   : > { %4276 = vmatmul.mubr.msk.f32.vlgmr.msra.gmra.mrb[42].mxu1 %vm895_vm3, %v2428_v57 }
 0x2f0   : > { %4355 = vmatpush3.bf16.msra.mxu1 %v5772_v4  ;;  %4278 = vmatprep.mubr.msk.f32.mxu1 %vm895_vm3, %v2429_v47 }
 0x2f1   : > { %v3234_v42 = vpop.permute.xlu1 %3233  ;;  %4306 = vmatprep.subr.mxu1 %v3323_v19 }
 0x2f2   : > { %v3236_v63 = vpop.permute.xlu0 %3235 }
 0x2f3   : > { %4279 = vmatmul.mubr.msk.f32.gmra.mrb[44].mxu1 %vm895_vm3, %v2430_v44 }
 0x2f4   : > { %4281 = vmatprep.mubr.msk.f32.mxu1 %vm895_vm3, %v5786_v40  ;;  %4307 = vmatpush3.msra.mxu1 %v3323_v19 }
 0x2f5   : > { %v3166_v60 = vpop.permute.xlu1 %3165 }
 0x2f6   : > { %v3168_v35 = vpop.permute.xlu0 %3167 }
 0x2f7   : > { %4282 = vmatmul.mubr.msk.f32.gmra.mrb[46].mxu1 %vm895_vm3, %v5802_v59  ;;  %v3289_v2 = vsel %vm562_vm0, %v4450_v27, %v3168_v35 }
 0x2f8   : > { %4284 = vmatprep.mubr.msk.f32.mxu1 %vm895_vm3, %v5814_v37  ;;  %v2225_v37 = vld [vmem:[#allocation2 + $0x70] sm:$0xff] }
 0x2f9   : > { %v3238_v36 = vpop.permute.xlu1 %3237 }
 0x2fa   : > { %v3240_v4 = vpop.permute.xlu0 %3239 }
 0x2fb   : > { %4285 = vmatmul.mubr.msk.f32.gmra.mrb[48].mxu1 %vm895_vm3, %v5826_v14  ;;  %v3307_v50 = vsel %vm586_vm2, %v3289_v2, %v3240_v4 }
 0x2fc   : > { %4287 = vmatprep.mubr.msk.f32.mxu1 %vm895_vm3, %v5838_v38  ;;  %v2423_v38 = vsel %vm562_vm0, %v2225_v37, %v5892_v15 }
 0x2fd   : > { %v3170_v5 = vpop.permute.xlu1 %3169 }
 0x2fe   : > { %v3172_v21 = vpop.permute.xlu0 %3171 }
 0x2ff   : > { %4288 = vmatmul.mubr.msk.f32.gmra.mrb[50].mxu1 %vm895_vm3, %v5850_v20  ;;  %v2441_v20 = vsel %vm586_vm2, %v2423_v38, %v5908_v33  ;;  %v2443_v33 = vsel %vm586_vm2, %v2425_v58, %v5920_v51  ;;  %v3291_v47 = vsel %vm562_vm0, %v5609_v28, %v3172_v21 }
 0x300   : > { %4290 = vmatprep.mubr.msk.f32.mxu1 %vm895_vm3, %v5862_v3  ;;  %v2226_v3 = vld [vmem:[#allocation2 + $0x78] sm:$0xff] }
 0x301   : > { %v3242_v40 = vpop.permute.xlu1 %3241 }
 0x302   : > { %v3244_v59 = vpop.permute.xlu0 %3243 }
 0x303   : > { %4291 = vmatmul.mubr.msk.f32.gmra.mrb[52].mxu1 %vm895_vm3, %v5874_v61  ;;  %v2424_v61 = vsel %vm562_vm0, %v2226_v3, %v5904_v43 }
 0x304   : > { %4293 = vmatprep.mubr.msk.f32.mxu1 %vm895_vm3, %v5886_v54  ;;  %v2442_v15 = vsel %vm586_vm2, %v2424_v61, %v5916_v10  ;;  %v3285_v10 = vsel %vm562_vm0, %v3087_v48, %v5935_v13  ;;  %v3577_v48 = vld [vmem:[%s4596_s17 + $0x2d] sm:$0xff] }
 0x305   : > { %v3174_v14 = vpop.permute.xlu1 %3173  ;;  %v3303_v51 = vsel %vm586_vm2, %v3285_v10, %v5940_v0  ;;  %v4449_v0 = vld [vmem:[#allocation2 + $0x3c] sm:$0xff]  ;;  %v3576_v10 = vld [vmem:[%s4596_s17 + $0x25] sm:$0xff] }
 0x306   : > { %v3176_v16 = vpop.permute.xlu0 %3175  ;;  %v3288_v11 = vsel %vm562_vm0, %v4449_v0, %v3166_v60  ;;  %v3292_v44 = vsel %vm562_vm0, %v5623_v56, %v3174_v14 }
 0x307   : > { %4294 = vmatmul.mubr.msk.f32.gmra.mrb[54].mxu1 %vm895_vm3, %v5899_v53  ;;  %v2228_v53 = vld [vmem:[#allocation2 + $0x88] sm:$0xff] }
 0x308   : > { %4296 = vmatprep.mubr.msk.f32.mxu1 %vm895_vm3, %v2441_v20  ;;  %v2426_v43 = vsel %vm562_vm0, %v2228_v53, %v5924_v39  ;;  %v3286_v39 = vsel %vm562_vm0, %v3088_v30, %v5949_v29  ;;  %v3306_v29 = vsel %vm586_vm2, %v3288_v11, %v3238_v36  ;;  %v6084_v53 = vld [vmem:[%s6183_s5] ss:$0 sm:$0xff] }
 0x309   : > { %v3246_v54 = vpop.permute.xlu1 %3245  ;;  %v2444_v34 = vsel %vm586_vm2, %v2426_v43, %v5930_v62  ;;  %v3287_v62 = vsel %vm562_vm0, %v4448_v6, %v5955_v25  ;;  %v3304_v26 = vsel %vm586_vm2, %v3286_v39, %v3234_v42  ;;  %v3290_v25 = vsel %vm562_vm0, %v5595_v9, %v3170_v5 }
 0x30a   : > { %v3248_v31 = vpop.permute.xlu0 %3247  ;;  %v3305_v32 = vsel %vm586_vm2, %v3287_v62, %v3236_v63  ;;  %v3308_v18 = vsel %vm586_vm2, %v3290_v25, %v3242_v40  ;;  %v3309_v42 = vsel %vm586_vm2, %v3291_v47, %v3244_v59  ;;  %v3293_v9 = vsel %vm562_vm0, %v5637_v41, %v3176_v16  ;;  %v3583_v47 = vld [vmem:[%s4596_s17 + $0x5d] sm:$0xff] }
 0x30b   : > { %4297 = vmatmul.mubr.msk.f32.gmra.mrb[56].mxu1 %vm895_vm3, %v2442_v15  ;;  %v3310_v60 = vsel %vm586_vm2, %v3292_v44, %v3246_v54  ;;  %v3311_v28 = vsel %vm586_vm2, %v3293_v9, %v3248_v31  ;;  %v3104_v15 = vld [vmem:[#allocation2 + $0xac] sm:$0xff] }
 0x30c   : > { %4299 = vmatprep.mubr.msk.f32.mxu1 %vm895_vm3, %v2443_v33 }
 0x30d   : > { %v3178_v55 = vpop.permute.xlu1 %3177 }
 0x30e   : > { %v3180_v49 = vpop.permute.xlu0 %3179  ;;  %v3294_v36 = vsel %vm562_vm0, %v5651_v45, %v3178_v55 }
 0x30f   : > { %4300 = vmatmul.mubr.msk.f32.gmra.mrb[58].mxu1 %vm895_vm3, %v2444_v34  ;;  %v3295_v56 = vsel %vm562_vm0, %v5677_v46, %v3180_v49 }
 0x310   : > { %4308 = vmatprep.mubr.msk.f32.mxu1 %vm895_vm3, %v3303_v51 }
 0x311   : > { %v3250_v17 = vpop.permute.xlu1 %3249 }
 0x312   : > { %v3252_v13 = vpop.permute.xlu0 %3251  ;;  %v3312_v5 = vsel %vm586_vm2, %v3294_v36, %v3250_v17  ;;  %v3579_v17 = vld [vmem:[%s4596_s17 + $0x3d] sm:$0xff] }
 0x313   : > { %4309 = vmatmul.mubr.msk.f32.vlgmr.msra.gmra.mrb[42].mxu1 %vm895_vm3, %v3304_v26  ;;  %v3313_v41 = vsel %vm586_vm2, %v3295_v56, %v3252_v13  ;;  %v3578_v26 = vld [vmem:[%s4596_s17 + $0x35] sm:$0xff] }
 0x314   : > { %4311 = vmatprep.mubr.msk.f32.mxu1 %vm895_vm3, %v3305_v32 }
 0x315   : > { %v3182_v1 = vpop.permute.xlu1 %3181 }
 0x316   : > { %v3184_v57 = vpop.permute.xlu0 %3183  ;;  %v3296_v40 = vsel %vm562_vm0, %v5696_v24, %v3182_v1  ;;  %v3581_v1 = vld [vmem:[%s4596_s17 + $0x4d] sm:$0xff] }
 0x317   : > { %4312 = vmatmul.mubr.msk.f32.gmra.mrb[44].mxu1 %vm895_vm3, %v3306_v29  ;;  %v3297_v45 = vsel %vm562_vm0, %v5716_v8, %v3184_v57  ;;  %v3580_v29 = vld [vmem:[%s4596_s17 + $0x45] sm:$0xff] }
 0x318   : > { %4314 = vmatprep.mubr.msk.f32.mxu1 %vm895_vm3, %v3307_v50 }
 0x319   : > { %v3254_v19 = vpop.permute.xlu1 %3253 }
 0x31a   : > { %v3256_v23 = vpop.permute.xlu0 %3255  ;;  %v3314_v37 = vsel %vm586_vm2, %v3296_v40, %v3254_v19  ;;  %v3587_v40 = vld [vmem:[%s4596_s17 + $0x7d] sm:$0xff] }
 0x31b   : > { %4315 = vmatmul.mubr.msk.f32.gmra.mrb[46].mxu1 %vm895_vm3, %v3308_v18  ;;  %v3315_v46 = vsel %vm586_vm2, %v3297_v45, %v3256_v23 }
 0x31c   : > { %4317 = vmatprep.mubr.msk.f32.mxu1 %vm895_vm3, %v3309_v42  ;;  %v3582_v42 = vld [vmem:[%s4596_s17 + $0x55] sm:$0xff] }
 0x31d   : > { %v3186_v63 = vpop.permute.xlu1 %3185 }
 0x31e   : > { %v3188_v35 = vpop.permute.xlu0 %3187  ;;  %v3298_v38 = vsel %vm562_vm0, %v5738_v52, %v3186_v63 }
 0x31f   : > { %4318 = vmatmul.mubr.msk.f32.gmra.mrb[48].mxu1 %vm895_vm3, %v3310_v60  ;;  %v3299_v24 = vsel %vm562_vm0, %v5762_v22, %v3188_v35  ;;  %v3585_v35 = vld [vmem:[%s4596_s17 + $0x6d] sm:$0xff] }
 0x320   : > { %4320 = vmatprep.mubr.msk.f32.mxu1 %vm895_vm3, %v3311_v28 }
 0x321   : > { %v3258_v4 = vpop.permute.xlu1 %3257 }
 0x322   : > { %v3260_v21 = vpop.permute.xlu0 %3259  ;;  %v3316_v20 = vsel %vm586_vm2, %v3298_v38, %v3258_v4  ;;  %v3584_v4 = vld [vmem:[%s4596_s17 + $0x65] sm:$0xff] }
 0x323   : > { %4321 = vmatmul.mubr.msk.f32.gmra.mrb[50].mxu1 %vm895_vm3, %v3312_v5  ;;  %v3317_v8 = vsel %vm586_vm2, %v3299_v24, %v3260_v21  ;;  %v3589_v24 = vld [vmem:[%s4596_s17 + $0x8d] sm:$0xff] }
 0x324   : > { %4323 = vmatprep.mubr.msk.f32.mxu1 %vm895_vm3, %v3313_v41 }
 0x325   : > { %v3190_v59 = vpop.permute.xlu1 %3189 }
 0x326   : > { %v3192_v14 = vpop.permute.xlu0 %3191  ;;  %v3300_v61 = vsel %vm562_vm0, %v5788_v7, %v3190_v59 }
 0x327   : > { %4324 = vmatmul.mubr.msk.f32.gmra.mrb[52].mxu1 %vm895_vm3, %v3314_v37  ;;  %v3301_v54 = vsel %vm562_vm0, %v3103_v12, %v3192_v14  ;;  %v3586_v37 = vld [vmem:[%s4596_s17 + $0x75] sm:$0xff] }
 0x328   : > { %4326 = vmatprep.mubr.msk.f32.mxu1 %vm895_vm3, %v3315_v46 }
 0x329   : > { %v3262_v16 = vpop.permute.xlu1 %3261 }
 0x32a   : > { %v3264_v3 = vpop.permute.xlu0 %3263  ;;  %v3318_v22 = vsel %vm586_vm2, %v3300_v61, %v3262_v16 }
 0x32b   : > { %4327 = vmatmul.mubr.msk.f32.gmra.mrb[54].mxu1 %vm895_vm3, %v3316_v20  ;;  %v3319_v58 = vsel %vm586_vm2, %v3301_v54, %v3264_v3  ;;  %v3588_v3 = vld [vmem:[%s4596_s17 + $0x85] sm:$0xff] }
 0x32c   : > { %4329 = vmatprep.mubr.msk.f32.mxu1 %vm895_vm3, %v3317_v8 }
 0x32d   : > { %v3194_v52 = vpop.permute.xlu1 %3193 }
 0x32e   : > { %v3302_v31 = vsel %vm562_vm0, %v3104_v15, %v3194_v52 }
 0x32f   : > { %4330 = vmatmul.mubr.msk.f32.gmra.mrb[56].mxu1 %vm895_vm3, %v3318_v22  ;;  %v3591_v22 = vld [vmem:[%s4596_s17 + $0x9d] sm:$0xff] }
 0x330   : > { %4332 = vmatprep.mubr.msk.f32.mxu1 %vm895_vm3, %v3319_v58 }
 0x331   : > { %v3266_v33 = vpop.permute.xlu1 %3265 }
 0x332   : > { %v3320_v7 = vsel %vm586_vm2, %v3302_v31, %v3266_v33  ;;  %v3590_v31 = vld [vmem:[%s4596_s17 + $0x95] sm:$0xff] }
 0x333   : > { %4333 = vmatmul.mubr.msk.f32.gmra.mrb[58].mxu1 %vm895_vm3, %v3320_v7 }
 0x3e6   : > { %v4310_v43 = vpop.f32.mrb[42].mxu1 }
 0x3e7   : > { %v3559_v55 = vadd.f32 %v4310_v43, %v6084_v53  ;;  %v3444_v34 = vpop.f32.mrb[43].mxu1 }
 0x3e8   : > { %v3558_v49 = vadd.f32 %v6084_v53, %v3444_v34 }
 0x3e9   : > { %v3595_v51 = vadd.f32 %v3577_v48, %v3559_v55  ;;  %v3593_v55 = vld [vmem:[%s4596_s17 + $0xad] sm:$0xff] }
 0x3ea   : > { %v3594_v30 = vadd.f32 %v3576_v10, %v3558_v49  ;;  %v4313_v39 = vpop.f32.mrb[44].mxu1  ;;  %v3592_v49 = vld [vmem:[%s4596_s17 + $0xa5] sm:$0xff] }
 0x3eb   : > { %3613 = vst.msk [vmem:[%s6092_s22 + $0x8] sm:$0xff] %vm562_vm0, %v3595_v51  ;;  %v3561_v6 = vadd.f32 %v4313_v39, %v6084_v53  ;;  %v3454_v62 = vpop.f32.mrb[45].mxu1 }
 0x3ec   : > { %3612 = vst.msk [vmem:[%s6092_s22] sm:$0xff] %vm562_vm0, %v3594_v30  ;;  %v3560_v13 = vadd.f32 %v6084_v53, %v3454_v62 }
 0x3ed   : > { %v3597_v32 = vadd.f32 %v3579_v17, %v3561_v6 }
 0x3ee   : > { %v3596_v0 = vadd.f32 %v3578_v26, %v3560_v13  ;;  %v4316_v11 = vpop.f32.mrb[46].mxu1 }
 0x3ef   : > { %3615 = vst.msk [vmem:[%s6092_s22 + $0x18] sm:$0xff] %vm562_vm0, %v3597_v32  ;;  %v3563_v27 = vadd.f32 %v4316_v11, %v6084_v53  ;;  %v3464_v2 = vpop.f32.mrb[47].mxu1 }
 0x3f0   : > { %3614 = vst.msk [vmem:[%s6092_s22 + $0x10] sm:$0xff] %vm562_vm0, %v3596_v0  ;;  %v3562_v57 = vadd.f32 %v6084_v53, %v3464_v2 }
 0x3f1   : > { %v3599_v50 = vadd.f32 %v3581_v1, %v3563_v27 }
 0x3f2   : > { %v3598_v25 = vadd.f32 %v3580_v29, %v3562_v57  ;;  %v4319_v19 = vpop.f32.mrb[48].mxu1 }
 0x3f3   : > { %3617 = vst.msk [vmem:[%s6092_s22 + $0x28] sm:$0xff] %vm562_vm0, %v3599_v50  ;;  %v3565_v18 = vadd.f32 %v4319_v19, %v6084_v53  ;;  %v3474_v23 = vpop.f32.mrb[49].mxu1 }
 0x3f4   : > { %3616 = vst.msk [vmem:[%s6092_s22 + $0x20] sm:$0xff] %vm562_vm0, %v3598_v25  ;;  %v3564_v44 = vadd.f32 %v6084_v53, %v3474_v23 }
 0x3f5   : > { %v3601_v63 = vadd.f32 %v3583_v47, %v3565_v18 }
 0x3f6   : > { %v3600_v9 = vadd.f32 %v3582_v42, %v3564_v44  ;;  %v4322_v60 = vpop.f32.mrb[50].mxu1 }
 0x3f7   : > { %3619 = vst.msk [vmem:[%s6092_s22 + $0x38] sm:$0xff] %vm562_vm0, %v3601_v63  ;;  %v3567_v28 = vadd.f32 %v4322_v60, %v6084_v53  ;;  %v3484_v36 = vpop.f32.mrb[51].mxu1 }
 0x3f8   : > { %3618 = vst.msk [vmem:[%s6092_s22 + $0x30] sm:$0xff] %vm562_vm0, %v3600_v9  ;;  %v3566_v56 = vadd.f32 %v6084_v53, %v3484_v36 }
 0x3f9   : > { %v3603_v5 = vadd.f32 %v3585_v35, %v3567_v28 }
 0x3fa   : > { %v3602_v21 = vadd.f32 %v3584_v4, %v3566_v56  ;;  %v4325_v41 = vpop.f32.mrb[52].mxu1 }
 0x3fb   : > { %3621 = vst.msk [vmem:[%s6092_s22 + $0x48] sm:$0xff] %vm562_vm0, %v3603_v5  ;;  %v3569_v59 = vadd.f32 %v4325_v41, %v6084_v53  ;;  %v3494_v45 = vpop.f32.mrb[53].mxu1 }
 0x3fc   : > { %3620 = vst.msk [vmem:[%s6092_s22 + $0x40] sm:$0xff] %vm562_vm0, %v3602_v21  ;;  %v3568_v14 = vadd.f32 %v6084_v53, %v3494_v45 }
 0x3fd   : > { %v3605_v46 = vadd.f32 %v3587_v40, %v3569_v59 }
 0x3fe   : > { %v3604_v38 = vadd.f32 %v3586_v37, %v3568_v14  ;;  %v4328_v16 = vpop.f32.mrb[54].mxu1 }
 0x3ff   : > { %3623 = vst.msk [vmem:[%s6092_s22 + $0x58] sm:$0xff] %vm562_vm0, %v3605_v46  ;;  %v3571_v20 = vadd.f32 %v4328_v16, %v6084_v53  ;;  %v3504_v8 = vpop.f32.mrb[55].mxu1 }
 0x400   : > { %3622 = vst.msk [vmem:[%s6092_s22 + $0x50] sm:$0xff] %vm562_vm0, %v3604_v38  ;;  %v3570_v61 = vadd.f32 %v6084_v53, %v3504_v8 }
 0x401   : > { %v3607_v12 = vadd.f32 %v3589_v24, %v3571_v20 }
 0x402   : > { %v3606_v52 = vadd.f32 %v3588_v3, %v3570_v61  ;;  %v4331_v54 = vpop.f32.mrb[56].mxu1 }
 0x403   : > { %3625 = vst.msk [vmem:[%s6092_s22 + $0x68] sm:$0xff] %vm562_vm0, %v3607_v12  ;;  %v3573_v58 = vadd.f32 %v4331_v54, %v6084_v53  ;;  %v3514_v15 = vpop.f32.mrb[57].mxu1 }
 0x404   : > { %3624 = vst.msk [vmem:[%s6092_s22 + $0x60] sm:$0xff] %vm562_vm0, %v3606_v52  ;;  %v3572_v33 = vadd.f32 %v6084_v53, %v3514_v15 }
 0x405   : > { %v3609_v7 = vadd.f32 %v3591_v22, %v3573_v58 }
 0x406   : > { %v3608_v43 = vadd.f32 %v3590_v31, %v3572_v33  ;;  %v4334_v48 = vpop.f32.mrb[58].mxu1 }
 0x407   : > { %3627 = vst.msk [vmem:[%s6092_s22 + $0x78] sm:$0xff] %vm562_vm0, %v3609_v7  ;;  %v3575_v34 = vadd.f32 %v4334_v48, %v6084_v53  ;;  %v3524_v10 = vpop.f32.mrb[59].mxu1 }
 0x408   : > { %3626 = vst.msk [vmem:[%s6092_s22 + $0x70] sm:$0xff] %vm562_vm0, %v3608_v43  ;;  %v3574_v51 = vadd.f32 %v6084_v53, %v3524_v10 }
 0x409   : > { %v3611_v30 = vadd.f32 %v3593_v55, %v3575_v34 }
 0x40a   : > { %v3610_v39 = vadd.f32 %v3592_v49, %v3574_v51 }
 0x40b   : > { %3629 = vst.msk [vmem:[%s6092_s22 + $0x88] sm:$0xff] %vm562_vm0, %v3611_v30 }
 0x40c   : > { %3628 = vst.msk [vmem:[%s6092_s22 + $0x80] sm:$0xff] %vm562_vm0, %v3610_v39 }
 0x40d PF: > { %s16_s25 = sadd.s32 1, %s4489_s25   ;;  %s6185_s21 = smov %s4481_s23 }
 0x40e   : > { %p13_p8 = scmp.ge.s32.totalorder %s16_s25, 6   ;;  %s6186_s22 = smov %s4485_s24 }
 0x40f   : > { %s6187_s23 = smov %s6190_s26  ;;  %s6188_s24 = smov %s6194_s27 }
 0x410   :  { %15 = sbr.rel (!%p13_p8) target bundleno = 3 (0x3), region = 77 }

</bundles_post_ra>
